<compile_context>
chip_gen: v5e
topology: v5e:2x2
jax: 0.10.0
libtpu: 0.0.40
codegen_flags: <defaults>
</compile_context>

<pallas_src>
import functools
from typing import NamedTuple

import numpy as np
import jax
import jax.numpy as jnp
import jax.scipy.linalg as jsl
from jax.experimental import pallas as pl
from jax.experimental.pallas import tpu as pltpu

ARC_W_VAR = 1.0          # arc-cosine kernel weight variance
EPS = 1e-12              # guard for the norm reciprocal
JITTER = 1e-6            # jitter on Kzz
VAR_FLOOR = 1e-8
LANE = 128
ROWBLK = 16              # row-tile granularity (bf16 sublane packing)
TN_TARGET = 256          # max batch-row tile (v7x-safe VMEM footprint)
VMEM_LIMIT = 32 * 1024 * 1024


# --------------- arc-cos J(c) polynomial (fitted once at init) ---------------
# J(theta) = sin(theta) + (pi - theta) * cos(theta), rewritten in c = cos(theta):
#     J(c) = sqrt(1 - |c|) * g(|c|) + pi * max(c, 0)
#     g(a) = sqrt(1 + a) - a * arccos(a) / sqrt(1 - a)
# g is analytic on [0, 1] (nearest singularity at a = -1), so a degree-6
# polynomial reaches ~1e-5 max error: one EUP sqrt + a short Horner chain per
# element instead of the old 8-term acos polynomial + separate sin term.
def _fit_g_coeffs(deg=6, n_nodes=513):
    t = np.cos(np.pi * (2.0 * np.arange(n_nodes) + 1.0) / (2.0 * n_nodes))
    a = 0.5 * (t + 1.0)                                   # Chebyshev nodes in (0,1)
    u = np.sqrt(0.5 * (1.0 - a))
    # arccos(a)/sqrt(1-a) = sqrt(2) * arcsin(u)/u   (stable near a = 1)
    ratio = np.where(u > 1e-8,
                     np.arcsin(np.minimum(u, 1.0)) / np.maximum(u, 1e-30), 1.0)
    p = np.sqrt(2.0) * ratio
    g = np.sqrt(1.0 + a) - a * p
    coeffs = np.polyfit(a, g, deg)
    assert float(np.max(np.abs(np.polyval(coeffs, a) - g))) < 5e-4
    return tuple(float(c) for c in coeffs)                # highest power first


_G_COEFFS = _fit_g_coeffs()


def _chain_dtype_for_device():
    """bf16 elementwise chain only where the VPU is bf16-native (v6e/v7x)."""
    try:
        kind = jax.devices()[0].device_kind.lower()
    except Exception:
        return jnp.float32
    if any(tag in kind for tag in ("v6", "v7", "7x")):
        return jnp.bfloat16
    return jnp.float32


# ------------------------------ Pallas kernel --------------------------------

def _svgp_kernel(*refs, is_last, has_feed, chain_dtype, coeffs):
    """Fused SVGP layer: arc-cos Kxz assembly + mean (+ variance) matmuls."""
    it = iter(refs)
    f_ref = next(it)
    r_ref = next(it) if has_feed else None
    zf_ref = next(it)
    zr_ref = next(it) if has_feed else None
    a_ref = next(it)
    bh_ref = next(it) if is_last else None
    bl_ref = next(it) if is_last else None
    mean_ref = next(it)
    var_ref = next(it) if is_last else None

    f = f_ref[...]                                                  # (tn, Df) bf16
    ff = f.astype(jnp.float32)
    xsq = jnp.sum(ff * ff, axis=1, keepdims=True)                   # (tn, 1) f32
    dot = jnp.dot(f, zf_ref[...], preferred_element_type=jnp.float32)
    if has_feed:                                                    # in-kernel concat
        rv = r_ref[...]                                             # (tn, Dl) bf16
        rf = rv.astype(jnp.float32)
        xsq = xsq + jnp.sum(rf * rf, axis=1, keepdims=True)
        dot = dot + jnp.dot(rv, zr_ref[...], preferred_element_type=jnp.float32)

    xn = jnp.sqrt(xsq)                                              # (tn, 1)
    inv_xn = 1.0 / (xn + EPS)                                       # exact, (tn,1) only
    c = jnp.clip(dot * inv_xn, -1.0, 1.0).astype(chain_dtype)       # cos(theta)

    # J(theta) via the fitted polynomial (VPU Horner + one EUP sqrt).
    a_abs = jnp.abs(c)
    s = jnp.sqrt(jnp.maximum(1.0 - a_abs, 0.0))
    g = coeffs[0]
    for co in coeffs[1:]:
        g = g * a_abs + co
    j = s * g + jnp.pi * jnp.maximum(c, 0.0)
    kraw = xn.astype(chain_dtype) * j                               # ||x|| * J(theta)

    k_b = kraw.astype(jnp.bfloat16)                                 # MXU operand
    mean = jnp.dot(k_b, a_ref[...], preferred_element_type=jnp.float32)
    mean_ref[...] = mean.astype(mean_ref.dtype)

    if is_last:
        # Split-bf16 B matmul (hi + residual planes), f32 accumulate; the
        # cancellation-sensitive kxx - rowsum subtraction stays f32.
        t = (jnp.dot(k_b, bh_ref[...], preferred_element_type=jnp.float32)
             + jnp.dot(k_b, bl_ref[...], preferred_element_type=jnp.float32))
        quad = jnp.sum(t * kraw.astype(jnp.float32), axis=1, keepdims=True)
        var = jnp.maximum(ARC_W_VAR * xsq - quad, VAR_FLOOR)        # k(x,x)=||x||^2
        var_ref[...] = jnp.broadcast_to(var, var_ref.shape)         # (tn, 128)


# ------------------------------ Pallas wrapper --------------------------------

class LayerMeta(NamedTuple):
    out_dim: int
    din_pad: int
    dlat_pad: int
    dout_pad: int
    m_pad: int
    is_last: bool
    has_feed: bool


def _round_up(x, m):
    return (x + m - 1) // m * m


def _pad2(x, rows, cols):
    return jnp.pad(x, ((0, rows - x.shape[0]), (0, cols - x.shape[1])))


def _svgp_call(f, r, p, meta, *, tn, n_pad, chain_dtype):
    din_pad, dlat_pad = meta.din_pad, meta.dlat_pad
    m_pad, dout_pad = meta.m_pad, meta.dout_pad
    is_last, has_feed = meta.is_last, meta.has_feed

    row = lambda cols: pl.BlockSpec((tn, cols), lambda i: (i, 0))
    full = lambda rr, cc: pl.BlockSpec((rr, cc), lambda i: (0, 0))

    inputs = [f]
    in_specs = [row(din_pad)]
    if has_feed:
        inputs.append(r)
        in_specs.append(row(dlat_pad))
    inputs.append(p["Zf"])
    in_specs.append(full(din_pad, m_pad))
    if has_feed:
        inputs.append(p["Zr"])
        in_specs.append(full(dlat_pad, m_pad))
    inputs.append(p["A"])
    in_specs.append(full(m_pad, dout_pad))
    if is_last:
        inputs += [p["Bh"], p["Bl"]]
        in_specs += [full(m_pad, m_pad), full(m_pad, m_pad)]

    mean_dtype = jnp.float32 if is_last else jnp.bfloat16
    mean_struct = jax.ShapeDtypeStruct((n_pad, dout_pad), mean_dtype)
    mean_spec = row(dout_pad)

    kernel = functools.partial(
        _svgp_kernel, is_last=is_last, has_feed=has_feed,
        chain_dtype=(jnp.float32 if is_last else chain_dtype),
        coeffs=_G_COEFFS)
    cp = pltpu.CompilerParams(dimension_semantics=("parallel",),
                              vmem_limit_bytes=VMEM_LIMIT)
    grid = (n_pad // tn,)

    if is_last:
        var_struct = jax.ShapeDtypeStruct((n_pad, LANE), jnp.float32)
        return pl.pallas_call(
            kernel,
            out_shape=(mean_struct, var_struct),
            grid=grid,
            in_specs=in_specs,
            out_specs=(mean_spec, row(LANE)),
            compiler_params=cp,
        )(*inputs)

    return pl.pallas_call(
        kernel,
        out_shape=mean_struct,
        grid=grid,
        in_specs=in_specs,
        out_specs=mean_spec,
        compiler_params=cp,
    )(*inputs)


# --------------------------- plain-JAX glue / params --------------------------

def _arccos_kernel_matrix(x, y):
    """Order-1 arc-cosine kernel matrix (init-time M x M Kzz only, exact)."""
    xn = jnp.sqrt(jnp.sum(x * x, axis=1, keepdims=True))
    yn = jnp.sqrt(jnp.sum(y * y, axis=1, keepdims=True))
    dot = x @ y.T
    nn = xn * yn.T
    c = jnp.clip(dot / (nn + EPS), -1.0, 1.0)
    theta = jnp.arccos(c)
    j = jnp.sqrt(jnp.maximum(1.0 - c * c, 0.0)) + (jnp.pi - theta) * c
    return (ARC_W_VAR / jnp.pi) * nn * j


def init_dgplvm(key, *, input_dim, hidden_dim, output_dim, speaker_code_dim,
                speaker_latent_dim, num_hidden_layers, feed_layer_indices,
                num_inducing):
    s_arc = float(ARC_W_VAR / np.pi)
    layers, metas = [], []
    keys = jax.random.split(key, num_hidden_layers + 2)
    m_pad = _round_up(num_inducing, LANE)
    dlat_pad = _round_up(speaker_latent_dim, LANE)
    for i in range(num_hidden_layers + 1):
        din_feat = input_dim if i == 0 else hidden_dim
        out_dim = output_dim if i == num_hidden_layers else hidden_dim
        s_val = 1.0 if i == num_hidden_layers else 1e-6       # initial_q_S_value
        has_feed = i in feed_layer_indices                    # mode == 'concat'
        in_dim = din_feat + (speaker_latent_dim if has_feed else 0)
        is_last = i == num_hidden_layers

        kz, kq = jax.random.split(keys[i])
        z = jax.random.normal(kz, (num_inducing, in_dim), jnp.float32)
        q_mu = 0.1 * jax.random.normal(kq, (num_inducing, out_dim), jnp.float32)
        kzz = (_arccos_kernel_matrix(z, z)
               + JITTER * jnp.eye(num_inducing, dtype=jnp.float32))
        chol = jnp.linalg.cholesky(kzz)
        eye = jnp.eye(num_inducing, dtype=jnp.float32)
        kzz_inv = jsl.cho_solve((chol, True), eye)
        a = jsl.cho_solve((chol, True), q_mu)                 # Kzz^-1 q_mu
        b = kzz_inv - s_val * (kzz_inv @ kzz_inv)             # Kzz^-1 - Kzz^-1 S Kzz^-1

        zn = jnp.sqrt(jnp.sum(z * z, axis=1, keepdims=True))  # (M, 1)
        zhat = z / zn                                         # unit-norm rows
        din_pad = _round_up(din_feat, LANE)
        dout_pad = _round_up(out_dim, LANE)

        layer = dict(
            # Z^T split into feature / latent row blocks, norms folded out.
            Zf=_pad2(zhat[:, :din_feat], m_pad, din_pad).T.astype(jnp.bfloat16),
            # A' = (w/pi) * diag(||z||) * (Kzz^-1 q_mu)
            A=(s_arc * _pad2(zn * a, m_pad, dout_pad)).astype(jnp.bfloat16),
        )
        if has_feed:
            layer["Zr"] = _pad2(zhat[:, din_feat:], m_pad,
                                dlat_pad).T.astype(jnp.bfloat16)
        if is_last:
            # B' = (w/pi)^2 * (||z|| ||z||^T) .* B, stored as two bf16 planes.
            bs = (s_arc * s_arc) * (zn * zn.T) * b
            b_full = _pad2(bs, m_pad, m_pad)
            b_hi = b_full.astype(jnp.bfloat16)
            layer["Bh"] = b_hi
            layer["Bl"] = (b_full - b_hi.astype(jnp.float32)).astype(jnp.bfloat16)

        layers.append(layer)
        metas.append(LayerMeta(out_dim, din_pad, dlat_pad if has_feed else 0,
                               dout_pad, m_pad, is_last, has_feed))
    mu = jax.random.normal(keys[-1], (speaker_code_dim, speaker_latent_dim),
                           jnp.float32)
    return dict(layers=layers, mu=mu), tuple(metas)


def dgplvm_forward(params, x, *, metas, speaker_code_dim):
    n = x.shape[0]
    speaker_code = x[:, -speaker_code_dim:]
    f = x[:, :-speaker_code_dim]
    indices = jnp.argmax(speaker_code, axis=1)
    r = params["mu"][indices]                                 # eval mode: r = mu
    chain_dtype = _chain_dtype_for_device()

    # >= 2 grid steps (v7x dual TC), row tile a multiple of 16 (bf16 packing).
    tn = max(ROWBLK, min(TN_TARGET, _round_up((n + 1) // 2, ROWBLK)))
    n_pad = _round_up(n, tn)

    # Activations stay padded bf16 across layers; no per-layer XLA pad/slice.
    cur = _pad2(f, n_pad, metas[0].din_pad).astype(jnp.bfloat16)
    dlat_pad = max(m.dlat_pad for m in metas)
    r_pad = (_pad2(r, n_pad, dlat_pad).astype(jnp.bfloat16)
             if dlat_pad > 0 else None)

    for layer, meta in zip(params["layers"], metas):
        rin = r_pad if meta.has_feed else None
        out = _svgp_call(cur, rin, layer, meta, tn=tn, n_pad=n_pad,
                         chain_dtype=chain_dtype)
        if meta.is_last:
            mean_p, var_p = out
            mean = mean_p[:n, :meta.out_dim]
            var = jnp.broadcast_to(var_p[:n, :1], (n, meta.out_dim))
            return mean, var
        cur = out                                             # padded bf16


# ----------------------------------- demo -------------------------------------

if __name__ == "__main__":
    # Scaled-down analogue of DGPLVM(input_dim=535, hidden_dim=128,
    # output_dim=187, speaker_code_dim=100, hidden_gp_inducing_size=1024).
    INPUT_DIM = 48
    HIDDEN_DIM = 32
    OUTPUT_DIM = 24
    SPEAKER_CODE_DIM = 8
    SPEAKER_LATENT_DIM = 16
    NUM_HIDDEN_LAYERS = 5
    FEED_LAYER_INDICES = (1, 2, 3, 4, 5)
    NUM_INDUCING = 64
    N = 64

    key = jax.random.PRNGKey(0)
    kp, kx = jax.random.split(key)
    params, metas = init_dgplvm(
        kp,
        input_dim=INPUT_DIM,
        hidden_dim=HIDDEN_DIM,
        output_dim=OUTPUT_DIM,
        speaker_code_dim=SPEAKER_CODE_DIM,
        speaker_latent_dim=SPEAKER_LATENT_DIM,
        num_hidden_layers=NUM_HIDDEN_LAYERS,
        feed_layer_indices=FEED_LAYER_INDICES,
        num_inducing=NUM_INDUCING,
    )
    x = jax.random.normal(kx, (N, INPUT_DIM + SPEAKER_CODE_DIM), jnp.float32)

    fwd = jax.jit(functools.partial(
        dgplvm_forward,
        metas=metas,
        speaker_code_dim=SPEAKER_CODE_DIM,
    ))
    mean, var = fwd(params, x)
    mean, var = jax.block_until_ready((mean, var))

    assert mean.shape == (N, OUTPUT_DIM), mean.shape
    assert var.shape == (N, OUTPUT_DIM), var.shape
    assert bool(jnp.all(jnp.isfinite(mean))) and bool(jnp.all(jnp.isfinite(var)))
    assert bool(jnp.all(var > 0.0))
    print("KERNEL_OK")
</pallas_src>

<mosaic_0001>
module attributes {stable_mosaic.version = 11 : i64} {
  func.func @_svgp_kernel(%arg0: i32, %arg1: memref<32x128xbf16, #tpu.memory_space<vmem>>, %arg2: memref<32x128xbf16, #tpu.memory_space<vmem>>, %arg3: memref<128x128xbf16, #tpu.memory_space<vmem>>, %arg4: memref<128x128xbf16, #tpu.memory_space<vmem>>, %arg5: memref<128x128xbf16, #tpu.memory_space<vmem>>, %arg6: memref<32x128xbf16, #tpu.memory_space<vmem>>) attributes {dimension_semantics = [#tpu.dimension_semantics<parallel>], iteration_bounds = array<i64: 2>, scalar_prefetch = 0 : i64, scratch_operands = 0 : i64, tpu.core_type = #tpu.core_type<tc>, window_params = [{transform_indices = @transform_0, window_bounds = array<i64: 32, 128>}, {transform_indices = @transform_1, window_bounds = array<i64: 32, 128>}, {pipeline_mode = #tpu.pipeline_mode<synchronous>, transform_indices = @transform_2, window_bounds = array<i64: 128, 128>}, {pipeline_mode = #tpu.pipeline_mode<synchronous>, transform_indices = @transform_3, window_bounds = array<i64: 128, 128>}, {pipeline_mode = #tpu.pipeline_mode<synchronous>, transform_indices = @transform_4, window_bounds = array<i64: 128, 128>}, {transform_indices = @transform_5, window_bounds = array<i64: 32, 128>}]} {
    %c0 = arith.constant 0 : index
    %c0_0 = arith.constant 0 : index
    %0 = vector.load %arg1[%c0, %c0_0] : memref<32x128xbf16, #tpu.memory_space<vmem>>, vector<32x128xbf16>
    %1 = arith.extf %0 : vector<32x128xbf16> to vector<32x128xf32>
    %2 = arith.mulf %1, %1 : vector<32x128xf32>
    %cst = arith.constant dense<0.000000e+00> : vector<32xf32>
    %3 = vector.multi_reduction <add>, %2, %cst [1] : vector<32x128xf32> to vector<32xf32>
    %4 = vector.shape_cast %3 : vector<32xf32> to vector<32x1xf32>
    %c0_1 = arith.constant 0 : index
    %c0_2 = arith.constant 0 : index
    %5 = vector.load %arg3[%c0_1, %c0_2] : memref<128x128xbf16, #tpu.memory_space<vmem>>, vector<128x128xbf16>
    %cst_3 = arith.constant dense<0.000000e+00> : vector<32x128xf32>
    %6 = tpu.matmul %0, %5, %cst_3 {dimension_numbers = #tpu.dot_dimension_numbers<[1], [0], [0], [1], [0, 0, 1, 1], [], []>} : vector<32x128xbf16>, vector<128x128xbf16>, vector<32x128xf32> -> vector<32x128xf32>
    %c0_4 = arith.constant 0 : index
    %c0_5 = arith.constant 0 : index
    %7 = vector.load %arg2[%c0_4, %c0_5] : memref<32x128xbf16, #tpu.memory_space<vmem>>, vector<32x128xbf16>
    %8 = arith.extf %7 : vector<32x128xbf16> to vector<32x128xf32>
    %9 = arith.mulf %8, %8 : vector<32x128xf32>
    %cst_6 = arith.constant dense<0.000000e+00> : vector<32xf32>
    %10 = vector.multi_reduction <add>, %9, %cst_6 [1] : vector<32x128xf32> to vector<32xf32>
    %11 = vector.shape_cast %10 : vector<32xf32> to vector<32x1xf32>
    %12 = arith.addf %4, %11 : vector<32x1xf32>
    %c0_7 = arith.constant 0 : index
    %c0_8 = arith.constant 0 : index
    %13 = vector.load %arg4[%c0_7, %c0_8] : memref<128x128xbf16, #tpu.memory_space<vmem>>, vector<128x128xbf16>
    %cst_9 = arith.constant dense<0.000000e+00> : vector<32x128xf32>
    %14 = tpu.matmul %7, %13, %cst_9 {dimension_numbers = #tpu.dot_dimension_numbers<[1], [0], [0], [1], [0, 0, 1, 1], [], []>} : vector<32x128xbf16>, vector<128x128xbf16>, vector<32x128xf32> -> vector<32x128xf32>
    %15 = arith.addf %6, %14 : vector<32x128xf32>
    %16 = math.sqrt %12 : vector<32x1xf32>
    %cst_10 = arith.constant 9.99999996E-13 : f32
    %17 = vector.broadcast %cst_10 : f32 to vector<32x1xf32>
    %18 = arith.addf %16, %17 : vector<32x1xf32>
    %cst_11 = arith.constant 1.000000e+00 : f32
    %19 = vector.broadcast %cst_11 : f32 to vector<32x1xf32>
    %20 = arith.divf %19, %18 : vector<32x1xf32>
    %21 = vector.broadcast %20 : vector<32x1xf32> to vector<32x128xf32>
    %22 = arith.mulf %15, %21 : vector<32x128xf32>
    %cst_12 = arith.constant -1.000000e+00 : f32
    %cst_13 = arith.constant 1.000000e+00 : f32
    %23 = vector.broadcast %cst_12 : f32 to vector<32x128xf32>
    %24 = arith.maximumf %23, %22 : vector<32x128xf32>
    %25 = vector.broadcast %cst_13 : f32 to vector<32x128xf32>
    %26 = arith.minimumf %25, %24 : vector<32x128xf32>
    %27 = math.absf %26 : vector<32x128xf32>
    %cst_14 = arith.constant 1.000000e+00 : f32
    %28 = vector.broadcast %cst_14 : f32 to vector<32x128xf32>
    %29 = arith.subf %28, %27 : vector<32x128xf32>
    %cst_15 = arith.constant 0.000000e+00 : f32
    %30 = vector.broadcast %cst_15 : f32 to vector<32x128xf32>
    %31 = arith.maximumf %29, %30 : vector<32x128xf32>
    %32 = math.sqrt %31 : vector<32x128xf32>
    %cst_16 = arith.constant 6.5347791E-4 : f32
    %33 = vector.broadcast %cst_16 : f32 to vector<32x128xf32>
    %34 = arith.mulf %33, %27 : vector<32x128xf32>
    %cst_17 = arith.constant -0.00350793544 : f32
    %35 = vector.broadcast %cst_17 : f32 to vector<32x128xf32>
    %36 = arith.addf %34, %35 : vector<32x128xf32>
    %37 = arith.mulf %36, %27 : vector<32x128xf32>
    %cst_18 = arith.constant 0.0101949209 : f32
    %38 = vector.broadcast %cst_18 : f32 to vector<32x128xf32>
    %39 = arith.addf %37, %38 : vector<32x128xf32>
    %40 = arith.mulf %39, %27 : vector<32x128xf32>
    %cst_19 = arith.constant -0.0260781329 : f32
    %41 = vector.broadcast %cst_19 : f32 to vector<32x128xf32>
    %42 = arith.addf %40, %41 : vector<32x128xf32>
    %43 = arith.mulf %42, %27 : vector<32x128xf32>
    %cst_20 = arith.constant 0.0895298272 : f32
    %44 = vector.broadcast %cst_20 : f32 to vector<32x128xf32>
    %45 = arith.addf %43, %44 : vector<32x128xf32>
    %46 = arith.mulf %45, %27 : vector<32x128xf32>
    %cst_21 = arith.constant -1.07079208 : f32
    %47 = vector.broadcast %cst_21 : f32 to vector<32x128xf32>
    %48 = arith.addf %46, %47 : vector<32x128xf32>
    %49 = arith.mulf %48, %27 : vector<32x128xf32>
    %cst_22 = arith.constant 0.99999994 : f32
    %50 = vector.broadcast %cst_22 : f32 to vector<32x128xf32>
    %51 = arith.addf %49, %50 : vector<32x128xf32>
    %52 = arith.mulf %32, %51 : vector<32x128xf32>
    %cst_23 = arith.constant 0.000000e+00 : f32
    %53 = vector.broadcast %cst_23 : f32 to vector<32x128xf32>
    %54 = arith.maximumf %26, %53 : vector<32x128xf32>
    %cst_24 = arith.constant 3.14159274 : f32
    %55 = vector.broadcast %cst_24 : f32 to vector<32x128xf32>
    %56 = arith.mulf %55, %54 : vector<32x128xf32>
    %57 = arith.addf %52, %56 : vector<32x128xf32>
    %58 = vector.broadcast %16 : vector<32x1xf32> to vector<32x128xf32>
    %59 = arith.mulf %58, %57 : vector<32x128xf32>
    %60 = arith.truncf %59 : vector<32x128xf32> to vector<32x128xbf16>
    %c0_25 = arith.constant 0 : index
    %c0_26 = arith.constant 0 : index
    %61 = vector.load %arg5[%c0_25, %c0_26] : memref<128x128xbf16, #tpu.memory_space<vmem>>, vector<128x128xbf16>
    %cst_27 = arith.constant dense<0.000000e+00> : vector<32x128xf32>
    %62 = tpu.matmul %60, %61, %cst_27 {dimension_numbers = #tpu.dot_dimension_numbers<[1], [0], [0], [1], [0, 0, 1, 1], [], []>} : vector<32x128xbf16>, vector<128x128xbf16>, vector<32x128xf32> -> vector<32x128xf32>
    %63 = arith.truncf %62 : vector<32x128xf32> to vector<32x128xbf16>
    %c0_28 = arith.constant 0 : index
    %c0_29 = arith.constant 0 : index
    %64 = vector.load %arg6[%c0_28, %c0_29] : memref<32x128xbf16, #tpu.memory_space<vmem>>, vector<32x128xbf16>
    tpu.vector_store %arg6[%c0_28, %c0_29], %63 {strides = array<i32>} : memref<32x128xbf16, #tpu.memory_space<vmem>>, vector<32x128xbf16>,
    return
  }
  func.func @transform_0(%arg0: i32) -> (i32, i32) {
    %c0_i32 = arith.constant 0 : i32
    %c0_i32_0 = arith.constant 0 : i32
    return %arg0, %c0_i32 : i32, i32
  }
  func.func @transform_1(%arg0: i32) -> (i32, i32) {
    %c0_i32 = arith.constant 0 : i32
    %c0_i32_0 = arith.constant 0 : i32
    return %arg0, %c0_i32 : i32, i32
  }
  func.func @transform_2(%arg0: i32) -> (i32, i32) {
    %c0_i32 = arith.constant 0 : i32
    %c0_i32_0 = arith.constant 0 : i32
    %c0_i32_1 = arith.constant 0 : i32
    return %c0_i32, %c0_i32_0 : i32, i32
  }
  func.func @transform_3(%arg0: i32) -> (i32, i32) {
    %c0_i32 = arith.constant 0 : i32
    %c0_i32_0 = arith.constant 0 : i32
    %c0_i32_1 = arith.constant 0 : i32
    return %c0_i32, %c0_i32_0 : i32, i32
  }
  func.func @transform_4(%arg0: i32) -> (i32, i32) {
    %c0_i32 = arith.constant 0 : i32
    %c0_i32_0 = arith.constant 0 : i32
    %c0_i32_1 = arith.constant 0 : i32
    return %c0_i32, %c0_i32_0 : i32, i32
  }
  func.func @transform_5(%arg0: i32) -> (i32, i32) {
    %c0_i32 = arith.constant 0 : i32
    %c0_i32_0 = arith.constant 0 : i32
    return %arg0, %c0_i32 : i32, i32
  }
}

module attributes {stable_mosaic.version = 11 : i64} {
  func.func @_svgp_kernel(%arg0: i32, %arg1: memref<32x128xbf16, #tpu.memory_space<vmem>>, %arg2: memref<32x128xbf16, #tpu.memory_space<vmem>>, %arg3: memref<128x128xbf16, #tpu.memory_space<vmem>>, %arg4: memref<128x128xbf16, #tpu.memory_space<vmem>>, %arg5: memref<128x128xbf16, #tpu.memory_space<vmem>>, %arg6: memref<32x128xbf16, #tpu.memory_space<vmem>>) attributes {dimension_semantics = [#tpu.dimension_semantics<parallel>], iteration_bounds = array<i64: 2>, scalar_prefetch = 0 : i64, scratch_operands = 0 : i64, tpu.core_type = #tpu.core_type<tc>, window_params = [{transform_indices = @transform_0, window_bounds = array<i64: 32, 128>}, {transform_indices = @transform_1, window_bounds = array<i64: 32, 128>}, {pipeline_mode = #tpu.pipeline_mode<synchronous>, transform_indices = @transform_2, window_bounds = array<i64: 128, 128>}, {pipeline_mode = #tpu.pipeline_mode<synchronous>, transform_indices = @transform_3, window_bounds = array<i64: 128, 128>}, {pipeline_mode = #tpu.pipeline_mode<synchronous>, transform_indices = @transform_4, window_bounds = array<i64: 128, 128>}, {transform_indices = @transform_5, window_bounds = array<i64: 32, 128>}]} {
    %c0 = arith.constant 0 : index
    %c0_0 = arith.constant 0 : index
    %0 = vector.load %arg1[%c0, %c0_0] : memref<32x128xbf16, #tpu.memory_space<vmem>>, vector<32x128xbf16>
    %1 = arith.extf %0 : vector<32x128xbf16> to vector<32x128xf32>
    %2 = arith.mulf %1, %1 : vector<32x128xf32>
    %cst = arith.constant dense<0.000000e+00> : vector<32xf32>
    %3 = vector.multi_reduction <add>, %2, %cst [1] : vector<32x128xf32> to vector<32xf32>
    %4 = vector.shape_cast %3 : vector<32xf32> to vector<32x1xf32>
    %c0_1 = arith.constant 0 : index
    %c0_2 = arith.constant 0 : index
    %5 = vector.load %arg3[%c0_1, %c0_2] : memref<128x128xbf16, #tpu.memory_space<vmem>>, vector<128x128xbf16>
    %cst_3 = arith.constant dense<0.000000e+00> : vector<32x128xf32>
    %6 = tpu.matmul %0, %5, %cst_3 {dimension_numbers = #tpu.dot_dimension_numbers<[1], [0], [0], [1], [0, 0, 1, 1], [], []>} : vector<32x128xbf16>, vector<128x128xbf16>, vector<32x128xf32> -> vector<32x128xf32>
    %c0_4 = arith.constant 0 : index
    %c0_5 = arith.constant 0 : index
    %7 = vector.load %arg2[%c0_4, %c0_5] : memref<32x128xbf16, #tpu.memory_space<vmem>>, vector<32x128xbf16>
    %8 = arith.extf %7 : vector<32x128xbf16> to vector<32x128xf32>
    %9 = arith.mulf %8, %8 : vector<32x128xf32>
    %cst_6 = arith.constant dense<0.000000e+00> : vector<32xf32>
    %10 = vector.multi_reduction <add>, %9, %cst_6 [1] : vector<32x128xf32> to vector<32xf32>
    %11 = vector.shape_cast %10 : vector<32xf32> to vector<32x1xf32>
    %12 = arith.addf %4, %11 : vector<32x1xf32>
    %c0_7 = arith.constant 0 : index
    %c0_8 = arith.constant 0 : index
    %13 = vector.load %arg4[%c0_7, %c0_8] : memref<128x128xbf16, #tpu.memory_space<vmem>>, vector<128x128xbf16>
    %cst_9 = arith.constant dense<0.000000e+00> : vector<32x128xf32>
    %14 = tpu.matmul %7, %13, %cst_9 {dimension_numbers = #tpu.dot_dimension_numbers<[1], [0], [0], [1], [0, 0, 1, 1], [], []>} : vector<32x128xbf16>, vector<128x128xbf16>, vector<32x128xf32> -> vector<32x128xf32>
    %15 = arith.addf %6, %14 : vector<32x128xf32>
    %16 = math.sqrt %12 : vector<32x1xf32>
    %cst_10 = arith.constant 9.99999996E-13 : f32
    %17 = vector.broadcast %cst_10 : f32 to vector<32x1xf32>
    %18 = arith.addf %16, %17 : vector<32x1xf32>
    %cst_11 = arith.constant 1.000000e+00 : f32
    %19 = vector.broadcast %cst_11 : f32 to vector<32x1xf32>
    %20 = arith.divf %19, %18 : vector<32x1xf32>
    %21 = vector.broadcast %20 : vector<32x1xf32> to vector<32x128xf32>
    %22 = arith.mulf %15, %21 : vector<32x128xf32>
    %cst_12 = arith.constant -1.000000e+00 : f32
    %cst_13 = arith.constant 1.000000e+00 : f32
    %23 = vector.broadcast %cst_12 : f32 to vector<32x128xf32>
    %24 = arith.maximumf %23, %22 : vector<32x128xf32>
    %25 = vector.broadcast %cst_13 : f32 to vector<32x128xf32>
    %26 = arith.minimumf %25, %24 : vector<32x128xf32>
    %27 = math.absf %26 : vector<32x128xf32>
    %cst_14 = arith.constant 1.000000e+00 : f32
    %28 = vector.broadcast %cst_14 : f32 to vector<32x128xf32>
    %29 = arith.subf %28, %27 : vector<32x128xf32>
    %cst_15 = arith.constant 0.000000e+00 : f32
    %30 = vector.broadcast %cst_15 : f32 to vector<32x128xf32>
    %31 = arith.maximumf %29, %30 : vector<32x128xf32>
    %32 = math.sqrt %31 : vector<32x128xf32>
    %cst_16 = arith.constant 6.5347791E-4 : f32
    %33 = vector.broadcast %cst_16 : f32 to vector<32x128xf32>
    %34 = arith.mulf %33, %27 : vector<32x128xf32>
    %cst_17 = arith.constant -0.00350793544 : f32
    %35 = vector.broadcast %cst_17 : f32 to vector<32x128xf32>
    %36 = arith.addf %34, %35 : vector<32x128xf32>
    %37 = arith.mulf %36, %27 : vector<32x128xf32>
    %cst_18 = arith.constant 0.0101949209 : f32
    %38 = vector.broadcast %cst_18 : f32 to vector<32x128xf32>
    %39 = arith.addf %37, %38 : vector<32x128xf32>
    %40 = arith.mulf %39, %27 : vector<32x128xf32>
    %cst_19 = arith.constant -0.0260781329 : f32
    %41 = vector.broadcast %cst_19 : f32 to vector<32x128xf32>
    %42 = arith.addf %40, %41 : vector<32x128xf32>
    %43 = arith.mulf %42, %27 : vector<32x128xf32>
    %cst_20 = arith.constant 0.0895298272 : f32
    %44 = vector.broadcast %cst_20 : f32 to vector<32x128xf32>
    %45 = arith.addf %43, %44 : vector<32x128xf32>
    %46 = arith.mulf %45, %27 : vector<32x128xf32>
    %cst_21 = arith.constant -1.07079208 : f32
    %47 = vector.broadcast %cst_21 : f32 to vector<32x128xf32>
    %48 = arith.addf %46, %47 : vector<32x128xf32>
    %49 = arith.mulf %48, %27 : vector<32x128xf32>
    %cst_22 = arith.constant 0.99999994 : f32
    %50 = vector.broadcast %cst_22 : f32 to vector<32x128xf32>
    %51 = arith.addf %49, %50 : vector<32x128xf32>
    %52 = arith.mulf %32, %51 : vector<32x128xf32>
    %cst_23 = arith.constant 0.000000e+00 : f32
    %53 = vector.broadcast %cst_23 : f32 to vector<32x128xf32>
    %54 = arith.maximumf %26, %53 : vector<32x128xf32>
    %cst_24 = arith.constant 3.14159274 : f32
    %55 = vector.broadcast %cst_24 : f32 to vector<32x128xf32>
    %56 = arith.mulf %55, %54 : vector<32x128xf32>
    %57 = arith.addf %52, %56 : vector<32x128xf32>
    %58 = vector.broadcast %16 : vector<32x1xf32> to vector<32x128xf32>
    %59 = arith.mulf %58, %57 : vector<32x128xf32>
    %60 = arith.truncf %59 : vector<32x128xf32> to vector<32x128xbf16>
    %c0_25 = arith.constant 0 : index
    %c0_26 = arith.constant 0 : index
    %61 = vector.load %arg5[%c0_25, %c0_26] : memref<128x128xbf16, #tpu.memory_space<vmem>>, vector<128x128xbf16>
    %cst_27 = arith.constant dense<0.000000e+00> : vector<32x128xf32>
    %62 = tpu.matmul %60, %61, %cst_27 {dimension_numbers = #tpu.dot_dimension_numbers<[1], [0], [0], [1], [0, 0, 1, 1], [], []>} : vector<32x128xbf16>, vector<128x128xbf16>, vector<32x128xf32> -> vector<32x128xf32>
    %63 = arith.truncf %62 : vector<32x128xf32> to vector<32x128xbf16>
    %c0_28 = arith.constant 0 : index
    %c0_29 = arith.constant 0 : index
    %64 = vector.load %arg6[%c0_28, %c0_29] : memref<32x128xbf16, #tpu.memory_space<vmem>>, vector<32x128xbf16>
    tpu.vector_store %arg6[%c0_28, %c0_29], %63 {strides = array<i32>} : memref<32x128xbf16, #tpu.memory_space<vmem>>, vector<32x128xbf16>,
    return
  }
  func.func @transform_0(%arg0: i32) -> (i32, i32) {
    %c0_i32 = arith.constant 0 : i32
    %c0_i32_0 = arith.constant 0 : i32
    return %arg0, %c0_i32 : i32, i32
  }
  func.func @transform_1(%arg0: i32) -> (i32, i32) {
    %c0_i32 = arith.constant 0 : i32
    %c0_i32_0 = arith.constant 0 : i32
    return %arg0, %c0_i32 : i32, i32
  }
  func.func @transform_2(%arg0: i32) -> (i32, i32) {
    %c0_i32 = arith.constant 0 : i32
    %c0_i32_0 = arith.constant 0 : i32
    %c0_i32_1 = arith.constant 0 : i32
    return %c0_i32, %c0_i32_0 : i32, i32
  }
  func.func @transform_3(%arg0: i32) -> (i32, i32) {
    %c0_i32 = arith.constant 0 : i32
    %c0_i32_0 = arith.constant 0 : i32
    %c0_i32_1 = arith.constant 0 : i32
    return %c0_i32, %c0_i32_0 : i32, i32
  }
  func.func @transform_4(%arg0: i32) -> (i32, i32) {
    %c0_i32 = arith.constant 0 : i32
    %c0_i32_0 = arith.constant 0 : i32
    %c0_i32_1 = arith.constant 0 : i32
    return %c0_i32, %c0_i32_0 : i32, i32
  }
  func.func @transform_5(%arg0: i32) -> (i32, i32) {
    %c0_i32 = arith.constant 0 : i32
    %c0_i32_0 = arith.constant 0 : i32
    return %arg0, %c0_i32 : i32, i32
  }
}

module attributes {stable_mosaic.version = 11 : i64} {
  func.func @_svgp_kernel(%arg0: i32, %arg1: memref<32x128xbf16, #tpu.memory_space<vmem>>, %arg2: memref<128x128xbf16, #tpu.memory_space<vmem>>, %arg3: memref<128x128xbf16, #tpu.memory_space<vmem>>, %arg4: memref<32x128xbf16, #tpu.memory_space<vmem>>) attributes {dimension_semantics = [#tpu.dimension_semantics<parallel>], iteration_bounds = array<i64: 2>, scalar_prefetch = 0 : i64, scratch_operands = 0 : i64, tpu.core_type = #tpu.core_type<tc>, window_params = [{transform_indices = @transform_0, window_bounds = array<i64: 32, 128>}, {pipeline_mode = #tpu.pipeline_mode<synchronous>, transform_indices = @transform_1, window_bounds = array<i64: 128, 128>}, {pipeline_mode = #tpu.pipeline_mode<synchronous>, transform_indices = @transform_2, window_bounds = array<i64: 128, 128>}, {transform_indices = @transform_3, window_bounds = array<i64: 32, 128>}]} {
    %c0 = arith.constant 0 : index
    %c0_0 = arith.constant 0 : index
    %0 = vector.load %arg1[%c0, %c0_0] : memref<32x128xbf16, #tpu.memory_space<vmem>>, vector<32x128xbf16>
    %1 = arith.extf %0 : vector<32x128xbf16> to vector<32x128xf32>
    %2 = arith.mulf %1, %1 : vector<32x128xf32>
    %cst = arith.constant dense<0.000000e+00> : vector<32xf32>
    %3 = vector.multi_reduction <add>, %2, %cst [1] : vector<32x128xf32> to vector<32xf32>
    %4 = vector.shape_cast %3 : vector<32xf32> to vector<32x1xf32>
    %c0_1 = arith.constant 0 : index
    %c0_2 = arith.constant 0 : index
    %5 = vector.load %arg2[%c0_1, %c0_2] : memref<128x128xbf16, #tpu.memory_space<vmem>>, vector<128x128xbf16>
    %cst_3 = arith.constant dense<0.000000e+00> : vector<32x128xf32>
    %6 = tpu.matmul %0, %5, %cst_3 {dimension_numbers = #tpu.dot_dimension_numbers<[1], [0], [0], [1], [0, 0, 1, 1], [], []>} : vector<32x128xbf16>, vector<128x128xbf16>, vector<32x128xf32> -> vector<32x128xf32>
    %7 = math.sqrt %4 : vector<32x1xf32>
    %cst_4 = arith.constant 9.99999996E-13 : f32
    %8 = vector.broadcast %cst_4 : f32 to vector<32x1xf32>
    %9 = arith.addf %7, %8 : vector<32x1xf32>
    %cst_5 = arith.constant 1.000000e+00 : f32
    %10 = vector.broadcast %cst_5 : f32 to vector<32x1xf32>
    %11 = arith.divf %10, %9 : vector<32x1xf32>
    %12 = vector.broadcast %11 : vector<32x1xf32> to vector<32x128xf32>
    %13 = arith.mulf %6, %12 : vector<32x128xf32>
    %cst_6 = arith.constant -1.000000e+00 : f32
    %cst_7 = arith.constant 1.000000e+00 : f32
    %14 = vector.broadcast %cst_6 : f32 to vector<32x128xf32>
    %15 = arith.maximumf %14, %13 : vector<32x128xf32>
    %16 = vector.broadcast %cst_7 : f32 to vector<32x128xf32>
    %17 = arith.minimumf %16, %15 : vector<32x128xf32>
    %18 = math.absf %17 : vector<32x128xf32>
    %cst_8 = arith.constant 1.000000e+00 : f32
    %19 = vector.broadcast %cst_8 : f32 to vector<32x128xf32>
    %20 = arith.subf %19, %18 : vector<32x128xf32>
    %cst_9 = arith.constant 0.000000e+00 : f32
    %21 = vector.broadcast %cst_9 : f32 to vector<32x128xf32>
    %22 = arith.maximumf %20, %21 : vector<32x128xf32>
    %23 = math.sqrt %22 : vector<32x128xf32>
    %cst_10 = arith.constant 6.5347791E-4 : f32
    %24 = vector.broadcast %cst_10 : f32 to vector<32x128xf32>
    %25 = arith.mulf %24, %18 : vector<32x128xf32>
    %cst_11 = arith.constant -0.00350793544 : f32
    %26 = vector.broadcast %cst_11 : f32 to vector<32x128xf32>
    %27 = arith.addf %25, %26 : vector<32x128xf32>
    %28 = arith.mulf %27, %18 : vector<32x128xf32>
    %cst_12 = arith.constant 0.0101949209 : f32
    %29 = vector.broadcast %cst_12 : f32 to vector<32x128xf32>
    %30 = arith.addf %28, %29 : vector<32x128xf32>
    %31 = arith.mulf %30, %18 : vector<32x128xf32>
    %cst_13 = arith.constant -0.0260781329 : f32
    %32 = vector.broadcast %cst_13 : f32 to vector<32x128xf32>
    %33 = arith.addf %31, %32 : vector<32x128xf32>
    %34 = arith.mulf %33, %18 : vector<32x128xf32>
    %cst_14 = arith.constant 0.0895298272 : f32
    %35 = vector.broadcast %cst_14 : f32 to vector<32x128xf32>
    %36 = arith.addf %34, %35 : vector<32x128xf32>
    %37 = arith.mulf %36, %18 : vector<32x128xf32>
    %cst_15 = arith.constant -1.07079208 : f32
    %38 = vector.broadcast %cst_15 : f32 to vector<32x128xf32>
    %39 = arith.addf %37, %38 : vector<32x128xf32>
    %40 = arith.mulf %39, %18 : vector<32x128xf32>
    %cst_16 = arith.constant 0.99999994 : f32
    %41 = vector.broadcast %cst_16 : f32 to vector<32x128xf32>
    %42 = arith.addf %40, %41 : vector<32x128xf32>
    %43 = arith.mulf %23, %42 : vector<32x128xf32>
    %cst_17 = arith.constant 0.000000e+00 : f32
    %44 = vector.broadcast %cst_17 : f32 to vector<32x128xf32>
    %45 = arith.maximumf %17, %44 : vector<32x128xf32>
    %cst_18 = arith.constant 3.14159274 : f32
    %46 = vector.broadcast %cst_18 : f32 to vector<32x128xf32>
    %47 = arith.mulf %46, %45 : vector<32x128xf32>
    %48 = arith.addf %43, %47 : vector<32x128xf32>
    %49 = vector.broadcast %7 : vector<32x1xf32> to vector<32x128xf32>
    %50 = arith.mulf %49, %48 : vector<32x128xf32>
    %51 = arith.truncf %50 : vector<32x128xf32> to vector<32x128xbf16>
    %c0_19 = arith.constant 0 : index
    %c0_20 = arith.constant 0 : index
    %52 = vector.load %arg3[%c0_19, %c0_20] : memref<128x128xbf16, #tpu.memory_space<vmem>>, vector<128x128xbf16>
    %cst_21 = arith.constant dense<0.000000e+00> : vector<32x128xf32>
    %53 = tpu.matmul %51, %52, %cst_21 {dimension_numbers = #tpu.dot_dimension_numbers<[1], [0], [0], [1], [0, 0, 1, 1], [], []>} : vector<32x128xbf16>, vector<128x128xbf16>, vector<32x128xf32> -> vector<32x128xf32>
    %54 = arith.truncf %53 : vector<32x128xf32> to vector<32x128xbf16>
    %c0_22 = arith.constant 0 : index
    %c0_23 = arith.constant 0 : index
    %55 = vector.load %arg4[%c0_22, %c0_23] : memref<32x128xbf16, #tpu.memory_space<vmem>>, vector<32x128xbf16>
    tpu.vector_store %arg4[%c0_22, %c0_23], %54 {strides = array<i32>} : memref<32x128xbf16, #tpu.memory_space<vmem>>, vector<32x128xbf16>,
    return
  }
  func.func @transform_0(%arg0: i32) -> (i32, i32) {
    %c0_i32 = arith.constant 0 : i32
    %c0_i32_0 = arith.constant 0 : i32
    return %arg0, %c0_i32 : i32, i32
  }
  func.func @transform_1(%arg0: i32) -> (i32, i32) {
    %c0_i32 = arith.constant 0 : i32
    %c0_i32_0 = arith.constant 0 : i32
    %c0_i32_1 = arith.constant 0 : i32
    return %c0_i32, %c0_i32_0 : i32, i32
  }
  func.func @transform_2(%arg0: i32) -> (i32, i32) {
    %c0_i32 = arith.constant 0 : i32
    %c0_i32_0 = arith.constant 0 : i32
    %c0_i32_1 = arith.constant 0 : i32
    return %c0_i32, %c0_i32_0 : i32, i32
  }
  func.func @transform_3(%arg0: i32) -> (i32, i32) {
    %c0_i32 = arith.constant 0 : i32
    %c0_i32_0 = arith.constant 0 : i32
    return %arg0, %c0_i32 : i32, i32
  }
}

module attributes {stable_mosaic.version = 11 : i64} {
  func.func @_svgp_kernel(%arg0: i32, %arg1: memref<32x128xbf16, #tpu.memory_space<vmem>>, %arg2: memref<32x128xbf16, #tpu.memory_space<vmem>>, %arg3: memref<128x128xbf16, #tpu.memory_space<vmem>>, %arg4: memref<128x128xbf16, #tpu.memory_space<vmem>>, %arg5: memref<128x128xbf16, #tpu.memory_space<vmem>>, %arg6: memref<128x128xbf16, #tpu.memory_space<vmem>>, %arg7: memref<128x128xbf16, #tpu.memory_space<vmem>>, %arg8: memref<32x128xf32, #tpu.memory_space<vmem>>, %arg9: memref<32x128xf32, #tpu.memory_space<vmem>>) attributes {dimension_semantics = [#tpu.dimension_semantics<parallel>], iteration_bounds = array<i64: 2>, scalar_prefetch = 0 : i64, scratch_operands = 0 : i64, tpu.core_type = #tpu.core_type<tc>, window_params = [{transform_indices = @transform_0, window_bounds = array<i64: 32, 128>}, {transform_indices = @transform_1, window_bounds = array<i64: 32, 128>}, {pipeline_mode = #tpu.pipeline_mode<synchronous>, transform_indices = @transform_2, window_bounds = array<i64: 128, 128>}, {pipeline_mode = #tpu.pipeline_mode<synchronous>, transform_indices = @transform_3, window_bounds = array<i64: 128, 128>}, {pipeline_mode = #tpu.pipeline_mode<synchronous>, transform_indices = @transform_4, window_bounds = array<i64: 128, 128>}, {pipeline_mode = #tpu.pipeline_mode<synchronous>, transform_indices = @transform_5, window_bounds = array<i64: 128, 128>}, {pipeline_mode = #tpu.pipeline_mode<synchronous>, transform_indices = @transform_6, window_bounds = array<i64: 128, 128>}, {transform_indices = @transform_7, window_bounds = array<i64: 32, 128>}, {transform_indices = @transform_8, window_bounds = array<i64: 32, 128>}]} {
    %c0 = arith.constant 0 : index
    %c0_0 = arith.constant 0 : index
    %0 = vector.load %arg1[%c0, %c0_0] : memref<32x128xbf16, #tpu.memory_space<vmem>>, vector<32x128xbf16>
    %1 = arith.extf %0 : vector<32x128xbf16> to vector<32x128xf32>
    %2 = arith.mulf %1, %1 : vector<32x128xf32>
    %cst = arith.constant dense<0.000000e+00> : vector<32xf32>
    %3 = vector.multi_reduction <add>, %2, %cst [1] : vector<32x128xf32> to vector<32xf32>
    %4 = vector.shape_cast %3 : vector<32xf32> to vector<32x1xf32>
    %c0_1 = arith.constant 0 : index
    %c0_2 = arith.constant 0 : index
    %5 = vector.load %arg3[%c0_1, %c0_2] : memref<128x128xbf16, #tpu.memory_space<vmem>>, vector<128x128xbf16>
    %cst_3 = arith.constant dense<0.000000e+00> : vector<32x128xf32>
    %6 = tpu.matmul %0, %5, %cst_3 {dimension_numbers = #tpu.dot_dimension_numbers<[1], [0], [0], [1], [0, 0, 1, 1], [], []>} : vector<32x128xbf16>, vector<128x128xbf16>, vector<32x128xf32> -> vector<32x128xf32>
    %c0_4 = arith.constant 0 : index
    %c0_5 = arith.constant 0 : index
    %7 = vector.load %arg2[%c0_4, %c0_5] : memref<32x128xbf16, #tpu.memory_space<vmem>>, vector<32x128xbf16>
    %8 = arith.extf %7 : vector<32x128xbf16> to vector<32x128xf32>
    %9 = arith.mulf %8, %8 : vector<32x128xf32>
    %cst_6 = arith.constant dense<0.000000e+00> : vector<32xf32>
    %10 = vector.multi_reduction <add>, %9, %cst_6 [1] : vector<32x128xf32> to vector<32xf32>
    %11 = vector.shape_cast %10 : vector<32xf32> to vector<32x1xf32>
    %12 = arith.addf %4, %11 : vector<32x1xf32>
    %c0_7 = arith.constant 0 : index
    %c0_8 = arith.constant 0 : index
    %13 = vector.load %arg4[%c0_7, %c0_8] : memref<128x128xbf16, #tpu.memory_space<vmem>>, vector<128x128xbf16>
    %cst_9 = arith.constant dense<0.000000e+00> : vector<32x128xf32>
    %14 = tpu.matmul %7, %13, %cst_9 {dimension_numbers = #tpu.dot_dimension_numbers<[1], [0], [0], [1], [0, 0, 1, 1], [], []>} : vector<32x128xbf16>, vector<128x128xbf16>, vector<32x128xf32> -> vector<32x128xf32>
    %15 = arith.addf %6, %14 : vector<32x128xf32>
    %16 = math.sqrt %12 : vector<32x1xf32>
    %cst_10 = arith.constant 9.99999996E-13 : f32
    %17 = vector.broadcast %cst_10 : f32 to vector<32x1xf32>
    %18 = arith.addf %16, %17 : vector<32x1xf32>
    %cst_11 = arith.constant 1.000000e+00 : f32
    %19 = vector.broadcast %cst_11 : f32 to vector<32x1xf32>
    %20 = arith.divf %19, %18 : vector<32x1xf32>
    %21 = vector.broadcast %20 : vector<32x1xf32> to vector<32x128xf32>
    %22 = arith.mulf %15, %21 : vector<32x128xf32>
    %cst_12 = arith.constant -1.000000e+00 : f32
    %cst_13 = arith.constant 1.000000e+00 : f32
    %23 = vector.broadcast %cst_12 : f32 to vector<32x128xf32>
    %24 = arith.maximumf %23, %22 : vector<32x128xf32>
    %25 = vector.broadcast %cst_13 : f32 to vector<32x128xf32>
    %26 = arith.minimumf %25, %24 : vector<32x128xf32>
    %27 = math.absf %26 : vector<32x128xf32>
    %cst_14 = arith.constant 1.000000e+00 : f32
    %28 = vector.broadcast %cst_14 : f32 to vector<32x128xf32>
    %29 = arith.subf %28, %27 : vector<32x128xf32>
    %cst_15 = arith.constant 0.000000e+00 : f32
    %30 = vector.broadcast %cst_15 : f32 to vector<32x128xf32>
    %31 = arith.maximumf %29, %30 : vector<32x128xf32>
    %32 = math.sqrt %31 : vector<32x128xf32>
    %cst_16 = arith.constant 6.5347791E-4 : f32
    %33 = vector.broadcast %cst_16 : f32 to vector<32x128xf32>
    %34 = arith.mulf %33, %27 : vector<32x128xf32>
    %cst_17 = arith.constant -0.00350793544 : f32
    %35 = vector.broadcast %cst_17 : f32 to vector<32x128xf32>
    %36 = arith.addf %34, %35 : vector<32x128xf32>
    %37 = arith.mulf %36, %27 : vector<32x128xf32>
    %cst_18 = arith.constant 0.0101949209 : f32
    %38 = vector.broadcast %cst_18 : f32 to vector<32x128xf32>
    %39 = arith.addf %37, %38 : vector<32x128xf32>
    %40 = arith.mulf %39, %27 : vector<32x128xf32>
    %cst_19 = arith.constant -0.0260781329 : f32
    %41 = vector.broadcast %cst_19 : f32 to vector<32x128xf32>
    %42 = arith.addf %40, %41 : vector<32x128xf32>
    %43 = arith.mulf %42, %27 : vector<32x128xf32>
    %cst_20 = arith.constant 0.0895298272 : f32
    %44 = vector.broadcast %cst_20 : f32 to vector<32x128xf32>
    %45 = arith.addf %43, %44 : vector<32x128xf32>
    %46 = arith.mulf %45, %27 : vector<32x128xf32>
    %cst_21 = arith.constant -1.07079208 : f32
    %47 = vector.broadcast %cst_21 : f32 to vector<32x128xf32>
    %48 = arith.addf %46, %47 : vector<32x128xf32>
    %49 = arith.mulf %48, %27 : vector<32x128xf32>
    %cst_22 = arith.constant 0.99999994 : f32
    %50 = vector.broadcast %cst_22 : f32 to vector<32x128xf32>
    %51 = arith.addf %49, %50 : vector<32x128xf32>
    %52 = arith.mulf %32, %51 : vector<32x128xf32>
    %cst_23 = arith.constant 0.000000e+00 : f32
    %53 = vector.broadcast %cst_23 : f32 to vector<32x128xf32>
    %54 = arith.maximumf %26, %53 : vector<32x128xf32>
    %cst_24 = arith.constant 3.14159274 : f32
    %55 = vector.broadcast %cst_24 : f32 to vector<32x128xf32>
    %56 = arith.mulf %55, %54 : vector<32x128xf32>
    %57 = arith.addf %52, %56 : vector<32x128xf32>
    %58 = vector.broadcast %16 : vector<32x1xf32> to vector<32x128xf32>
    %59 = arith.mulf %58, %57 : vector<32x128xf32>
    %60 = arith.truncf %59 : vector<32x128xf32> to vector<32x128xbf16>
    %c0_25 = arith.constant 0 : index
    %c0_26 = arith.constant 0 : index
    %61 = vector.load %arg5[%c0_25, %c0_26] : memref<128x128xbf16, #tpu.memory_space<vmem>>, vector<128x128xbf16>
    %cst_27 = arith.constant dense<0.000000e+00> : vector<32x128xf32>
    %62 = tpu.matmul %60, %61, %cst_27 {dimension_numbers = #tpu.dot_dimension_numbers<[1], [0], [0], [1], [0, 0, 1, 1], [], []>} : vector<32x128xbf16>, vector<128x128xbf16>, vector<32x128xf32> -> vector<32x128xf32>
    %c0_28 = arith.constant 0 : index
    %c0_29 = arith.constant 0 : index
    %63 = vector.load %arg8[%c0_28, %c0_29] : memref<32x128xf32, #tpu.memory_space<vmem>>, vector<32x128xf32>
    tpu.vector_store %arg8[%c0_28, %c0_29], %62 {strides = array<i32>} : memref<32x128xf32, #tpu.memory_space<vmem>>, vector<32x128xf32>,
    %c0_30 = arith.constant 0 : index
    %c0_31 = arith.constant 0 : index
    %64 = vector.load %arg6[%c0_30, %c0_31] : memref<128x128xbf16, #tpu.memory_space<vmem>>, vector<128x128xbf16>
    %cst_32 = arith.constant dense<0.000000e+00> : vector<32x128xf32>
    %65 = tpu.matmul %60, %64, %cst_32 {dimension_numbers = #tpu.dot_dimension_numbers<[1], [0], [0], [1], [0, 0, 1, 1], [], []>} : vector<32x128xbf16>, vector<128x128xbf16>, vector<32x128xf32> -> vector<32x128xf32>
    %c0_33 = arith.constant 0 : index
    %c0_34 = arith.constant 0 : index
    %66 = vector.load %arg7[%c0_33, %c0_34] : memref<128x128xbf16, #tpu.memory_space<vmem>>, vector<128x128xbf16>
    %cst_35 = arith.constant dense<0.000000e+00> : vector<32x128xf32>
    %67 = tpu.matmul %60, %66, %cst_35 {dimension_numbers = #tpu.dot_dimension_numbers<[1], [0], [0], [1], [0, 0, 1, 1], [], []>} : vector<32x128xbf16>, vector<128x128xbf16>, vector<32x128xf32> -> vector<32x128xf32>
    %68 = arith.addf %65, %67 : vector<32x128xf32>
    %69 = arith.mulf %68, %59 : vector<32x128xf32>
    %cst_36 = arith.constant dense<0.000000e+00> : vector<32xf32>
    %70 = vector.multi_reduction <add>, %69, %cst_36 [1] : vector<32x128xf32> to vector<32xf32>
    %71 = vector.shape_cast %70 : vector<32xf32> to vector<32x1xf32>
    %cst_37 = arith.constant 1.000000e+00 : f32
    %72 = vector.broadcast %cst_37 : f32 to vector<32x1xf32>
    %73 = arith.mulf %72, %12 : vector<32x1xf32>
    %74 = arith.subf %73, %71 : vector<32x1xf32>
    %cst_38 = arith.constant 9.99999993E-9 : f32
    %75 = vector.broadcast %cst_38 : f32 to vector<32x1xf32>
    %76 = arith.maximumf %74, %75 : vector<32x1xf32>
    %77 = vector.shape_cast %76 : vector<32x1xf32> to vector<32x1xf32>
    %78 = vector.broadcast %77 : vector<32x1xf32> to vector<32x128xf32>
    %c0_39 = arith.constant 0 : index
    %c0_40 = arith.constant 0 : index
    %79 = vector.load %arg9[%c0_39, %c0_40] : memref<32x128xf32, #tpu.memory_space<vmem>>, vector<32x128xf32>
    tpu.vector_store %arg9[%c0_39, %c0_40], %78 {strides = array<i32>} : memref<32x128xf32, #tpu.memory_space<vmem>>, vector<32x128xf32>,
    return
  }
  func.func @transform_0(%arg0: i32) -> (i32, i32) {
    %c0_i32 = arith.constant 0 : i32
    %c0_i32_0 = arith.constant 0 : i32
    return %arg0, %c0_i32 : i32, i32
  }
  func.func @transform_1(%arg0: i32) -> (i32, i32) {
    %c0_i32 = arith.constant 0 : i32
    %c0_i32_0 = arith.constant 0 : i32
    return %arg0, %c0_i32 : i32, i32
  }
  func.func @transform_2(%arg0: i32) -> (i32, i32) {
    %c0_i32 = arith.constant 0 : i32
    %c0_i32_0 = arith.constant 0 : i32
    %c0_i32_1 = arith.constant 0 : i32
    return %c0_i32, %c0_i32_0 : i32, i32
  }
  func.func @transform_3(%arg0: i32) -> (i32, i32) {
    %c0_i32 = arith.constant 0 : i32
    %c0_i32_0 = arith.constant 0 : i32
    %c0_i32_1 = arith.constant 0 : i32
    return %c0_i32, %c0_i32_0 : i32, i32
  }
  func.func @transform_4(%arg0: i32) -> (i32, i32) {
    %c0_i32 = arith.constant 0 : i32
    %c0_i32_0 = arith.constant 0 : i32
    %c0_i32_1 = arith.constant 0 : i32
    return %c0_i32, %c0_i32_0 : i32, i32
  }
  func.func @transform_5(%arg0: i32) -> (i32, i32) {
    %c0_i32 = arith.constant 0 : i32
    %c0_i32_0 = arith.constant 0 : i32
    %c0_i32_1 = arith.constant 0 : i32
    return %c0_i32, %c0_i32_0 : i32, i32
  }
  func.func @transform_6(%arg0: i32) -> (i32, i32) {
    %c0_i32 = arith.constant 0 : i32
    %c0_i32_0 = arith.constant 0 : i32
    %c0_i32_1 = arith.constant 0 : i32
    return %c0_i32, %c0_i32_0 : i32, i32
  }
  func.func @transform_7(%arg0: i32) -> (i32, i32) {
    %c0_i32 = arith.constant 0 : i32
    %c0_i32_0 = arith.constant 0 : i32
    return %arg0, %c0_i32 : i32, i32
  }
  func.func @transform_8(%arg0: i32) -> (i32, i32) {
    %c0_i32 = arith.constant 0 : i32
    %c0_i32_0 = arith.constant 0 : i32
    return %arg0, %c0_i32 : i32, i32
  }
}

</mosaic_0001>

<bundles_post_ra>
// kernel: dgplvm_forward.6
= control target key start
LH: loop header
LB: loop body
LE: loop exit
PB: predicated region body
PF: predicated region fallthrough
CT: control target
= control target key end

     0   :  { %s882_s12 = smov 0   ;;  %s1104_s0 = inlined_call_operand.vmem [shape: bf16[64,128], index: 0, kind: input, shape index: {}]   ;;  %s1105_s1 = inlined_call_operand.vmem [shape: bf16[128,128], index: 1, kind: input, shape index: {}]   ;;  %s1106_s2 = inlined_call_operand.vmem [shape: bf16[128,128], index: 2, kind: input, shape index: {}]   ;;  %s1107_s3 = inlined_call_operand.vmem [shape: bf16[64,128], index: 3, kind: output, shape index: {}]  }
   0x1 LB: > { %s690_s13 = sadd.s32 4294967295, %s860_s12   ;;  %p694_p0 = scmp.ge.s32.totalorder %s860_s12, 1  ;;  %s860_s12 = sphi %s882_s12, %s13_s12  }
   0x2   : > { %p138_p1 = scmp.lt.s32.totalorder %s860_s12, 3 }
   0x4   : > { %p139_p2 = pnand %p694_p0, %p138_p1 }
   0x5   : > { %s695_s16 = sshll.u32 (!%p139_p2), %s690_s13, 2 }
   0x6   : > { %142 = sbr.rel (%p139_p2) target bundleno = 365 (0x16d), region = 32  ;;  %p163_p3 = scmp.lt.s32.totalorder (!%p139_p2), %s695_s16, 7 }
   0xb   : > { %v786_v0 = vld [vmem:[%s1105_s1 + $0x38] sm:$0xff]  ;;  %v785_v1 = vld [vmem:[%s1105_s1 + $0x30] sm:$0xff]  ;;  %s1109_s16 = smov (!%p163_p3, %s695_s16), 7  ;;  %v784_v2 = vld [vmem:[%s1105_s1 + $0x28] sm:$0xff] }
   0xc   : > { %806 = vmatpush.bf16.msra.mxu2 %v786_v0  ;;  %270 = vmatpush.bf16.msra.mxu0 %v786_v0  ;;  %s696_s19 = sshll.u32 %s1109_s16, 2  ;;  %v783_v9 = vld [vmem:[%s1105_s1 + $0x20] sm:$0xff]  ;;  %v782_v12 = vld [vmem:[%s1105_s1 + $0x18] sm:$0xff]  ;;  %v781_v15 = vld [vmem:[%s1105_s1 + $0x10] sm:$0xff] }
   0xd   : > { %s907_s24 = scalar_lea.vmem %s1104_s0, %s696_s19  ;;  %v780_v16 = vld [vmem:[%s1105_s1 + $0x8] sm:$0xff]  ;;  %v779_v17 = vld [vmem:[%s1105_s1] sm:$0xff]  ;;  %v794_v58 = vld [vmem:[%s1106_s2 + $0x38] sm:$0xff]  ;;  %s172_s29 = scalar_lea.vmem %s1107_s3, %s696_s19 }
   0xe   : > { %v176_v3 = vld [vmem:[%s907_s24 + $0x8] sm:$0xff]   ;;  %v174_v4 = vld [vmem:[%s907_s24] sm:$0xff]   ;;  %607 = vmatpush.bf16.msra.mxu1 %v794_v58  ;;  %814 = vmatpush.bf16.msra.mxu3 %v794_v58  ;;  %v793_v62 = vld [vmem:[%s1106_s2 + $0x30] sm:$0xff] }
   0xf   : > { %v180_v5 = vunpack.c.l.bf16 %v176_v3  ;;  %v178_v6 = vunpack.c.l.bf16 %v174_v4  ;;  %v181_v10 = vunpack.c.h.bf16 %v176_v3  ;;  %v179_v11 = vunpack.c.h.bf16 %v174_v4  ;;  %v778_v18 = vld [vmem:[%s907_s24 + $0x8] sm:$0xff]  ;;  %v777_v19 = vld [vmem:[%s907_s24] sm:$0xff] }
  0x10   : > { %807 = vmatpush.bf16.msra.mxu2 %v785_v1  ;;  %271 = vmatpush.bf16.msra.mxu0 %v785_v1  ;;  %v788_v58 = vld [vmem:[%s1106_s2 + $0x8] sm:$0xff] }
  0x11   : > { %v184_v7 = vmul.f32 %v180_v5, %v180_v5  ;;  %v182_v8 = vmul.f32 %v178_v6, %v178_v6  ;;  %v185_v13 = vmul.f32 %v181_v10, %v181_v10  ;;  %v183_v14 = vmul.f32 %v179_v11, %v179_v11 }
  0x12   : > { %608 = vmatpush.bf16.msra.mxu1 %v793_v62  ;;  %815 = vmatpush.bf16.msra.mxu3 %v793_v62 }
  0x13   : > { %190 = vadd.xlane.f32.xlu0 %v184_v7  ;;  %186 = vadd.xlane.f32.xlu1 %v182_v8 }
  0x14   : > { %808 = vmatpush.bf16.msra.mxu2 %v784_v2  ;;  %272 = vmatpush.bf16.msra.mxu0 %v784_v2 }
  0x18   : > { %809 = vmatpush.bf16.msra.mxu2 %v783_v9  ;;  %273 = vmatpush.bf16.msra.mxu0 %v783_v9  ;;  %v792_v9 = vld [vmem:[%s1106_s2 + $0x28] sm:$0xff] }
  0x19   : > { %609 = vmatpush.bf16.msra.mxu1 %v792_v9  ;;  %816 = vmatpush.bf16.msra.mxu3 %v792_v9 }
  0x1b   : > { %192 = vadd.xlane.f32.xlu0 %v185_v13  ;;  %188 = vadd.xlane.f32.xlu1 %v183_v14 }
  0x1c   : > { %810 = vmatpush.bf16.msra.mxu2 %v782_v12  ;;  %274 = vmatpush.bf16.msra.mxu0 %v782_v12 }
  0x20   : > { %811 = vmatpush.bf16.msra.mxu2 %v781_v15  ;;  %275 = vmatpush.bf16.msra.mxu0 %v781_v15 }
  0x24   : > { %812 = vmatpush.bf16.msra.mxu2 %v780_v16  ;;  %276 = vmatpush.bf16.msra.mxu0 %v780_v16 }
  0x28   : > { %813 = vmatpush.bf16.msra.mxu2 %v779_v17  ;;  %277 = vmatpush.bf16.msra.mxu0 %v779_v17  ;;  %v791_v17 = vld [vmem:[%s1106_s2 + $0x20] sm:$0xff] }
  0x29   : > { %610 = vmatpush.bf16.msra.mxu1 %v791_v17  ;;  %817 = vmatpush.bf16.msra.mxu3 %v791_v17 }
  0x2b   : > { %283 = vmatmul.bf16.vlgmr.msra.gmra.mxu2 %v778_v18  ;;  %278 = vmatmul.bf16.vlgmr.msra.gmra.mxu0 %v777_v19 }
  0x86   : > { %v191_v20 = vpop.xlane.xlu0 %190  ;;  %v187_v21 = vpop.xlane.xlu1 %186 }
  0x87   : > { %830 = vrsqrt.f32 %v191_v20  ;;  %vm320_vm0 = vcmp.eq.f32.partialorder %v191_v20, inf  ;;  %vm322_vm1 = vcmp.eq.f32.partialorder %v191_v20, 0.0  ;;  %v323_v42 = vand.u32 2147483648, %v191_v20 }
  0x88   : > { %832 = vrsqrt.f32 %v187_v21  ;;  %vm296_vm2 = vcmp.eq.f32.partialorder %v187_v21, inf  ;;  %v299_v46 = vand.u32 2147483648, %v187_v21  ;;  %vm298_vm3 = vcmp.eq.f32.partialorder %v187_v21, 0.0 }
  0x8d   : > { %v831_v22 = vpop.eup %830 }
  0x8e   : > { %v833_v23 = vpop.eup %832  ;;  %v314_v24 = vmul.f32 %v831_v22, %v191_v20  ;;  %v193_v25 = vpop.xlane.xlu0 %192 }
  0x8f   : > { %v189_v26 = vpop.xlane.xlu1 %188  ;;  %v290_v27 = vmul.f32 %v833_v23, %v187_v21  ;;  %834 = vrsqrt.f32 %v193_v25  ;;  %vm332_vm4 = vcmp.eq.f32.partialorder %v193_v25, inf  ;;  %v335_v60 = vand.u32 2147483648, %v193_v25 }
  0x90   : > { %v315_v28 = vmul.f32 %v831_v22, %v314_v24  ;;  %836 = vrsqrt.f32 %v189_v26  ;;  %vm334_vm5 = vcmp.eq.f32.partialorder %v193_v25, 0.0  ;;  %vm308_vm6 = vcmp.eq.f32.partialorder %v189_v26, inf }
  0x91   : > { %v291_v29 = vmul.f32 %v833_v23, %v290_v27  ;;  %v311_v0 = vand.u32 2147483648, %v189_v26  ;;  %vm310_vm7 = vcmp.eq.f32.partialorder %v189_v26, 0.0 }
  0x92   : > { %v316_v30 = vmul.f32 0.5, %v315_v28 }
  0x93   : > { %v292_v31 = vmul.f32 0.5, %v291_v29 }
  0x94   : > { %v317_v32 = vsub.f32 1.5, %v316_v30  ;;  %v790_v30 = vld [vmem:[%s1106_s2 + $0x18] sm:$0xff] }
  0x95   : > { %v835_v33 = vpop.eup %834  ;;  %v293_v34 = vsub.f32 1.5, %v292_v31  ;;  %611 = vmatpush.bf16.msra.mxu1 %v790_v30  ;;  %818 = vmatpush.bf16.msra.mxu3 %v790_v30 }
  0x96   : > { %v837_v35 = vpop.eup %836  ;;  %v318_v36 = vmul.f32 %v831_v22, %v317_v32  ;;  %v326_v37 = vmul.f32 %v835_v33, %v193_v25 }
  0x97   : > { %v294_v38 = vmul.f32 %v833_v23, %v293_v34  ;;  %v302_v39 = vmul.f32 %v837_v35, %v189_v26 }
  0x98   : > { %v319_v40 = vmul.f32 %v318_v36, %v191_v20  ;;  %v327_v41 = vmul.f32 %v835_v33, %v326_v37 }
  0x99   : > { %v295_v43 = vmul.f32 %v294_v38, %v187_v21  ;;  %v303_v44 = vmul.f32 %v837_v35, %v302_v39 }
  0x9a   : > { %v321_v45 = vsel %vm320_vm0, %v191_v20, %v319_v40  ;;  %v328_v47 = vmul.f32 0.5, %v327_v41 }
  0x9b   : > { %v297_v48 = vsel %vm296_vm2, %v187_v21, %v295_v43  ;;  %v304_v49 = vmul.f32 0.5, %v303_v44  ;;  %v928_v50 = vsel %vm322_vm1, %v323_v42, %v321_v45  ;;  %v789_v44 = vld [vmem:[%s1106_s2 + $0x10] sm:$0xff] }
  0x9c   : > { %v329_v51 = vsub.f32 1.5, %v328_v47  ;;  %v930_v52 = vsel %vm298_vm3, %v299_v46, %v297_v48  ;;  %v339_v53 = vadd.f32 1e-12, %v928_v50  ;;  %612 = vmatpush.bf16.msra.mxu1 %v789_v44  ;;  %819 = vmatpush.bf16.msra.mxu3 %v789_v44 }
  0x9d   : > { %v305_v54 = vsub.f32 1.5, %v304_v49  ;;  %v934_v55 = vadd.f32 1e-12, %v930_v52 }
  0x9e   : > { %v330_v56 = vmul.f32 %v835_v33, %v329_v51  ;;  %838 = vrcp.f32 %v339_v53  ;;  %v382_v13 = vand.u32 2147483648, %v339_v53  ;;  %v380_v16 = vand.u32 2147483647, %v339_v53 }
  0x9f   : > { %v306_v57 = vmul.f32 %v837_v35, %v305_v54  ;;  %840 = vrcp.f32 %v934_v55  ;;  %v352_v14 = vand.u32 2147483648, %v934_v55  ;;  %v350_v19 = vand.u32 2147483647, %v934_v55 }
  0xa0   : > { %v331_v59 = vmul.f32 %v330_v56, %v193_v25  ;;  %vm376_vm10 = vweird.f32 %v339_v53  ;;  %vm346_vm11 = vweird.f32 %v934_v55  ;;  %v383_v24 = vor.u32 1.1754944e-38, %v382_v13  ;;  %613 = vmatpush.bf16.msra.mxu1 %v788_v58  ;;  %820 = vmatpush.bf16.msra.mxu3 %v788_v58 }
  0xa1   : > { %v307_v61 = vmul.f32 %v306_v57, %v189_v26  ;;  %v353_v27 = vor.u32 1.1754944e-38, %v352_v14  ;;  %vm381_vm14 = vcmp.eq.f32.partialorder %v380_v16, 8.507059e+37  ;;  %vm351_vm15 = vcmp.eq.f32.partialorder %v350_v19, 8.507059e+37 }
  0xa2   : > { %v333_v63 = vsel %vm332_vm4, %v193_v25, %v331_v59 }
  0xa3   : > { %v943_v1 = vsel %vm334_vm5, %v335_v60, %v333_v63  ;;  %v309_v2 = vsel %vm308_vm6, %v189_v26, %v307_v61 }
  0xa4   : > { %v839_v3 = vpop.eup %838  ;;  %v946_v4 = vadd.f32 1e-12, %v943_v1  ;;  %v948_v5 = vsel %vm310_vm7, %v311_v0, %v309_v2 }
  0xa5   : > { %v841_v6 = vpop.eup %840  ;;  %v951_v7 = vadd.f32 1e-12, %v948_v5  ;;  %v372_v8 = vmul.f32 %v839_v3, %v339_v53  ;;  %vm377_vm8 = vweird.f32 %v839_v3 }
  0xa6   : > { %842 = vrcp.f32 %v946_v4  ;;  %v342_v10 = vmul.f32 %v841_v6, %v934_v55  ;;  %vm347_vm9 = vweird.f32 %v841_v6  ;;  %vm378_vm12 = vmor %vm376_vm10, %vm377_vm8  ;;  %v397_v40 = vand.u32 2147483648, %v946_v4 }
  0xa7   : > { %844 = vrcp.f32 %v951_v7  ;;  %v373_v11 = vsub.f32 1.0, %v372_v8  ;;  %vm348_vm13 = vmor %vm346_vm11, %vm347_vm9  ;;  %v367_v39 = vand.u32 2147483648, %v951_v7  ;;  %v395_v43 = vand.u32 2147483647, %v946_v4 }
  0xa8   : > { %v343_v12 = vsub.f32 1.0, %v342_v10  ;;  %v279_v26 = vpop.f32.mrf.mxu0  ;;  %v365_v47 = vand.u32 2147483647, %v951_v7  ;;  %vm361_vm2 = vweird.f32 %v951_v7  ;;  %vm391_vm3 = vweird.f32 %v946_v4  ;;  %v787_v10 = vld [vmem:[%s1106_s2] sm:$0xff] }
  0xa9   : > { %v374_v15 = vmul.f32 %v839_v3, %v373_v11  ;;  %v368_v54 = vor.u32 1.1754944e-38, %v367_v39  ;;  %v398_v55 = vor.u32 1.1754944e-38, %v397_v40  ;;  %vm396_vm6 = vcmp.eq.f32.partialorder %v395_v43, 8.507059e+37  ;;  %614 = vmatpush.bf16.msra.mxu1 %v787_v10  ;;  %821 = vmatpush.bf16.msra.mxu3 %v787_v10 }
  0xaa   : > { %v344_v18 = vmul.f32 %v841_v6, %v343_v12  ;;  %vm366_vm7 = vcmp.eq.f32.partialorder %v365_v47, 8.507059e+37 }
  0xab   : > { %v375_v20 = vadd.f32 %v839_v3, %v374_v15 }
  0xac   : > { %v843_v21 = vpop.eup %842  ;;  %v345_v22 = vadd.f32 %v841_v6, %v344_v18 }
  0xad   : > { %v845_v25 = vpop.eup %844  ;;  %v379_v28 = vsel %vm378_vm12, %v839_v3, %v375_v20  ;;  %v387_v29 = vmul.f32 %v843_v21, %v946_v4  ;;  %vm392_vm0 = vweird.f32 %v843_v21 }
  0xae   : > { %v284_v23 = vpop.f32.mrf.mxu2  ;;  %v349_v31 = vsel %vm348_vm13, %v841_v6, %v345_v22  ;;  %v384_v32 = vsel %vm381_vm14, %v383_v24, %v379_v28  ;;  %v357_v33 = vmul.f32 %v845_v25, %v951_v7  ;;  %vm362_vm1 = vweird.f32 %v845_v25  ;;  %vm393_vm4 = vmor %vm391_vm3, %vm392_vm0 }
  0xaf   : > { %v354_v34 = vsel %vm351_vm15, %v353_v27, %v349_v31  ;;  %v970_v35 = vmul.f32 %v384_v32, %v284_v23  ;;  %v388_v36 = vsub.f32 1.0, %v387_v29  ;;  %vm363_vm5 = vmor %vm361_vm2, %vm362_vm1 }
  0xb0   : > { %v972_v37 = vmul.f32 %v354_v34, %v279_v26  ;;  %v358_v38 = vsub.f32 1.0, %v357_v33  ;;  %v281_v2 = vpop.f32.mrf.mxu0 }
  0xb1   : > { %v741_v41 = vclamps-f32 %v970_v35, 1.0  ;;  %v389_v42 = vmul.f32 %v843_v21, %v388_v36 }
  0xb2   : > { %v739_v45 = vclamps-f32 %v972_v37, 1.0  ;;  %v359_v46 = vmul.f32 %v845_v25, %v358_v38 }
  0xb3   : > { %v985_v48 = vand.u32 2147483647, %v741_v41  ;;  %v390_v49 = vadd.f32 %v843_v21, %v389_v42  ;;  %v1038_v40 = vmax.f32 %v741_v41, 0.0 }
  0xb4   : > { %v989_v51 = vand.u32 2147483647, %v739_v45  ;;  %v360_v53 = vadd.f32 %v845_v25, %v359_v46  ;;  %v525_v23 = vmax.f32 %v739_v45, 0.0 }
  0xb5   : > { %v419_v56 = vsub.f32 1.0, %v985_v48  ;;  %v394_v57 = vsel %vm393_vm4, %v843_v21, %v390_v49  ;;  %v475_v59 = vmul.f32 0.0006534779, %v985_v48 }
  0xb6   : > { %v417_v60 = vsub.f32 1.0, %v989_v51  ;;  %v364_v61 = vsel %vm363_vm5, %v845_v25, %v360_v53  ;;  %v286_v62 = vpop.f32.mrf.mxu2  ;;  %v399_v63 = vsel %vm396_vm6, %v398_v55, %v394_v57  ;;  %v473_v6 = vmul.f32 0.0006534779, %v989_v51 }
  0xb7   : > { %v998_v0 = vmax.f32 %v419_v56, 0.0  ;;  %v369_v3 = vsel %vm366_vm7, %v368_v54, %v364_v61  ;;  %v404_v4 = vmul.f32 %v399_v63, %v286_v62  ;;  %v479_v12 = vadd.f32 -0.0035079354, %v475_v59 }
  0xb8   : > { %v1001_v7 = vmax.f32 %v417_v60, 0.0  ;;  %v1003_v8 = vmul.f32 %v369_v3, %v281_v2  ;;  %v477_v11 = vadd.f32 -0.0035079354, %v473_v6  ;;  %v1034_v39 = vmul.f32 3.1415927, %v525_v23 }
  0xb9   : > { %v742_v9 = vclamps-f32 %v404_v4, 1.0  ;;  %846 = vrsqrt.f32 %v998_v0  ;;  %v483_v19 = vmul.f32 %v479_v12, %v985_v48  ;;  %vm456_vm10 = vcmp.eq.f32.partialorder %v998_v0, inf }
  0xba   : > { %v740_v13 = vclamps-f32 %v1003_v8, 1.0  ;;  %848 = vrsqrt.f32 %v1001_v7  ;;  %v481_v15 = vmul.f32 %v477_v11, %v989_v51  ;;  %vm432_vm8 = vcmp.eq.f32.partialorder %v1001_v7, inf }
  0xbb   : > { %v1011_v14 = vand.u32 2147483647, %v742_v9  ;;  %v487_v31 = vadd.f32 0.010194921, %v483_v19  ;;  %vm434_vm9 = vcmp.eq.f32.partialorder %v1001_v7, 0.0  ;;  %v1047_v58 = vmax.f32 %v742_v9, 0.0 }
  0xbc   : > { %v1016_v16 = vand.u32 2147483647, %v740_v13  ;;  %v485_v18 = vadd.f32 0.010194921, %v481_v15  ;;  %v435_v23 = vand.u32 2147483648, %v1001_v7  ;;  %vm458_vm11 = vcmp.eq.f32.partialorder %v998_v0, 0.0 }
  0xbd   : > { %v420_v17 = vsub.f32 1.0, %v1011_v14  ;;  %v476_v26 = vmul.f32 0.0006534779, %v1011_v14  ;;  %v491_v43 = vmul.f32 %v487_v31, %v985_v48 }
  0xbe   : > { %v418_v20 = vsub.f32 1.0, %v1016_v16  ;;  %v474_v21 = vmul.f32 0.0006534779, %v1016_v16  ;;  %v489_v25 = vmul.f32 %v485_v18, %v989_v51 }
  0xbf   : > { %v847_v22 = vpop.eup %846  ;;  %v1022_v24 = vmax.f32 %v420_v17, 0.0  ;;  %v480_v42 = vadd.f32 -0.0035079354, %v476_v26  ;;  %v495_v53 = vadd.f32 -0.026078133, %v491_v43 }
  0xc0   : > { %v849_v27 = vpop.eup %848  ;;  %v1026_v28 = vmax.f32 %v418_v20, 0.0  ;;  %v478_v29 = vadd.f32 -0.0035079354, %v474_v21  ;;  %v450_v30 = vmul.f32 %v847_v22, %v998_v0  ;;  %v493_v33 = vadd.f32 -0.026078133, %v489_v25 }
  0xc1   : > { %v426_v32 = vmul.f32 %v849_v27, %v1001_v7  ;;  %850 = vrsqrt.f32 %v1022_v24  ;;  %v484_v49 = vmul.f32 %v480_v42, %v1011_v14  ;;  %v499_v61 = vmul.f32 %v495_v53, %v985_v48 }
  0xc2   : > { %852 = vrsqrt.f32 %v1026_v28  ;;  %v482_v36 = vmul.f32 %v478_v29, %v1016_v16  ;;  %v497_v37 = vmul.f32 %v493_v33, %v989_v51  ;;  %v451_v38 = vmul.f32 %v847_v22, %v450_v30 }
  0xc3   : > { %v427_v34 = vmul.f32 %v849_v27, %v426_v32  ;;  %v488_v60 = vadd.f32 0.010194921, %v484_v49  ;;  %v503_v11 = vadd.f32 0.08952983, %v499_v61  ;;  %v459_v42 = vand.u32 2147483648, %v998_v0 }
  0xc4   : > { %v486_v45 = vadd.f32 0.010194921, %v482_v36  ;;  %v501_v46 = vadd.f32 0.08952983, %v497_v37  ;;  %v452_v47 = vmul.f32 0.5, %v451_v38  ;;  %vm468_vm12 = vcmp.eq.f32.partialorder %v1022_v24, inf }
  0xc5   : > { %v428_v44 = vmul.f32 0.5, %v427_v34  ;;  %v492_v10 = vmul.f32 %v488_v60, %v1011_v14  ;;  %v507_v21 = vmul.f32 %v503_v11, %v985_v48  ;;  %vm444_vm13 = vcmp.eq.f32.partialorder %v1026_v28, inf }
  0xc6   : > { %v490_v35 = vmul.f32 %v486_v45, %v1016_v16  ;;  %v505_v41 = vmul.f32 %v501_v46, %v989_v51  ;;  %v453_v56 = vsub.f32 1.5, %v452_v47  ;;  %v447_v53 = vand.u32 2147483648, %v1026_v28 }
  0xc7   : > { %v851_v54 = vpop.eup %850  ;;  %v429_v55 = vsub.f32 1.5, %v428_v44  ;;  %v496_v20 = vadd.f32 -0.026078133, %v492_v10  ;;  %v511_v8 = vadd.f32 -1.0707921, %v507_v21  ;;  %vm446_vm14 = vcmp.eq.f32.partialorder %v1026_v28, 0.0 }
  0xc8   : > { %v853_v57 = vpop.eup %852  ;;  %v462_v59 = vmul.f32 %v851_v54, %v1022_v24  ;;  %v494_v2 = vadd.f32 -0.026078133, %v490_v35  ;;  %v509_v3 = vadd.f32 -1.0707921, %v505_v41  ;;  %v454_v4 = vmul.f32 %v847_v22, %v453_v56 }
  0xc9   : > { %v430_v62 = vmul.f32 %v849_v27, %v429_v55  ;;  %v438_v63 = vmul.f32 %v853_v57, %v1026_v28  ;;  %v526_v27 = vmax.f32 %v740_v13, 0.0  ;;  %v500_v29 = vmul.f32 %v496_v20, %v1011_v14 }
  0xca   : > { %v463_v6 = vmul.f32 %v851_v54, %v462_v59  ;;  %v498_v9 = vmul.f32 %v494_v2, %v1016_v16  ;;  %v513_v17 = vmul.f32 %v509_v3, %v989_v51  ;;  %v455_v18 = vmul.f32 %v454_v4, %v998_v0 }
  0xcb   : > { %v431_v12 = vmul.f32 %v430_v62, %v1001_v7  ;;  %v439_v15 = vmul.f32 %v853_v57, %v438_v63  ;;  %v504_v37 = vadd.f32 0.08952983, %v500_v29  ;;  %v515_v44 = vmul.f32 %v511_v8, %v985_v48 }
  0xcc   : > { %v464_v19 = vmul.f32 0.5, %v463_v6  ;;  %v502_v26 = vadd.f32 0.08952983, %v498_v9  ;;  %v517_v33 = vadd.f32 0.99999994, %v513_v17  ;;  %v457_v34 = vsel %vm456_vm10, %v998_v0, %v455_v18 }
  0xcd   : > { %v433_v22 = vsel %vm432_vm8, %v1001_v7, %v431_v12  ;;  %v440_v25 = vmul.f32 0.5, %v439_v15  ;;  %v508_v43 = vmul.f32 %v504_v37, %v1011_v14  ;;  %v460_v49 = vsel %vm458_vm11, %v459_v42, %v457_v34 }
  0xce   : > { %v465_v51 = vsub.f32 1.5, %v464_v19  ;;  %v436_v30 = vsel %vm434_vm9, %v435_v23, %v433_v22  ;;  %v506_v32 = vmul.f32 %v502_v26, %v1016_v16  ;;  %v519_v35 = vadd.f32 0.99999994, %v515_v44 }
  0xcf   : > { %v441_v31 = vsub.f32 1.5, %v440_v25  ;;  %v521_v47 = vmul.f32 %v517_v33, %v436_v30  ;;  %v512_v55 = vadd.f32 -1.0707921, %v508_v43  ;;  %v471_v48 = vand.u32 2147483648, %v1022_v24 }
  0xd0   : > { %v466_v36 = vmul.f32 %v851_v54, %v465_v51  ;;  %v510_v38 = vadd.f32 -1.0707921, %v506_v32  ;;  %vm470_vm15 = vcmp.eq.f32.partialorder %v1022_v24, 0.0  ;;  %v523_v0 = vmul.f32 %v519_v35, %v460_v49 }
  0xd1   : > { %v442_v13 = vmul.f32 %v853_v57, %v441_v31  ;;  %v530_v59 = vmul.f32 3.1415927, %v526_v27  ;;  %v533_v61 = vadd.f32 %v1034_v39, %v521_v47  ;;  %v531_v63 = vmul.f32 3.1415927, %v1038_v40 }
  0xd2   : > { %v467_v7 = vmul.f32 %v466_v36, %v1022_v24  ;;  %v514_v46 = vmul.f32 %v510_v38, %v1016_v16  ;;  %v516_v16 = vmul.f32 %v512_v55, %v1011_v14 }
  0xd3   : > { %v443_v45 = vmul.f32 %v442_v13, %v1026_v28  ;;  %v535_v6 = vadd.f32 %v531_v63, %v523_v0  ;;  %v537_v10 = vmul.f32 %v533_v61, %v930_v52 }
  0xd4   : > { %v469_v54 = vsel %vm468_vm12, %v1022_v24, %v467_v7  ;;  %v518_v56 = vadd.f32 0.99999994, %v514_v46  ;;  %v520_v2 = vadd.f32 0.99999994, %v516_v16 }
  0xd5   : > { %v445_v41 = vsel %vm444_vm13, %v1026_v28, %v443_v45  ;;  %v472_v62 = vsel %vm470_vm15, %v471_v48, %v469_v54  ;;  %v532_v28 = vmul.f32 3.1415927, %v1047_v58  ;;  %v539_v12 = vmul.f32 %v535_v6, %v928_v50 }
  0xd6   : > { %v448_v57 = vsel %vm446_vm14, %v447_v53, %v445_v41  ;;  %v524_v4 = vmul.f32 %v520_v2, %v472_v62 }
  0xd7   : > { %v522_v60 = vmul.f32 %v518_v56, %v448_v57 }
  0xd8   : > { %v536_v14 = vadd.f32 %v532_v28, %v524_v4 }
  0xd9   : > { %v534_v3 = vadd.f32 %v530_v59, %v522_v60 }
  0xda   : > { %v540_v39 = vmul.f32 %v536_v14, %v943_v1 }
  0xdb   : > { %v538_v24 = vmul.f32 %v534_v3, %v948_v5 }
  0xdc   : > { %v542_v15 = vpack.c.bf16 %v540_v39, %v539_v12 }
  0xdd   : > { %v541_v11 = vpack.c.bf16 %v538_v24, %v537_v10 }
  0xde   : > { %620 = vmatmul.bf16.vlgmr.msra.gmra.mxu3 %v542_v15 }
  0xdf   : > { %615 = vmatmul.bf16.vlgmr.msra.gmra.mxu1 %v541_v11 }
 0x15c   : > { %v616_v40 = vpop.f32.mrf.mxu1 }
 0x161   : > { %v621_v9 = vpop.f32.mrf.mxu3 }
 0x164   : > { %v618_v58 = vpop.f32.mrf.mxu1 }
 0x165   : > { %v798_v52 = vpack.c.bf16 %v618_v58, %v616_v40 }
 0x167   : > { %799 = vst [vmem:[%s172_s29] sm:$0xff] %v798_v52  }
 0x169   : > { %v623_v5 = vpop.f32.mrf.mxu3 }
 0x16a   : > { %v803_v17 = vpack.c.bf16 %v623_v5, %v621_v9 }
 0x16c   : > { %805 = vst [vmem:[%s172_s29 + $0x8] sm:$0xff] %v803_v17  }
 0x16d PF: > { %s13_s12 = sadd.s32 1, %s860_s12  }
 0x16e   : > { %p10_p4 = scmp.ge.s32.totalorder %s13_s12, 4  }
 0x170   :  { %12 = sbr.rel (!%p10_p4) target bundleno = 1 (0x1), region = 62 }

// kernel: dgplvm_forward.9
= control target key start
LH: loop header
LB: loop body
LE: loop exit
PB: predicated region body
PF: predicated region fallthrough
CT: control target
= control target key end

     0   :  { %10 = vsyncpa [#allocation3], 0  ;;  %s1594_s0 = inlined_call_operand.vmem [shape: bf16[64,128], index: 0, kind: input, shape index: {}]   ;;  %s1595_s1 = inlined_call_operand.vmem [shape: bf16[64,128], index: 1, kind: input, shape index: {}]   ;;  %s1596_s2 = inlined_call_operand.hbm [shape: bf16[128,128], index: 2, kind: input, shape index: {}]   ;;  %s1597_s3 = inlined_call_operand.hbm [shape: bf16[128,128], index: 3, kind: input, shape index: {}]   ;;  %s1598_s4 = inlined_call_operand.hbm [shape: bf16[128,128], index: 4, kind: input, shape index: {}]   ;;  %s1599_s5 = inlined_call_operand.vmem [shape: bf16[64,128], index: 5, kind: output, shape index: {}]  }
   0x1   :  { %11 = vsyncpa [#allocation5], 0  ;;  %s1366_s18 = smov 0  }
   0x2 LB: > { %s978_s19 = sadd.s32 4294967295, %s1329_s18   ;;  %p980_p0 = scmp.ge.s32.totalorder %s1329_s18, 1  ;;  %s1329_s18 = sphi %s1366_s18, %s17_s18  }
   0x3   : > { %p163_p1 = scmp.lt.s32.totalorder %s1329_s18, 3  ;;  %p1376_p2 = scmp.eq.s32.totalorder %s978_s19, 0 }
   0x4   : > { %s188_s23 = sshll.u32 %s1597_s3, 4  ;;  %s174_s27 = sshll.u32 %s1596_s2, 4  ;;  %s189_s23 = int_to_ptr.hbm [resolvable:$true] %s188_s23  ;;  %s175_s27 = int_to_ptr.hbm [resolvable:$true] %s174_s27 }
   0x5   : > { %p1383_p3 = pnand %p980_p0, %p163_p1  ;;  %s1331_s28 = smov [#allocation4]  }
   0x6   : > { %s190_s29 = sshll.u32 %s1331_s28, 4  ;;  %s1332_s30 = smov [#allocation2]   ;;  %s191_s29 = int_to_ptr.vmem [resolvable:$true] %s190_s29 }
   0x7   : > { %p1172_p4 = pneg %p1383_p3  ;;  %s176_s6 = sshll.u32 %s1332_s30, 4  ;;  %s177_s6 = int_to_ptr.vmem [resolvable:$true] %s176_s6 }
   0x8   : > { %s202_s9 = sshll.u32 %s1598_s4, 4  ;;  %s1333_s10 = smov 64   ;;  %s203_s9 = int_to_ptr.hbm [resolvable:$true] %s202_s9 }
   0x9   : > { %p1173_p5 = pnand %p1376_p2, %p1172_p4  ;;  %s1334_s11 = smov 4  }
   0xa   : > { %s1335_s12 = smov [#allocation6]   ;;  %238 = sbr.rel (%p1383_p3) target bundleno = 394 (0x18a), region = 40 }
   0xb   : > { %1178 = dma.hbm_to_vmem [thread:$0]  (!%p1173_p5), %s189_s23, 1024, %s191_s29, [#allocation5], %s1333_s10, %s1333_s10, %s1334_s11  }
   0xc   : > { %1175 = dma.hbm_to_vmem [thread:$0]  (!%p1173_p5), %s175_s27, 1024, %s177_s6, [#allocation3], %s1333_s10, %s1333_s10, %s1334_s11  }
   0xd   : > { %s204_s13 = sshll.u32 %s1335_s12, 4  ;;  %s205_s13 = int_to_ptr.vmem [resolvable:$true] %s204_s13 }
   0xe   : > { %1181 = dma.hbm_to_vmem [thread:$0]  (!%p1173_p5), %s203_s9, 1024, %s205_s13, [#allocation5], %s1333_s10, %s1333_s10, %s1334_s11  }
   0xf   : > { %1320 = dma.done.wait (%p1376_p2), [#allocation3], 1024  }
  0x10   : > { %1322 = vsyncadd (%p1376_p2), [#allocation3], 4294966272 }
  0x11   : > { %1324 = dma.done.wait (%p1376_p2), [#allocation5], 2048  }
  0x12   : > { %1326 = vsyncadd (%p1376_p2), [#allocation5], 4294965248  ;;  %s989_s14 = sshll.u32 %s978_s19, 2  ;;  %v1132_v0 = vld [vmem:[#allocation4 + $0x38] sm:$0xff]  ;;  %v1131_v6 = vld [vmem:[#allocation4 + $0x30] sm:$0xff] }
  0x13   : > { %p283_p6 = scmp.lt.s32.totalorder %s989_s14, 7  ;;  %v1122_v1 = vld [vmem:[#allocation2 + $0x38] sm:$0xff]  ;;  %436 = vmatpush.bf16.msra.mxu0 %v1132_v0  ;;  %1152 = vmatpush.bf16.msra.mxu3 %v1132_v0  ;;  %v1121_v9 = vld [vmem:[#allocation2 + $0x30] sm:$0xff]  ;;  %v1130_v14 = vld [vmem:[#allocation4 + $0x28] sm:$0xff] }
  0x14   : > { %515 = vmatpush.bf16.msra.mxu1 %v1122_v1  ;;  %v1120_v16 = vld [vmem:[#allocation2 + $0x28] sm:$0xff]  ;;  %v1129_v20 = vld [vmem:[#allocation4 + $0x20] sm:$0xff]  ;;  %v1128_v25 = vld [vmem:[#allocation4 + $0x18] sm:$0xff] }
  0x15   : > { %s1605_s14 = smov (!%p283_p6, %s989_s14), 7  ;;  %v1119_v22 = vld [vmem:[#allocation2 + $0x20] sm:$0xff]  ;;  %v1118_v27 = vld [vmem:[#allocation2 + $0x18] sm:$0xff]  ;;  %v1127_v30 = vld [vmem:[#allocation4 + $0x10] sm:$0xff] }
  0x16   : > { %s1409_s15 = sshll.u32 %s1605_s14, 2  ;;  %v1117_v31 = vld [vmem:[#allocation2 + $0x10] sm:$0xff]  ;;  %v1126_v32 = vld [vmem:[#allocation4 + $0x8] sm:$0xff]  ;;  %v1125_v34 = vld [vmem:[#allocation4] sm:$0xff] }
  0x17   : > { %s1415_s21 = scalar_lea.vmem %s1595_s1, %s1409_s15  ;;  %s1421_s20 = scalar_lea.vmem %s1594_s0, %s1409_s15  ;;  %437 = vmatpush.bf16.msra.mxu0 %v1131_v6  ;;  %1153 = vmatpush.bf16.msra.mxu3 %v1131_v6  ;;  %v1116_v33 = vld [vmem:[#allocation2 + $0x8] sm:$0xff]  ;;  %v1115_v35 = vld [vmem:[#allocation2] sm:$0xff] }
  0x18   : > { %v336_v2 = vld [vmem:[%s1415_s21] sm:$0xff]   ;;  %v302_v7 = vld [vmem:[%s1421_s20 + $0x8] sm:$0xff]   ;;  %516 = vmatpush.bf16.msra.mxu1 %v1121_v9  ;;  %v1140_v9 = vld [vmem:[#allocation6 + $0x38] sm:$0xff]  ;;  %s298_s25 = scalar_lea.vmem %s1599_s5, %s1409_s15 }
  0x19   : > { %v340_v3 = vunpack.c.l.bf16 %v336_v2  ;;  %v300_v4 = vld [vmem:[%s1421_s20] sm:$0xff]   ;;  %v306_v10 = vunpack.c.l.bf16 %v302_v7  ;;  %v341_v12 = vunpack.c.h.bf16 %v336_v2  ;;  %v307_v17 = vunpack.c.h.bf16 %v302_v7  ;;  %v339_v21 = vld [vmem:[%s1415_s21 + $0x8] sm:$0xff]   ;;  %852 = vmatpush.bf16.msra.mxu2 %v1140_v9 }
  0x1a   : > { %v304_v5 = vunpack.c.l.bf16 %v300_v4  ;;  %v305_v15 = vunpack.c.h.bf16 %v300_v4  ;;  %v343_v24 = vunpack.c.h.bf16 %v339_v21  ;;  %v342_v26 = vunpack.c.l.bf16 %v339_v21  ;;  %v1123_v36 = vld [vmem:[%s1415_s21] sm:$0xff]  ;;  %v1124_v38 = vld [vmem:[%s1415_s21 + $0x8] sm:$0xff] }
  0x1b   : > { %v344_v8 = vmul.f32 %v340_v3, %v340_v3  ;;  %v310_v13 = vmul.f32 %v306_v10, %v306_v10  ;;  %v345_v18 = vmul.f32 %v341_v12, %v341_v12  ;;  %438 = vmatpush.bf16.msra.mxu0 %v1130_v14  ;;  %1154 = vmatpush.bf16.msra.mxu3 %v1130_v14  ;;  %v1113_v37 = vld [vmem:[%s1421_s20] sm:$0xff]  ;;  %v1114_v39 = vld [vmem:[%s1421_s20 + $0x8] sm:$0xff] }
  0x1c   : > { %v308_v11 = vmul.f32 %v304_v5, %v304_v5  ;;  %v309_v19 = vmul.f32 %v305_v15, %v305_v15  ;;  %517 = vmatpush.bf16.msra.mxu1 %v1120_v16  ;;  %v311_v23 = vmul.f32 %v307_v17, %v307_v17  ;;  %v347_v28 = vmul.f32 %v343_v24, %v343_v24 }
  0x1d   : > { %348 = vadd.xlane.f32.xlu1 %v344_v8  ;;  %316 = vadd.xlane.f32.xlu2 %v310_v13  ;;  %v346_v29 = vmul.f32 %v342_v26, %v342_v26 }
  0x1e   : > { %312 = vadd.xlane.f32.xlu0 %v308_v11 }
  0x1f   : > { %439 = vmatpush.bf16.msra.mxu0 %v1129_v20  ;;  %1155 = vmatpush.bf16.msra.mxu3 %v1129_v20 }
  0x20   : > { %518 = vmatpush.bf16.msra.mxu1 %v1119_v22 }
  0x23   : > { %440 = vmatpush.bf16.msra.mxu0 %v1128_v25  ;;  %1156 = vmatpush.bf16.msra.mxu3 %v1128_v25 }
  0x24   : > { %519 = vmatpush.bf16.msra.mxu1 %v1118_v27 }
  0x25   : > { %350 = vadd.xlane.f32.xlu1 %v345_v18  ;;  %318 = vadd.xlane.f32.xlu2 %v311_v23 }
  0x26   : > { %314 = vadd.xlane.f32.xlu0 %v309_v19  ;;  %v1139_v19 = vld [vmem:[#allocation6 + $0x30] sm:$0xff] }
  0x27   : > { %441 = vmatpush.bf16.msra.mxu0 %v1127_v30  ;;  %1157 = vmatpush.bf16.msra.mxu3 %v1127_v30 }
  0x28   : > { %520 = vmatpush.bf16.msra.mxu1 %v1117_v31  ;;  %853 = vmatpush.bf16.msra.mxu2 %v1139_v19 }
  0x2b   : > { %442 = vmatpush.bf16.msra.mxu0 %v1126_v32  ;;  %1158 = vmatpush.bf16.msra.mxu3 %v1126_v32 }
  0x2c   : > { %521 = vmatpush.bf16.msra.mxu1 %v1116_v33 }
  0x2d   : > { %354 = vadd.xlane.f32.xlu1 %v347_v28 }
  0x2e   : > { %352 = vadd.xlane.f32.xlu0 %v346_v29  ;;  %v1138_v29 = vld [vmem:[#allocation6 + $0x28] sm:$0xff] }
  0x2f   : > { %443 = vmatpush.bf16.msra.mxu0 %v1125_v34  ;;  %1159 = vmatpush.bf16.msra.mxu3 %v1125_v34 }
  0x30   : > { %522 = vmatpush.bf16.msra.mxu1 %v1115_v35  ;;  %854 = vmatpush.bf16.msra.mxu2 %v1138_v29 }
  0x32   : > { %444 = vmatmul.bf16.vlgmr.msra.gmra.mxu0 %v1123_v36  ;;  %449 = vmatmul.bf16.vlgmr.msra.gmra.mxu3 %v1124_v38 }
  0x33   : > { %523 = vmatmul.bf16.vlgmr.msra.gmra.mxu1 %v1113_v37 }
  0x43   : > { %528 = vmatmul.bf16.gmra.mxu1 %v1114_v39 }
  0x90   : > { %v349_v40 = vpop.xlane.xlu1 %348  ;;  %v317_v43 = vpop.xlane.xlu2 %316 }
  0x91   : > { %v313_v41 = vpop.xlane.xlu0 %312 }
  0x92   : > { %v356_v42 = vadd.f32 %v349_v40, %v313_v41 }
  0x94   : > { %1201 = vrsqrt.f32 %v356_v42  ;;  %vm541_vm0 = vcmp.eq.f32.partialorder %v356_v42, inf  ;;  %v544_v62 = vand.u32 2147483648, %v356_v42  ;;  %vm543_vm1 = vcmp.eq.f32.partialorder %v356_v42, 0.0 }
  0x98   : > { %v351_v44 = vpop.xlane.xlu1 %350  ;;  %v319_v50 = vpop.xlane.xlu2 %318 }
  0x99   : > { %v315_v45 = vpop.xlane.xlu0 %314 }
  0x9a   : > { %v1202_v46 = vpop.eup %1201  ;;  %v357_v47 = vadd.f32 %v351_v44, %v315_v45  ;;  %v1137_v44 = vld [vmem:[#allocation6 + $0x20] sm:$0xff] }
  0x9b   : > { %v535_v48 = vmul.f32 %v1202_v46, %v356_v42  ;;  %855 = vmatpush.bf16.msra.mxu2 %v1137_v44 }
  0x9c   : > { %1203 = vrsqrt.f32 %v357_v47  ;;  %vm553_vm2 = vcmp.eq.f32.partialorder %v357_v47, inf  ;;  %v556_v14 = vand.u32 2147483648, %v357_v47  ;;  %vm555_vm3 = vcmp.eq.f32.partialorder %v357_v47, 0.0 }
  0x9d   : > { %v536_v49 = vmul.f32 %v1202_v46, %v535_v48 }
  0x9f   : > { %v537_v51 = vmul.f32 0.5, %v536_v49 }
  0xa0   : > { %v355_v52 = vpop.xlane.xlu1 %354 }
  0xa1   : > { %v538_v53 = vsub.f32 1.5, %v537_v51  ;;  %v1431_v54 = vadd.f32 %v355_v52, %v319_v50  ;;  %v353_v55 = vpop.xlane.xlu0 %352  ;;  %v1136_v50 = vld [vmem:[#allocation6 + $0x18] sm:$0xff] }
  0xa2   : > { %v1204_v56 = vpop.eup %1203  ;;  %v1433_v57 = vadd.f32 %v353_v55, %v317_v43  ;;  %856 = vmatpush.bf16.msra.mxu2 %v1136_v50 }
  0xa3   : > { %v539_v58 = vmul.f32 %v1202_v46, %v538_v53  ;;  %v547_v59 = vmul.f32 %v1204_v56, %v357_v47  ;;  %1205 = vrsqrt.f32 %v1431_v54  ;;  %vm577_vm4 = vcmp.eq.f32.partialorder %v1431_v54, inf }
  0xa4   : > { %1207 = vrsqrt.f32 %v1433_v57  ;;  %vm565_vm5 = vcmp.eq.f32.partialorder %v1433_v57, inf  ;;  %v568_v28 = vand.u32 2147483648, %v1433_v57  ;;  %vm579_vm6 = vcmp.eq.f32.partialorder %v1431_v54, 0.0 }
  0xa5   : > { %v540_v60 = vmul.f32 %v539_v58, %v356_v42  ;;  %v548_v61 = vmul.f32 %v1204_v56, %v547_v59  ;;  %v580_v32 = vand.u32 2147483648, %v1431_v54  ;;  %vm567_vm9 = vcmp.eq.f32.partialorder %v1433_v57, 0.0  ;;  %v1135_v58 = vld [vmem:[#allocation6 + $0x10] sm:$0xff] }
  0xa6   : > { %857 = vmatpush.bf16.msra.mxu2 %v1135_v58 }
  0xa7   : > { %v549_v63 = vmul.f32 0.5, %v548_v61  ;;  %v542_v0 = vsel %vm541_vm0, %v356_v42, %v540_v60 }
  0xa8   : > { %v1437_v1 = vsel %vm543_vm1, %v544_v62, %v542_v0 }
  0xa9   : > { %v1206_v2 = vpop.eup %1205  ;;  %v550_v3 = vsub.f32 1.5, %v549_v63  ;;  %v582_v4 = vadd.f32 1e-12, %v1437_v1 }
  0xaa   : > { %v1208_v5 = vpop.eup %1207  ;;  %v571_v6 = vmul.f32 %v1206_v2, %v1431_v54 }
  0xab   : > { %v551_v7 = vmul.f32 %v1204_v56, %v550_v3  ;;  %v559_v8 = vmul.f32 %v1208_v5, %v1433_v57  ;;  %1209 = vrcp.f32 %v582_v4  ;;  %v597_v31 = vand.u32 2147483648, %v582_v4 }
  0xac   : > { %v572_v10 = vmul.f32 %v1206_v2, %v571_v6  ;;  %v595_v35 = vand.u32 2147483647, %v582_v4  ;;  %vm591_vm8 = vweird.f32 %v582_v4 }
  0xad   : > { %v552_v11 = vmul.f32 %v551_v7, %v357_v47  ;;  %v560_v12 = vmul.f32 %v1208_v5, %v559_v8  ;;  %v598_v46 = vor.u32 1.1754944e-38, %v597_v31  ;;  %v1134_v8 = vld [vmem:[#allocation6 + $0x8] sm:$0xff] }
  0xae   : > { %v573_v13 = vmul.f32 0.5, %v572_v10  ;;  %vm596_vm11 = vcmp.eq.f32.partialorder %v595_v35, 8.507059e+37  ;;  %858 = vmatpush.bf16.msra.mxu2 %v1134_v8 }
  0xaf   : > { %v561_v15 = vmul.f32 0.5, %v560_v12  ;;  %v554_v16 = vsel %vm553_vm2, %v357_v47, %v552_v11  ;;  %v445_v33 = vpop.f32.mrf.mxu0 }
  0xb0   : > { %v574_v17 = vsub.f32 1.5, %v573_v13  ;;  %v1442_v18 = vsel %vm555_vm3, %v556_v14, %v554_v16  ;;  %v524_v37 = vpop.f32.mrf.mxu1 }
  0xb1   : > { %v1210_v20 = vpop.eup %1209  ;;  %v562_v21 = vsub.f32 1.5, %v561_v15  ;;  %v583_v22 = vadd.f32 1e-12, %v1442_v18  ;;  %v525_v40 = vadd.f32 %v524_v37, %v445_v33 }
  0xb2   : > { %v575_v23 = vmul.f32 %v1206_v2, %v574_v17  ;;  %v587_v24 = vmul.f32 %v1210_v20, %v582_v4  ;;  %vm592_vm7 = vweird.f32 %v1210_v20 }
  0xb3   : > { %v563_v25 = vmul.f32 %v1208_v5, %v562_v21  ;;  %1211 = vrcp.f32 %v583_v22  ;;  %vm593_vm10 = vmor %vm591_vm8, %vm592_vm7  ;;  %v612_v55 = vand.u32 2147483648, %v583_v22  ;;  %vm606_vm13 = vweird.f32 %v583_v22 }
  0xb4   : > { %v576_v26 = vmul.f32 %v575_v23, %v1431_v54  ;;  %v588_v27 = vsub.f32 1.0, %v587_v24  ;;  %v1133_v23 = vld [vmem:[#allocation6] sm:$0xff] }
  0xb5   : > { %v564_v30 = vmul.f32 %v563_v25, %v1433_v57  ;;  %v613_v2 = vor.u32 1.1754944e-38, %v612_v55  ;;  %v450_v15 = vpop.f32.mrf.mxu3  ;;  %859 = vmatpush.bf16.msra.mxu2 %v1133_v23 }
  0xb6   : > { %v589_v34 = vmul.f32 %v1210_v20, %v588_v27  ;;  %v578_v36 = vsel %vm577_vm4, %v1431_v54, %v576_v26  ;;  %v610_v54 = vand.u32 2147483647, %v583_v22 }
  0xb7   : > { %v566_v38 = vsel %vm565_vm5, %v1433_v57, %v564_v30  ;;  %v1455_v39 = vsel %vm579_vm6, %v580_v32, %v578_v36  ;;  %v447_v59 = vpop.f32.mrf.mxu0 }
  0xb8   : > { %v590_v41 = vadd.f32 %v1210_v20, %v589_v34  ;;  %v1457_v42 = vsel %vm567_vm9, %v568_v28, %v566_v38  ;;  %v1460_v43 = vadd.f32 1e-12, %v1455_v39  ;;  %v526_v60 = vpop.f32.mrf.mxu1  ;;  %vm611_vm15 = vcmp.eq.f32.partialorder %v610_v54, 8.507059e+37 }
  0xb9   : > { %v1212_v45 = vpop.eup %1211  ;;  %v584_v47 = vadd.f32 1e-12, %v1457_v42  ;;  %v527_v5 = vadd.f32 %v526_v60, %v447_v59 }
  0xba   : > { %v594_v48 = vsel %vm593_vm10, %v1210_v20, %v590_v41  ;;  %v602_v49 = vmul.f32 %v1212_v45, %v583_v22  ;;  %1213 = vrcp.f32 %v1460_v43  ;;  %vm607_vm12 = vweird.f32 %v1212_v45 }
  0xbb   : > { %v599_v51 = vsel %vm596_vm11, %v598_v46, %v594_v48  ;;  %1215 = vrcp.f32 %v584_v47  ;;  %vm608_vm14 = vmor %vm606_vm13, %vm607_vm12  ;;  %v625_v16 = vand.u32 2147483647, %v584_v47  ;;  %v627_v17 = vand.u32 2147483648, %v584_v47 }
  0xbc   : > { %v1465_v52 = vmul.f32 %v599_v51, %v525_v40  ;;  %v603_v53 = vsub.f32 1.0, %v602_v49  ;;  %vm621_vm1 = vweird.f32 %v584_v47  ;;  %v642_v35 = vand.u32 2147483648, %v1460_v43 }
  0xbd   : > { %vm626_vm3 = vcmp.eq.f32.partialorder %v625_v16, 8.507059e+37  ;;  %v628_v29 = vor.u32 1.1754944e-38, %v627_v17  ;;  %vm636_vm5 = vweird.f32 %v1460_v43  ;;  %v640_v44 = vand.u32 2147483647, %v1460_v43  ;;  %v452_v51 = vpop.f32.mrf.mxu3 }
  0xbe   : > { %v1075_v56 = vclamps-f32 %v1465_v52, 1.0  ;;  %v604_v57 = vmul.f32 %v1212_v45, %v603_v53  ;;  %v643_v54 = vor.u32 1.1754944e-38, %v642_v35 }
  0xbf   : > { %vm641_vm7 = vcmp.eq.f32.partialorder %v640_v44, 8.507059e+37 }
  0xc0   : > { %v1468_v61 = vpop.eup %1213  ;;  %v1472_v62 = vand.u32 2147483647, %v1075_v56  ;;  %v605_v63 = vadd.f32 %v1212_v45, %v604_v57  ;;  %v529_v24 = vpop.f32.mrf.mxu1 }
  0xc1   : > { %v1216_v0 = vpop.eup %1215  ;;  %v632_v3 = vmul.f32 %v1468_v61, %v1460_v43  ;;  %v530_v27 = vadd.f32 %v529_v24, %v450_v15  ;;  %vm637_vm4 = vweird.f32 %v1468_v61 }
  0xc2   : > { %v662_v4 = vsub.f32 1.0, %v1472_v62  ;;  %v609_v6 = vsel %vm608_vm14, %v1212_v45, %v605_v63  ;;  %v617_v7 = vmul.f32 %v1216_v0, %v584_v47  ;;  %v718_v11 = vmul.f32 0.0006534779, %v1472_v62  ;;  %vm1503_vm6 = vmor %vm636_vm5, %vm637_vm4 }
  0xc3   : > { %v614_v9 = vsel %vm611_vm15, %v613_v2, %v609_v6  ;;  %v633_v10 = vsub.f32 1.0, %v632_v3  ;;  %vm622_vm0 = vweird.f32 %v1216_v0 }
  0xc4   : > { %v1478_v12 = vmax.f32 %v662_v4, 0.0  ;;  %v1480_v13 = vmul.f32 %v614_v9, %v527_v5  ;;  %v618_v14 = vsub.f32 1.0, %v617_v7  ;;  %v722_v19 = vadd.f32 -0.0035079354, %v718_v11  ;;  %vm623_vm2 = vmor %vm621_vm1, %vm622_vm0 }
  0xc5   : > { %v634_v22 = vmul.f32 %v1468_v61, %v633_v10 }
  0xc6   : > { %v1076_v20 = vclamps-f32 %v1480_v13, 1.0  ;;  %v619_v21 = vmul.f32 %v1216_v0, %v618_v14  ;;  %1217 = vrsqrt.f32 %v1478_v12  ;;  %v726_v25 = vmul.f32 %v722_v19, %v1472_v62 }
  0xc7   : > { %v635_v33 = vadd.f32 %v1468_v61, %v634_v22  ;;  %vm677_vm8 = vcmp.eq.f32.partialorder %v1478_v12, inf  ;;  %vm679_vm9 = vcmp.eq.f32.partialorder %v1478_v12, 0.0 }
  0xc8   : > { %v1488_v26 = vand.u32 2147483647, %v1076_v20  ;;  %v620_v28 = vadd.f32 %v1216_v0, %v619_v21  ;;  %v730_v30 = vadd.f32 0.010194921, %v726_v25  ;;  %v531_v53 = vpop.f32.mrf.mxu1 }
  0xc9   : > { %v639_v50 = vsel %vm1503_vm6, %v1468_v61, %v635_v33  ;;  %v532_v59 = vadd.f32 %v531_v53, %v452_v51 }
  0xca   : > { %v663_v31 = vsub.f32 1.0, %v1488_v26  ;;  %v624_v32 = vsel %vm623_vm2, %v1216_v0, %v620_v28  ;;  %v719_v36 = vmul.f32 0.0006534779, %v1488_v26  ;;  %v734_v37 = vmul.f32 %v730_v30, %v1472_v62 }
  0xcb   : > { %v629_v34 = vsel %vm626_vm3, %v628_v29, %v624_v32  ;;  %v644_v60 = vsel %vm641_vm7, %v643_v54, %v639_v50  ;;  %v680_v32 = vand.u32 2147483648, %v1478_v12 }
  0xcc   : > { %v1218_v38 = vpop.eup %1217  ;;  %v1497_v40 = vmax.f32 %v663_v31, 0.0  ;;  %v1499_v41 = vmul.f32 %v629_v34, %v530_v27  ;;  %v723_v47 = vadd.f32 -0.0035079354, %v719_v36  ;;  %v738_v48 = vadd.f32 -0.026078133, %v734_v37 }
  0xcd   : > { %v671_v46 = vmul.f32 %v1218_v38, %v1478_v12  ;;  %v1520_v3 = vmul.f32 %v644_v60, %v532_v59  ;;  %v770_v27 = vmax.f32 %v1075_v56, 0.0 }
  0xce   : > { %v1077_v49 = vclamps-f32 %v1499_v41, 1.0  ;;  %1219 = vrsqrt.f32 %v1497_v40  ;;  %v727_v55 = vmul.f32 %v723_v47, %v1488_v26  ;;  %v742_v57 = vmul.f32 %v738_v48, %v1472_v62 }
  0xcf   : > { %v672_v43 = vmul.f32 %v1218_v38, %v671_v46  ;;  %v1078_v10 = vclamps-f32 %v1520_v3, 1.0  ;;  %v774_v37 = vmul.f32 3.1415927, %v770_v27  ;;  %v771_v46 = vmax.f32 %v1076_v20, 0.0 }
  0xd0   : > { %v1517_v58 = vand.u32 2147483647, %v1077_v49  ;;  %v731_v0 = vadd.f32 0.010194921, %v727_v55  ;;  %v746_v61 = vadd.f32 0.08952983, %v742_v57 }
  0xd1   : > { %v673_v63 = vmul.f32 0.5, %v672_v43  ;;  %v1531_v17 = vand.u32 2147483647, %v1078_v10  ;;  %vm689_vm10 = vcmp.eq.f32.partialorder %v1497_v40, inf  ;;  %v692_v54 = vand.u32 2147483648, %v1497_v40 }
  0xd2   : > { %v664_v2 = vsub.f32 1.0, %v1517_v58  ;;  %v720_v4 = vmul.f32 0.0006534779, %v1517_v58  ;;  %v735_v6 = vmul.f32 %v731_v0, %v1488_v26  ;;  %v750_v7 = vmul.f32 %v746_v61, %v1472_v62 }
  0xd3   : > { %v674_v5 = vsub.f32 1.5, %v673_v63  ;;  %v665_v25 = vsub.f32 1.0, %v1531_v17  ;;  %v721_v33 = vmul.f32 0.0006534779, %v1531_v17  ;;  %vm691_vm11 = vcmp.eq.f32.partialorder %v1497_v40, 0.0 }
  0xd4   : > { %v1220_v8 = vpop.eup %1219  ;;  %v1525_v9 = vmax.f32 %v664_v2, 0.0  ;;  %v739_v15 = vadd.f32 -0.026078133, %v735_v6  ;;  %v754_v16 = vadd.f32 -1.0707921, %v750_v7 }
  0xd5   : > { %v675_v11 = vmul.f32 %v1218_v38, %v674_v5  ;;  %v683_v14 = vmul.f32 %v1220_v8, %v1497_v40  ;;  %v724_v19 = vadd.f32 -0.0035079354, %v720_v4  ;;  %v1542_v31 = vmax.f32 %v665_v25, 0.0 }
  0xd6   : > { %1221 = vrsqrt.f32 %v1525_v9  ;;  %v743_v23 = vmul.f32 %v739_v15, %v1488_v26  ;;  %v758_v24 = vmul.f32 %v754_v16, %v1472_v62  ;;  %v725_v47 = vadd.f32 -0.0035079354, %v721_v33 }
  0xd7   : > { %v676_v21 = vmul.f32 %v675_v11, %v1478_v12  ;;  %v684_v22 = vmul.f32 %v1220_v8, %v683_v14  ;;  %v728_v34 = vmul.f32 %v724_v19, %v1517_v58  ;;  %1223 = vrsqrt.f32 %v1542_v31 }
  0xd8   : > { %v747_v30 = vadd.f32 0.08952983, %v743_v23  ;;  %v762_v36 = vadd.f32 0.99999994, %v758_v24  ;;  %v729_v43 = vmul.f32 %v725_v47, %v1531_v17  ;;  %v775_v60 = vmul.f32 3.1415927, %v771_v46 }
  0xd9   : > { %v678_v28 = vsel %vm677_vm8, %v1478_v12, %v676_v21  ;;  %v685_v29 = vmul.f32 0.5, %v684_v22  ;;  %v732_v48 = vadd.f32 0.010194921, %v728_v34  ;;  %vm701_vm12 = vcmp.eq.f32.partialorder %v1525_v9, inf }
  0xda   : > { %v751_v35 = vmul.f32 %v747_v30, %v1488_v26  ;;  %v681_v56 = vsel %vm679_vm9, %v680_v32, %v678_v28  ;;  %vm703_vm13 = vcmp.eq.f32.partialorder %v1525_v9, 0.0  ;;  %vm713_vm14 = vcmp.eq.f32.partialorder %v1542_v31, inf }
  0xdb   : > { %v686_v62 = vsub.f32 1.5, %v685_v29  ;;  %v766_v51 = vmul.f32 %v762_v36, %v681_v56  ;;  %v736_v55 = vmul.f32 %v732_v48, %v1517_v58  ;;  %vm715_vm15 = vcmp.eq.f32.partialorder %v1542_v31, 0.0 }
  0xdc   : > { %v1222_v52 = vpop.eup %1221  ;;  %v755_v44 = vadd.f32 -1.0707921, %v751_v35  ;;  %v772_v35 = vmax.f32 %v1077_v49, 0.0 }
  0xdd   : > { %v687_v38 = vmul.f32 %v1220_v8, %v686_v62  ;;  %v695_v45 = vmul.f32 %v1222_v52, %v1525_v9  ;;  %v1224_v59 = vpop.eup %1223  ;;  %v740_v0 = vadd.f32 -0.026078133, %v736_v55  ;;  %v778_v2 = vadd.f32 %v774_v37, %v766_v51 }
  0xde   : > { %v759_v50 = vmul.f32 %v755_v44, %v1488_v26  ;;  %v733_v26 = vadd.f32 0.010194921, %v729_v43  ;;  %v707_v5 = vmul.f32 %v1224_v59, %v1542_v31  ;;  %v716_v37 = vand.u32 2147483648, %v1542_v31 }
  0xdf   : > { %v688_v12 = vmul.f32 %v687_v38, %v1497_v40  ;;  %v696_v53 = vmul.f32 %v1222_v52, %v695_v45  ;;  %v744_v7 = vmul.f32 %v740_v0, %v1517_v58  ;;  %v782_v16 = vmul.f32 %v778_v2, %v1437_v1 }
  0xe0   : > { %v763_v13 = vadd.f32 0.99999994, %v759_v50  ;;  %v737_v6 = vmul.f32 %v733_v26, %v1531_v17  ;;  %v708_v14 = vmul.f32 %v1224_v59, %v707_v5  ;;  %v704_v1 = vand.u32 2147483648, %v1525_v9 }
  0xe1   : > { %v690_v57 = vsel %vm689_vm10, %v1497_v40, %v688_v12  ;;  %v697_v20 = vmul.f32 0.5, %v696_v53  ;;  %v748_v15 = vadd.f32 0.08952983, %v744_v7  ;;  %v776_v41 = vmul.f32 3.1415927, %v772_v35 }
  0xe2   : > { %v693_v63 = vsel %vm691_vm11, %v692_v54, %v690_v57  ;;  %v741_v40 = vadd.f32 -0.026078133, %v737_v6  ;;  %v709_v22 = vmul.f32 0.5, %v708_v14 }
  0xe3   : > { %v767_v61 = vmul.f32 %v763_v13, %v693_v63  ;;  %v698_v4 = vsub.f32 1.5, %v697_v20  ;;  %v752_v24 = vmul.f32 %v748_v15, %v1517_v58 }
  0xe4   : > { %v745_v23 = vmul.f32 %v741_v40, %v1531_v17  ;;  %v710_v27 = vsub.f32 1.5, %v709_v22 }
  0xe5   : > { %v779_v8 = vadd.f32 %v775_v60, %v767_v61  ;;  %v699_v11 = vmul.f32 %v1222_v52, %v698_v4  ;;  %v756_v30 = vadd.f32 -1.0707921, %v752_v24 }
  0xe6   : > { %v749_v29 = vadd.f32 0.08952983, %v745_v23  ;;  %v711_v32 = vmul.f32 %v1224_v59, %v710_v27 }
  0xe7   : > { %v783_v19 = vmul.f32 %v779_v8, %v1442_v18  ;;  %v700_v21 = vmul.f32 %v699_v11, %v1525_v9  ;;  %v760_v33 = vmul.f32 %v756_v30, %v1517_v58 }
  0xe8   : > { %v753_v18 = vmul.f32 %v749_v29, %v1531_v17  ;;  %v712_v62 = vmul.f32 %v711_v32, %v1542_v31 }
  0xe9   : > { %v786_v25 = vpack.c.bf16 %v783_v19, %v782_v16  ;;  %v702_v28 = vsel %vm701_vm12, %v1525_v9, %v700_v21  ;;  %v764_v52 = vadd.f32 0.99999994, %v760_v33  ;;  %v773_v9 = vmax.f32 %v1078_v10, 0.0 }
  0xea   : > { %v705_v34 = vsel %vm703_vm13, %v704_v1, %v702_v28  ;;  %v757_v36 = vadd.f32 -1.0707921, %v753_v18  ;;  %v714_v56 = vsel %vm713_vm14, %v1542_v31, %v712_v62 }
  0xeb   : > { %860 = vmatmul.bf16.vlgmr.msra.gmra.mxu2 %v786_v25  ;;  %v768_v38 = vmul.f32 %v764_v52, %v705_v34  ;;  %v717_v44 = vsel %vm715_vm15, %v716_v37, %v714_v56  ;;  %v777_v45 = vmul.f32 3.1415927, %v773_v9 }
  0xec   : > { %v761_v58 = vmul.f32 %v757_v36, %v1531_v17 }
  0xed   : > { %v780_v47 = vadd.f32 %v776_v41, %v768_v38 }
  0xee   : > { %v765_v49 = vadd.f32 0.99999994, %v761_v58 }
  0xef   : > { %v784_v12 = vmul.f32 %v780_v47, %v1457_v42 }
  0xf0   : > { %v769_v46 = vmul.f32 %v765_v49, %v717_v44 }
  0xf2   : > { %v781_v48 = vadd.f32 %v777_v45, %v769_v46 }
  0xf4   : > { %v785_v50 = vmul.f32 %v781_v48, %v1455_v39 }
  0xf6   : > { %v787_v51 = vpack.c.bf16 %v785_v50, %v784_v12 }
  0xfb   : > { %865 = vmatmul.bf16.gmra.mxu2 %v787_v51 }
 0x16e   : > { %v861_v3 = vpop.f32.mrf.mxu2 }
 0x176   : > { %v863_v10 = vpop.f32.mrf.mxu2 }
 0x177   : > { %v1144_v17 = vpack.c.bf16 %v863_v10, %v861_v3 }
 0x179   : > { %1145 = vst [vmem:[%s298_s25] sm:$0xff] %v1144_v17  }
 0x17e   : > { %v866_v31 = vpop.f32.mrf.mxu2 }
 0x186   : > { %v868_v53 = vpop.f32.mrf.mxu2 }
 0x187   : > { %v1149_v54 = vpack.c.bf16 %v868_v53, %v866_v31 }
 0x189   : > { %1151 = vst [vmem:[%s298_s25 + $0x8] sm:$0xff] %v1149_v54  }
 0x18a PF: > { %s17_s18 = sadd.s32 1, %s1329_s18  }
 0x18b   : > { %p14_p7 = scmp.ge.s32.totalorder %s17_s18, 4  }
 0x18d   :  { %16 = sbr.rel (!%p14_p7) target bundleno = 2 (0x2), region = 86 }
 0x192   :  { %901 = vsyncpa [#allocation3], 1 }
 0x193   :  { %903 = vsyncpa [#allocation3 + $0x1], 1 }
 0x194   :  { %904 = vsyncpa [#allocation5], 1 }

// kernel: dgplvm_forward.7
= control target key start
LH: loop header
LB: loop body
LE: loop exit
PB: predicated region body
PF: predicated region fallthrough
CT: control target
= control target key end

     0   :  { %s1143_s18 = smov 0   ;;  %s1416_s0 = inlined_call_operand.vmem [shape: bf16[64,128], index: 0, kind: input, shape index: {}]   ;;  %s1417_s1 = inlined_call_operand.vmem [shape: bf16[64,128], index: 1, kind: input, shape index: {}]   ;;  %s1418_s2 = inlined_call_operand.vmem [shape: bf16[128,128], index: 2, kind: input, shape index: {}]   ;;  %s1419_s3 = inlined_call_operand.vmem [shape: bf16[128,128], index: 3, kind: input, shape index: {}]   ;;  %s1420_s4 = inlined_call_operand.vmem [shape: bf16[128,128], index: 4, kind: input, shape index: {}]   ;;  %s1421_s5 = inlined_call_operand.vmem [shape: bf16[64,128], index: 5, kind: output, shape index: {}]  }
   0x1 LB: > { %s897_s19 = sadd.s32 4294967295, %s1111_s18   ;;  %p901_p0 = scmp.ge.s32.totalorder %s1111_s18, 1  ;;  %s1111_s18 = sphi %s1143_s18, %s15_s18  }
   0x2   : > { %p199_p1 = scmp.lt.s32.totalorder %s1111_s18, 3 }
   0x4   : > { %p200_p2 = pnand %p901_p0, %p199_p1 }
   0x5   : > { %s902_s24 = sshll.u32 (!%p200_p2), %s897_s19, 2 }
   0x6   : > { %203 = sbr.rel (%p200_p2) target bundleno = 385 (0x181), region = 40  ;;  %p233_p3 = scmp.lt.s32.totalorder (!%p200_p2), %s902_s24, 7 }
   0xb   : > { %v1045_v0 = vld [vmem:[%s1419_s3 + $0x38] sm:$0xff]  ;;  %v1044_v2 = vld [vmem:[%s1419_s3 + $0x30] sm:$0xff]  ;;  %s1423_s24 = smov (!%p233_p3, %s902_s24), 7  ;;  %v1043_v4 = vld [vmem:[%s1419_s3 + $0x28] sm:$0xff] }
   0xc   : > { %v1035_v1 = vld [vmem:[%s1418_s2 + $0x38] sm:$0xff]  ;;  %386 = vmatpush.bf16.msra.mxu0 %v1045_v0  ;;  %v1034_v3 = vld [vmem:[%s1418_s2 + $0x30] sm:$0xff]  ;;  %1065 = vmatpush.bf16.msra.mxu3 %v1045_v0  ;;  %s1163_s29 = sshll.u32 %s1423_s24, 2  ;;  %v1033_v5 = vld [vmem:[%s1418_s2 + $0x28] sm:$0xff] }
   0xd   : > { %465 = vmatpush.bf16.msra.mxu1 %v1035_v1  ;;  %s1175_s11 = scalar_lea.vmem %s1417_s1, %s1163_s29  ;;  %s1181_s14 = scalar_lea.vmem %s1416_s0, %s1163_s29  ;;  %v1042_v14 = vld [vmem:[%s1419_s3 + $0x20] sm:$0xff]  ;;  %v1041_v20 = vld [vmem:[%s1419_s3 + $0x18] sm:$0xff]  ;;  %v1040_v26 = vld [vmem:[%s1419_s3 + $0x10] sm:$0xff] }
   0xe   : > { %v286_v6 = vld [vmem:[%s1175_s11] sm:$0xff]   ;;  %v252_v8 = vld [vmem:[%s1181_s14 + $0x8] sm:$0xff]   ;;  %v1031_v21 = vld [vmem:[%s1418_s2 + $0x18] sm:$0xff]  ;;  %s248_s7 = scalar_lea.vmem %s1421_s5, %s1163_s29 }
   0xf   : > { %v250_v7 = vld [vmem:[%s1181_s14] sm:$0xff]   ;;  %v290_v9 = vunpack.c.l.bf16 %v286_v6  ;;  %v256_v11 = vunpack.c.l.bf16 %v252_v8  ;;  %v291_v17 = vunpack.c.h.bf16 %v286_v6  ;;  %v257_v19 = vunpack.c.h.bf16 %v252_v8  ;;  %v289_v24 = vld [vmem:[%s1175_s11 + $0x8] sm:$0xff]   ;;  %v1030_v27 = vld [vmem:[%s1418_s2 + $0x10] sm:$0xff] }
  0x10   : > { %387 = vmatpush.bf16.msra.mxu0 %v1044_v2  ;;  %1066 = vmatpush.bf16.msra.mxu3 %v1044_v2  ;;  %v254_v10 = vunpack.c.l.bf16 %v250_v7  ;;  %v1032_v15 = vld [vmem:[%s1418_s2 + $0x20] sm:$0xff]  ;;  %v255_v18 = vunpack.c.h.bf16 %v250_v7  ;;  %v293_v28 = vunpack.c.h.bf16 %v289_v24  ;;  %v292_v29 = vunpack.c.l.bf16 %v289_v24  ;;  %v1039_v30 = vld [vmem:[%s1419_s3 + $0x8] sm:$0xff] }
  0x11   : > { %466 = vmatpush.bf16.msra.mxu1 %v1034_v3  ;;  %v294_v12 = vmul.f32 %v290_v9, %v290_v9  ;;  %v260_v16 = vmul.f32 %v256_v11, %v256_v11  ;;  %v295_v22 = vmul.f32 %v291_v17, %v291_v17  ;;  %v261_v25 = vmul.f32 %v257_v19, %v257_v19  ;;  %v1029_v31 = vld [vmem:[%s1418_s2 + $0x8] sm:$0xff]  ;;  %v1038_v34 = vld [vmem:[%s1419_s3] sm:$0xff]  ;;  %v1053_v9 = vld [vmem:[%s1420_s4 + $0x38] sm:$0xff] }
  0x12   : > { %v258_v13 = vmul.f32 %v254_v10, %v254_v10  ;;  %v259_v23 = vmul.f32 %v255_v18, %v255_v18  ;;  %v297_v32 = vmul.f32 %v293_v28, %v293_v28  ;;  %v296_v33 = vmul.f32 %v292_v29, %v292_v29  ;;  %v1028_v35 = vld [vmem:[%s1418_s2] sm:$0xff]  ;;  %v1037_v38 = vld [vmem:[%s1175_s11 + $0x8] sm:$0xff]  ;;  %802 = vmatpush.bf16.msra.mxu2 %v1053_v9  ;;  %v1052_v19 = vld [vmem:[%s1420_s4 + $0x30] sm:$0xff] }
  0x13   : > { %298 = vadd.xlane.f32.xlu1 %v294_v12  ;;  %266 = vadd.xlane.f32.xlu2 %v260_v16  ;;  %v1036_v36 = vld [vmem:[%s1175_s11] sm:$0xff]  ;;  %v1027_v39 = vld [vmem:[%s1181_s14 + $0x8] sm:$0xff] }
  0x14   : > { %388 = vmatpush.bf16.msra.mxu0 %v1043_v4  ;;  %1067 = vmatpush.bf16.msra.mxu3 %v1043_v4  ;;  %v1026_v37 = vld [vmem:[%s1181_s14] sm:$0xff]  ;;  %v1051_v28 = vld [vmem:[%s1420_s4 + $0x28] sm:$0xff] }
  0x15   : > { %467 = vmatpush.bf16.msra.mxu1 %v1033_v5  ;;  %262 = vadd.xlane.f32.xlu0 %v258_v13  ;;  %v1047_v9 = vld [vmem:[%s1420_s4 + $0x8] sm:$0xff] }
  0x16   : > { %803 = vmatpush.bf16.msra.mxu2 %v1052_v19 }
  0x18   : > { %389 = vmatpush.bf16.msra.mxu0 %v1042_v14  ;;  %1068 = vmatpush.bf16.msra.mxu3 %v1042_v14 }
  0x19   : > { %468 = vmatpush.bf16.msra.mxu1 %v1032_v15 }
  0x1a   : > { %804 = vmatpush.bf16.msra.mxu2 %v1051_v28 }
  0x1b   : > { %300 = vadd.xlane.f32.xlu1 %v295_v22  ;;  %268 = vadd.xlane.f32.xlu2 %v261_v25 }
  0x1c   : > { %390 = vmatpush.bf16.msra.mxu0 %v1041_v20  ;;  %1069 = vmatpush.bf16.msra.mxu3 %v1041_v20 }
  0x1d   : > { %469 = vmatpush.bf16.msra.mxu1 %v1031_v21  ;;  %264 = vadd.xlane.f32.xlu0 %v259_v23 }
  0x20   : > { %391 = vmatpush.bf16.msra.mxu0 %v1040_v26  ;;  %1070 = vmatpush.bf16.msra.mxu3 %v1040_v26 }
  0x21   : > { %470 = vmatpush.bf16.msra.mxu1 %v1030_v27 }
  0x23   : > { %304 = vadd.xlane.f32.xlu1 %v297_v32 }
  0x24   : > { %392 = vmatpush.bf16.msra.mxu0 %v1039_v30  ;;  %1071 = vmatpush.bf16.msra.mxu3 %v1039_v30 }
  0x25   : > { %471 = vmatpush.bf16.msra.mxu1 %v1029_v31  ;;  %302 = vadd.xlane.f32.xlu0 %v296_v33 }
  0x28   : > { %393 = vmatpush.bf16.msra.mxu0 %v1038_v34  ;;  %1072 = vmatpush.bf16.msra.mxu3 %v1038_v34 }
  0x29   : > { %472 = vmatpush.bf16.msra.mxu1 %v1028_v35 }
  0x2b   : > { %394 = vmatmul.bf16.vlgmr.msra.gmra.mxu0 %v1036_v36  ;;  %399 = vmatmul.bf16.vlgmr.msra.gmra.mxu3 %v1037_v38  ;;  %v1050_v36 = vld [vmem:[%s1420_s4 + $0x20] sm:$0xff] }
  0x2c   : > { %473 = vmatmul.bf16.vlgmr.msra.gmra.mxu1 %v1026_v37  ;;  %805 = vmatpush.bf16.msra.mxu2 %v1050_v36 }
  0x3c   : > { %478 = vmatmul.bf16.gmra.mxu1 %v1027_v39 }
  0x86   : > { %v299_v40 = vpop.xlane.xlu1 %298  ;;  %v267_v43 = vpop.xlane.xlu2 %266 }
  0x88   : > { %v263_v41 = vpop.xlane.xlu0 %262 }
  0x89   : > { %v306_v42 = vadd.f32 %v299_v40, %v263_v41 }
  0x8b   : > { %1081 = vrsqrt.f32 %v306_v42  ;;  %vm491_vm0 = vcmp.eq.f32.partialorder %v306_v42, inf  ;;  %v494_v62 = vand.u32 2147483648, %v306_v42  ;;  %vm493_vm1 = vcmp.eq.f32.partialorder %v306_v42, 0.0 }
  0x8e   : > { %v301_v44 = vpop.xlane.xlu1 %300  ;;  %v269_v51 = vpop.xlane.xlu2 %268 }
  0x90   : > { %v265_v45 = vpop.xlane.xlu0 %264 }
  0x91   : > { %v1082_v46 = vpop.eup %1081  ;;  %v307_v47 = vadd.f32 %v301_v44, %v265_v45 }
  0x92   : > { %v485_v48 = vmul.f32 %v1082_v46, %v306_v42 }
  0x93   : > { %1083 = vrsqrt.f32 %v307_v47  ;;  %vm503_vm2 = vcmp.eq.f32.partialorder %v307_v47, inf  ;;  %v506_v13 = vand.u32 2147483648, %v307_v47  ;;  %vm505_vm3 = vcmp.eq.f32.partialorder %v307_v47, 0.0 }
  0x94   : > { %v486_v49 = vmul.f32 %v1082_v46, %v485_v48 }
  0x96   : > { %v487_v50 = vmul.f32 0.5, %v486_v49  ;;  %v305_v53 = vpop.xlane.xlu1 %304 }
  0x97   : > { %v1221_v56 = vadd.f32 %v305_v53, %v269_v51  ;;  %v1049_v51 = vld [vmem:[%s1420_s4 + $0x18] sm:$0xff] }
  0x98   : > { %v488_v52 = vsub.f32 1.5, %v487_v50  ;;  %v303_v54 = vpop.xlane.xlu0 %302  ;;  %806 = vmatpush.bf16.msra.mxu2 %v1049_v51 }
  0x99   : > { %v1084_v55 = vpop.eup %1083  ;;  %v1223_v57 = vadd.f32 %v303_v54, %v267_v43  ;;  %1085 = vrsqrt.f32 %v1221_v56  ;;  %vm527_vm6 = vcmp.eq.f32.partialorder %v1221_v56, inf  ;;  %v530_v32 = vand.u32 2147483648, %v1221_v56 }
  0x9a   : > { %v489_v58 = vmul.f32 %v1082_v46, %v488_v52  ;;  %v497_v59 = vmul.f32 %v1084_v55, %v307_v47  ;;  %vm529_vm9 = vcmp.eq.f32.partialorder %v1221_v56, 0.0 }
  0x9b   : > { %1087 = vrsqrt.f32 %v1223_v57  ;;  %vm515_vm4 = vcmp.eq.f32.partialorder %v1223_v57, inf  ;;  %vm517_vm5 = vcmp.eq.f32.partialorder %v1223_v57, 0.0  ;;  %v518_v37 = vand.u32 2147483648, %v1223_v57 }
  0x9c   : > { %v490_v60 = vmul.f32 %v489_v58, %v306_v42  ;;  %v498_v61 = vmul.f32 %v1084_v55, %v497_v59 }
  0x9e   : > { %v499_v63 = vmul.f32 0.5, %v498_v61  ;;  %v492_v0 = vsel %vm491_vm0, %v306_v42, %v490_v60  ;;  %v1048_v60 = vld [vmem:[%s1420_s4 + $0x10] sm:$0xff] }
  0x9f   : > { %v1227_v1 = vsel %vm493_vm1, %v494_v62, %v492_v0  ;;  %v1086_v4 = vpop.eup %1085  ;;  %807 = vmatpush.bf16.msra.mxu2 %v1048_v60 }
  0xa0   : > { %v500_v2 = vsub.f32 1.5, %v499_v63  ;;  %v532_v3 = vadd.f32 1e-12, %v1227_v1  ;;  %v521_v7 = vmul.f32 %v1086_v4, %v1221_v56 }
  0xa1   : > { %v1088_v5 = vpop.eup %1087 }
  0xa2   : > { %v501_v6 = vmul.f32 %v1084_v55, %v500_v2  ;;  %1089 = vrcp.f32 %v532_v3  ;;  %v509_v8 = vmul.f32 %v1088_v5, %v1223_v57  ;;  %v522_v11 = vmul.f32 %v1086_v4, %v521_v7 }
  0xa3   : > { %v547_v31 = vand.u32 2147483648, %v532_v3  ;;  %v545_v35 = vand.u32 2147483647, %v532_v3  ;;  %vm541_vm8 = vweird.f32 %v532_v3  ;;  %808 = vmatpush.bf16.msra.mxu2 %v1047_v9 }
  0xa4   : > { %v502_v10 = vmul.f32 %v501_v6, %v307_v47  ;;  %v510_v12 = vmul.f32 %v1088_v5, %v509_v8  ;;  %v523_v14 = vmul.f32 0.5, %v522_v11 }
  0xa5   : > { %v548_v45 = vor.u32 1.1754944e-38, %v547_v31  ;;  %vm546_vm11 = vcmp.eq.f32.partialorder %v545_v35, 8.507059e+37 }
  0xa6   : > { %v504_v15 = vsel %vm503_vm2, %v307_v47, %v502_v10  ;;  %v511_v16 = vmul.f32 0.5, %v510_v12  ;;  %v524_v21 = vsub.f32 1.5, %v523_v14 }
  0xa7   : > { %v1235_v18 = vsel %vm505_vm3, %v506_v13, %v504_v15 }
  0xa8   : > { %v1090_v20 = vpop.eup %1089  ;;  %v1241_v22 = vadd.f32 1e-12, %v1235_v18  ;;  %v512_v23 = vsub.f32 1.5, %v511_v16  ;;  %v525_v25 = vmul.f32 %v1086_v4, %v524_v21  ;;  %v395_v30 = vpop.f32.mrf.mxu0 }
  0xa9   : > { %v474_v17 = vpop.f32.mrf.mxu1  ;;  %v537_v24 = vmul.f32 %v1090_v20, %v532_v3  ;;  %vm542_vm7 = vweird.f32 %v1090_v20 }
  0xaa   : > { %1091 = vrcp.f32 %v1241_v22  ;;  %v513_v26 = vmul.f32 %v1088_v5, %v512_v23  ;;  %v526_v29 = vmul.f32 %v525_v25, %v1221_v56  ;;  %v475_v39 = vadd.f32 %v474_v17, %v395_v30  ;;  %vm543_vm10 = vmor %vm541_vm8, %vm542_vm7 }
  0xab   : > { %v538_v27 = vsub.f32 1.0, %v537_v24  ;;  %vm556_vm13 = vweird.f32 %v1241_v22  ;;  %v1046_v24 = vld [vmem:[%s1420_s4] sm:$0xff] }
  0xac   : > { %v514_v33 = vmul.f32 %v513_v26, %v1223_v57  ;;  %v528_v38 = vsel %vm527_vm6, %v1221_v56, %v526_v29  ;;  %v560_v56 = vand.u32 2147483647, %v1241_v22  ;;  %809 = vmatpush.bf16.msra.mxu2 %v1046_v24 }
  0xad   : > { %v539_v34 = vmul.f32 %v1090_v20, %v538_v27  ;;  %v1262_v43 = vsel %vm529_vm9, %v530_v32, %v528_v38 }
  0xae   : > { %v516_v42 = vsel %vm515_vm4, %v1223_v57, %v514_v33  ;;  %v1269_v47 = vadd.f32 1e-12, %v1262_v43  ;;  %v400_v55 = vpop.f32.mrf.mxu3  ;;  %v562_v57 = vand.u32 2147483648, %v1241_v22  ;;  %vm561_vm15 = vcmp.eq.f32.partialorder %v560_v56, 8.507059e+37 }
  0xaf   : > { %v540_v40 = vadd.f32 %v1090_v20, %v539_v34  ;;  %v1266_v46 = vsel %vm517_vm5, %v518_v37, %v516_v42 }
  0xb0   : > { %v1092_v44 = vpop.eup %1091  ;;  %v1273_v50 = vadd.f32 1e-12, %v1266_v46  ;;  %1093 = vrcp.f32 %v1269_v47  ;;  %v397_v61 = vpop.f32.mrf.mxu0  ;;  %v563_v3 = vor.u32 1.1754944e-38, %v562_v57  ;;  %v590_v12 = vand.u32 2147483647, %v1269_v47 }
  0xb1   : > { %v476_v41 = vpop.f32.mrf.mxu1  ;;  %v544_v48 = vsel %vm543_vm10, %v1090_v20, %v540_v40  ;;  %v552_v49 = vmul.f32 %v1092_v44, %v1241_v22  ;;  %vm557_vm12 = vweird.f32 %v1092_v44  ;;  %v592_v13 = vand.u32 2147483648, %v1269_v47 }
  0xb2   : > { %v549_v52 = vsel %vm546_vm11, %v548_v45, %v544_v48  ;;  %1095 = vrcp.f32 %v1273_v50  ;;  %vm558_vm14 = vmor %vm556_vm13, %vm557_vm12  ;;  %v477_v6 = vadd.f32 %v476_v41, %v397_v61  ;;  %vm571_vm0 = vweird.f32 %v1273_v50 }
  0xb3   : > { %v1279_v53 = vmul.f32 %v549_v52, %v475_v39  ;;  %v553_v54 = vsub.f32 1.0, %v552_v49  ;;  %v577_v20 = vand.u32 2147483648, %v1273_v50  ;;  %vm586_vm1 = vweird.f32 %v1269_v47 }
  0xb4   : > { %v575_v26 = vand.u32 2147483647, %v1273_v50  ;;  %vm591_vm4 = vcmp.eq.f32.partialorder %v590_v12, 8.507059e+37  ;;  %v593_v31 = vor.u32 1.1754944e-38, %v592_v13 }
  0xb5   : > { %v988_v58 = vclamps-f32 %v1279_v53, 1.0  ;;  %v554_v59 = vmul.f32 %v1092_v44, %v553_v54  ;;  %v578_v37 = vor.u32 1.1754944e-38, %v577_v20 }
  0xb6   : > { %v1094_v2 = vpop.eup %1093  ;;  %v402_v22 = vpop.f32.mrf.mxu3  ;;  %vm576_vm7 = vcmp.eq.f32.partialorder %v575_v26, 8.507059e+37 }
  0xb7   : > { %v1290_v62 = vand.u32 2147483647, %v988_v58  ;;  %v555_v63 = vadd.f32 %v1092_v44, %v554_v59  ;;  %v582_v8 = vmul.f32 %v1094_v2, %v1269_v47  ;;  %vm587_vm2 = vweird.f32 %v1094_v2 }
  0xb8   : > { %v1096_v4 = vpop.eup %1095  ;;  %vm588_vm5 = vmor %vm586_vm1, %vm587_vm2 }
  0xb9   : > { %v479_v0 = vpop.f32.mrf.mxu1  ;;  %v612_v5 = vsub.f32 1.0, %v1290_v62  ;;  %v559_v7 = vsel %vm558_vm14, %v1092_v44, %v555_v63  ;;  %v567_v11 = vmul.f32 %v1096_v4, %v1273_v50  ;;  %v583_v16 = vsub.f32 1.0, %v582_v8 }
  0xba   : > { %v564_v10 = vsel %vm561_vm15, %v563_v3, %v559_v7  ;;  %v668_v17 = vmul.f32 0.0006534779, %v1290_v62  ;;  %vm572_vm3 = vweird.f32 %v1096_v4  ;;  %v480_v32 = vadd.f32 %v479_v0, %v400_v55 }
  0xbb   : > { %v1301_v14 = vmax.f32 %v612_v5, 0.0  ;;  %v1303_v15 = vmul.f32 %v564_v10, %v477_v6  ;;  %v568_v19 = vsub.f32 1.0, %v567_v11  ;;  %v584_v23 = vmul.f32 %v1094_v2, %v583_v16  ;;  %vm573_vm6 = vmor %vm571_vm0, %vm572_vm3 }
  0xbc   : > { %v672_v27 = vadd.f32 -0.0035079354, %v668_v17  ;;  %v720_v8 = vmax.f32 %v988_v58, 0.0 }
  0xbd   : > { %v989_v21 = vclamps-f32 %v1303_v15, 1.0  ;;  %1097 = vrsqrt.f32 %v1301_v14  ;;  %v569_v25 = vmul.f32 %v1096_v4, %v568_v19  ;;  %v585_v30 = vadd.f32 %v1094_v2, %v584_v23 }
  0xbe   : > { %v676_v35 = vmul.f32 %v672_v27, %v1290_v62  ;;  %vm627_vm8 = vcmp.eq.f32.partialorder %v1301_v14, inf  ;;  %v630_v27 = vand.u32 2147483648, %v1301_v14  ;;  %vm629_vm9 = vcmp.eq.f32.partialorder %v1301_v14, 0.0 }
  0xbf   : > { %v1317_v28 = vand.u32 2147483647, %v989_v21  ;;  %v570_v33 = vadd.f32 %v1096_v4, %v569_v25  ;;  %v589_v38 = vsel %vm588_vm5, %v1094_v2, %v585_v30 }
  0xc0   : > { %v594_v41 = vsel %vm591_vm4, %v593_v31, %v589_v38  ;;  %v680_v42 = vadd.f32 0.010194921, %v676_v35 }
  0xc1   : > { %v481_v29 = vpop.f32.mrf.mxu1  ;;  %v613_v36 = vsub.f32 1.0, %v1317_v28  ;;  %v669_v39 = vmul.f32 0.0006534779, %v1317_v28  ;;  %v574_v40 = vsel %vm573_vm6, %v1096_v4, %v570_v33 }
  0xc2   : > { %v482_v34 = vadd.f32 %v481_v29, %v402_v22  ;;  %v579_v47 = vsel %vm576_vm7, %v578_v37, %v574_v40  ;;  %v684_v52 = vmul.f32 %v680_v42, %v1290_v62 }
  0xc3   : > { %v1098_v44 = vpop.eup %1097  ;;  %v1327_v45 = vmax.f32 %v613_v36, 0.0  ;;  %v673_v49 = vadd.f32 -0.0035079354, %v669_v39  ;;  %v1331_v51 = vmul.f32 %v579_v47, %v480_v32  ;;  %v724_v32 = vmul.f32 3.1415927, %v720_v8 }
  0xc4   : > { %v1329_v48 = vmul.f32 %v594_v41, %v482_v34  ;;  %v621_v50 = vmul.f32 %v1098_v44, %v1301_v14  ;;  %v688_v60 = vadd.f32 -0.026078133, %v684_v52  ;;  %v721_v41 = vmax.f32 %v989_v21, 0.0 }
  0xc5   : > { %1099 = vrsqrt.f32 %v1327_v45  ;;  %v990_v55 = vclamps-f32 %v1331_v51, 1.0  ;;  %v677_v57 = vmul.f32 %v673_v49, %v1317_v28  ;;  %vm639_vm10 = vcmp.eq.f32.partialorder %v1327_v45, inf }
  0xc6   : > { %v991_v54 = vclamps-f32 %v1329_v48, 1.0  ;;  %v622_v56 = vmul.f32 %v1098_v44, %v621_v50  ;;  %v692_v3 = vmul.f32 %v688_v60, %v1290_v62  ;;  %v642_v60 = vand.u32 2147483648, %v1327_v45 }
  0xc7   : > { %v1345_v61 = vand.u32 2147483647, %v990_v55  ;;  %v681_v0 = vadd.f32 0.010194921, %v677_v57  ;;  %vm641_vm11 = vcmp.eq.f32.partialorder %v1327_v45, 0.0 }
  0xc8   : > { %v1341_v59 = vand.u32 2147483647, %v991_v54  ;;  %v623_v63 = vmul.f32 0.5, %v622_v56  ;;  %v696_v10 = vadd.f32 0.08952983, %v692_v3 }
  0xc9   : > { %v614_v4 = vsub.f32 1.0, %v1345_v61  ;;  %v685_v6 = vmul.f32 %v681_v0, %v1317_v28  ;;  %v670_v19 = vmul.f32 0.0006534779, %v1345_v61 }
  0xca   : > { %v615_v2 = vsub.f32 1.0, %v1341_v59  ;;  %v624_v5 = vsub.f32 1.5, %v623_v63  ;;  %v700_v17 = vmul.f32 %v696_v10, %v1290_v62  ;;  %v671_v20 = vmul.f32 0.0006534779, %v1341_v59 }
  0xcb   : > { %v1100_v7 = vpop.eup %1099  ;;  %v1355_v11 = vmax.f32 %v614_v4, 0.0  ;;  %v689_v16 = vadd.f32 -0.026078133, %v685_v6  ;;  %v674_v30 = vadd.f32 -0.0035079354, %v670_v19 }
  0xcc   : > { %v1353_v9 = vmax.f32 %v615_v2, 0.0  ;;  %v625_v12 = vmul.f32 %v1098_v44, %v624_v5  ;;  %v633_v13 = vmul.f32 %v1100_v7, %v1327_v45  ;;  %v704_v23 = vadd.f32 -1.0707921, %v700_v17 }
  0xcd   : > { %v693_v22 = vmul.f32 %v689_v16, %v1317_v28  ;;  %v675_v31 = vadd.f32 -0.0035079354, %v671_v20  ;;  %v678_v38 = vmul.f32 %v674_v30, %v1345_v61  ;;  %v725_v4 = vmul.f32 3.1415927, %v721_v41 }
  0xce   : > { %1101 = vrsqrt.f32 %v1353_v9  ;;  %v626_v53 = vmul.f32 %v625_v12, %v1301_v14  ;;  %v634_v58 = vmul.f32 %v1100_v7, %v633_v13  ;;  %v708_v29 = vmul.f32 %v704_v23, %v1290_v62 }
  0xcf   : > { %1103 = vrsqrt.f32 %v1355_v11  ;;  %v697_v26 = vadd.f32 0.08952983, %v693_v22  ;;  %v679_v39 = vmul.f32 %v675_v31, %v1341_v59  ;;  %v682_v47 = vadd.f32 0.010194921, %v678_v38 }
  0xd0   : > { %v628_v24 = vsel %vm627_vm8, %v1301_v14, %v626_v53  ;;  %v635_v25 = vmul.f32 0.5, %v634_v58  ;;  %v712_v37 = vadd.f32 0.99999994, %v708_v29  ;;  %vm651_vm12 = vcmp.eq.f32.partialorder %v1355_v11, inf }
  0xd1   : > { %v701_v34 = vmul.f32 %v697_v26, %v1317_v28  ;;  %v631_v36 = vsel %vm629_vm9, %v630_v27, %v628_v24  ;;  %v683_v49 = vadd.f32 0.010194921, %v679_v39  ;;  %v686_v21 = vmul.f32 %v682_v47, %v1345_v61 }
  0xd2   : > { %v636_v33 = vsub.f32 1.5, %v635_v25  ;;  %v716_v56 = vmul.f32 %v712_v37, %v631_v36  ;;  %vm663_vm13 = vcmp.eq.f32.partialorder %v1353_v9, inf  ;;  %vm653_vm14 = vcmp.eq.f32.partialorder %v1355_v11, 0.0 }
  0xd3   : > { %v705_v42 = vadd.f32 -1.0707921, %v701_v34  ;;  %v687_v63 = vmul.f32 %v683_v49, %v1341_v59  ;;  %v666_v34 = vand.u32 2147483648, %v1353_v9  ;;  %v723_v36 = vmax.f32 %v991_v54, 0.0 }
  0xd4   : > { %v1102_v35 = vpop.eup %1101  ;;  %v637_v62 = vmul.f32 %v1100_v7, %v636_v33  ;;  %v690_v7 = vadd.f32 -0.026078133, %v686_v21  ;;  %v728_v8 = vadd.f32 %v724_v32, %v716_v56  ;;  %v722_v33 = vmax.f32 %v990_v55, 0.0 }
  0xd5   : > { %v1104_v40 = vpop.eup %1103  ;;  %v657_v44 = vmul.f32 %v1102_v35, %v1353_v9  ;;  %v709_v52 = vmul.f32 %v705_v42, %v1317_v28  ;;  %v691_v12 = vadd.f32 -0.026078133, %v687_v63  ;;  %vm665_vm15 = vcmp.eq.f32.partialorder %v1353_v9, 0.0 }
  0xd6   : > { %v645_v14 = vmul.f32 %v1104_v40, %v1355_v11  ;;  %v638_v50 = vmul.f32 %v637_v62, %v1327_v45  ;;  %v694_v16 = vmul.f32 %v690_v7, %v1345_v61  ;;  %v726_v51 = vmul.f32 3.1415927, %v722_v33 }
  0xd7   : > { %v658_v57 = vmul.f32 %v1102_v35, %v657_v44  ;;  %v713_v2 = vadd.f32 0.99999994, %v709_v52  ;;  %v695_v20 = vmul.f32 %v691_v12, %v1341_v59  ;;  %v727_v62 = vmul.f32 3.1415927, %v723_v36 }
  0xd8   : > { %v646_v15 = vmul.f32 %v1104_v40, %v645_v14  ;;  %v640_v0 = vsel %vm639_vm10, %v1327_v45, %v638_v50  ;;  %v698_v58 = vadd.f32 0.08952983, %v694_v16  ;;  %v732_v45 = vmul.f32 %v728_v8, %v1227_v1 }
  0xd9   : > { %v659_v3 = vmul.f32 0.5, %v658_v57  ;;  %v643_v5 = vsel %vm641_vm11, %v642_v60, %v640_v0  ;;  %v699_v24 = vadd.f32 0.08952983, %v695_v20  ;;  %v654_v1 = vand.u32 2147483648, %v1355_v11 }
  0xda   : > { %v647_v6 = vmul.f32 0.5, %v646_v15  ;;  %v717_v28 = vmul.f32 %v713_v2, %v643_v5  ;;  %v702_v26 = vmul.f32 %v698_v58, %v1345_v61 }
  0xdb   : > { %v660_v10 = vsub.f32 1.5, %v659_v3  ;;  %v703_v29 = vmul.f32 %v699_v24, %v1341_v59 }
  0xdc   : > { %v648_v13 = vsub.f32 1.5, %v647_v6  ;;  %v729_v17 = vadd.f32 %v725_v4, %v717_v28  ;;  %v706_v31 = vadd.f32 -1.0707921, %v702_v26 }
  0xdd   : > { %v661_v19 = vmul.f32 %v1102_v35, %v660_v10  ;;  %v707_v32 = vadd.f32 -1.0707921, %v703_v29 }
  0xde   : > { %v649_v53 = vmul.f32 %v1104_v40, %v648_v13  ;;  %v733_v22 = vmul.f32 %v729_v17, %v1235_v18  ;;  %v710_v35 = vmul.f32 %v706_v31, %v1345_v61 }
  0xdf   : > { %v662_v23 = vmul.f32 %v661_v19, %v1353_v9  ;;  %v711_v38 = vmul.f32 %v707_v32, %v1341_v59 }
  0xe0   : > { %v650_v25 = vmul.f32 %v649_v53, %v1355_v11  ;;  %v736_v27 = vpack.c.bf16 %v733_v22, %v732_v45  ;;  %v714_v40 = vadd.f32 0.99999994, %v710_v35 }
  0xe1   : > { %v664_v18 = vsel %vm663_vm13, %v1353_v9, %v662_v23  ;;  %v715_v41 = vadd.f32 0.99999994, %v711_v38 }
  0xe2   : > { %v652_v30 = vsel %vm651_vm12, %v1355_v11, %v650_v25  ;;  %810 = vmatmul.bf16.vlgmr.msra.gmra.mxu2 %v736_v27  ;;  %v667_v39 = vsel %vm665_vm15, %v666_v34, %v664_v18 }
  0xe3   : > { %v655_v37 = vsel %vm653_vm14, %v654_v1, %v652_v30  ;;  %v719_v11 = vmul.f32 %v715_v41, %v667_v39 }
  0xe4   : > { %v718_v55 = vmul.f32 %v714_v40, %v655_v37 }
  0xe5   : > { %v731_v44 = vadd.f32 %v727_v62, %v719_v11 }
  0xe6   : > { %v730_v42 = vadd.f32 %v726_v51, %v718_v55 }
  0xe7   : > { %v735_v48 = vmul.f32 %v731_v44, %v1262_v43 }
  0xe8   : > { %v734_v61 = vmul.f32 %v730_v42, %v1266_v46 }
  0xea   : > { %v737_v54 = vpack.c.bf16 %v735_v48, %v734_v61 }
  0xf2   : > { %815 = vmatmul.bf16.gmra.mxu2 %v737_v54 }
 0x165   : > { %v811_v14 = vpop.f32.mrf.mxu2 }
 0x16d   : > { %v813_v59 = vpop.f32.mrf.mxu2 }
 0x16e   : > { %v1057_v9 = vpack.c.bf16 %v813_v59, %v811_v14 }
 0x170   : > { %1058 = vst [vmem:[%s248_s7] sm:$0xff] %v1057_v9  }
 0x175   : > { %v816_v47 = vpop.f32.mrf.mxu2 }
 0x17d   : > { %v818_v49 = vpop.f32.mrf.mxu2 }
 0x17e   : > { %v1062_v50 = vpack.c.bf16 %v818_v49, %v816_v47 }
 0x180   : > { %1064 = vst [vmem:[%s248_s7 + $0x8] sm:$0xff] %v1062_v50  }
 0x181 PF: > { %s15_s18 = sadd.s32 1, %s1111_s18  }
 0x182   : > { %p12_p4 = scmp.ge.s32.totalorder %s15_s18, 4  }
 0x184   :  { %14 = sbr.rel (!%p12_p4) target bundleno = 1 (0x1), region = 73 }

// kernel: dgplvm_forward.11
= control target key start
LH: loop header
LB: loop body
LE: loop exit
PB: predicated region body
PF: predicated region fallthrough
CT: control target
= control target key end

     0   :  { %14 = vsyncpa [#allocation3], 0  ;;  %s2242_s0 = inlined_call_operand.vmem [shape: bf16[64,128], index: 0, kind: input, shape index: {}]   ;;  %s2243_s1 = inlined_call_operand.vmem [shape: bf16[64,128], index: 1, kind: input, shape index: {}]   ;;  %s2244_s2 = inlined_call_operand.hbm [shape: bf16[128,128], index: 2, kind: input, shape index: {}]   ;;  %s2245_s3 = inlined_call_operand.hbm [shape: bf16[128,128], index: 3, kind: input, shape index: {}]   ;;  %s2246_s4 = inlined_call_operand.hbm [shape: bf16[128,128], index: 4, kind: input, shape index: {}]   ;;  %s2247_s5 = inlined_call_operand.hbm [shape: bf16[128,128], index: 5, kind: input, shape index: {}]   ;;  %s2248_s6 = inlined_call_operand.hbm [shape: bf16[128,128], index: 6, kind: input, shape index: {}]   ;;  %s2249_s7 = inlined_call_operand.vmem [shape: f32[64,128], index: 7, kind: output, shape index: {0}]   ;;  %s2250_s8 = inlined_call_operand.vmem [shape: f32[64,128], index: 8, kind: output, shape index: {1}]  }
   0x1   :  { %15 = vsyncpa [#allocation5], 0 }
   0x2   :  { %16 = vsyncpa [#allocation8], 0  ;;  %s1909_s27 = smov 0  }
   0x3 LB: > { %s1345_s28 = sadd.s32 4294967295, %s1855_s27   ;;  %p1347_p0 = scmp.ge.s32.totalorder %s1855_s27, 1  ;;  %s1855_s27 = sphi %s1909_s27, %s22_s27  }
   0x4   : > { %p236_p1 = scmp.lt.s32.totalorder %s1855_s27, 3  ;;  %p1919_p2 = scmp.eq.s32.totalorder %s1345_s28, 0 }
   0x5   : > { %s261_s10 = sshll.u32 %s2245_s3, 4  ;;  %s289_s14 = sshll.u32 %s2247_s5, 4  ;;  %s262_s10 = int_to_ptr.hbm [resolvable:$true] %s261_s10  ;;  %s290_s14 = int_to_ptr.hbm [resolvable:$true] %s289_s14 }
   0x6   : > { %p1926_p3 = pnand %p1347_p0, %p236_p1  ;;  %s1857_s15 = smov [#allocation4]  }
   0x7   : > { %s263_s16 = sshll.u32 %s1857_s15, 4  ;;  %s1858_s18 = smov [#allocation7]   ;;  %s264_s16 = int_to_ptr.vmem [resolvable:$true] %s263_s16 }
   0x8   : > { %p1622_p4 = pneg %p1926_p3  ;;  %s291_s19 = sshll.u32 %s1858_s18, 4  ;;  %s292_s19 = int_to_ptr.vmem [resolvable:$true] %s291_s19 }
   0x9   : > { %s247_s22 = sshll.u32 %s2244_s2, 4  ;;  %s1859_s23 = smov 64   ;;  %s248_s22 = int_to_ptr.hbm [resolvable:$true] %s247_s22 }
   0xa   : > { %p1937_p5 = pnand %p1919_p2, %p1622_p4  ;;  %s1860_s24 = smov 4  }
   0xb   : > { %s1861_s25 = smov [#allocation2]   ;;  %s275_s12 = sshll.u32 %s2246_s4, 4  ;;  %s276_s12 = int_to_ptr.hbm [resolvable:$true] %s275_s12 }
   0xc   : > { %1628 = dma.hbm_to_vmem [thread:$0]  (!%p1937_p5), %s262_s10, 1024, %s264_s16, [#allocation5], %s1859_s23, %s1859_s23, %s1860_s24  }
   0xd   : > { %1634 = dma.hbm_to_vmem [thread:$0]  (!%p1937_p5), %s290_s14, 1024, %s292_s19, [#allocation8], %s1859_s23, %s1859_s23, %s1860_s24  }
   0xe   : > { %s249_s26 = sshll.u32 %s1861_s25, 4  ;;  %s303_s18 = sshll.u32 %s2248_s6, 4  ;;  %s250_s26 = int_to_ptr.vmem [resolvable:$true] %s249_s26  ;;  %s304_s18 = int_to_ptr.hbm [resolvable:$true] %s303_s18 }
   0xf   : > { %1625 = dma.hbm_to_vmem [thread:$0]  (!%p1937_p5), %s248_s22, 1024, %s250_s26, [#allocation3], %s1859_s23, %s1859_s23, %s1860_s24  }
  0x10   : > { %s1862_s20 = smov [#allocation6]   ;;  %s1863_s14 = smov [#allocation9]  }
  0x11   : > { %s277_s10 = sshll.u32 %s1862_s20, 4  ;;  %s305_s16 = sshll.u32 %s1863_s14, 4  ;;  %s278_s10 = int_to_ptr.vmem [resolvable:$true] %s277_s10  ;;  %s306_s16 = int_to_ptr.vmem [resolvable:$true] %s305_s16 }
  0x12   : > { %1631 = dma.hbm_to_vmem [thread:$0]  (!%p1937_p5), %s276_s12, 1024, %s278_s10, [#allocation5], %s1859_s23, %s1859_s23, %s1860_s24  }
  0x13   : > { %1637 = dma.hbm_to_vmem [thread:$0]  (!%p1937_p5), %s304_s18, 1024, %s306_s16, [#allocation8], %s1859_s23, %s1859_s23, %s1860_s24  }
  0x14   : > { %339 = sbr.rel (%p1926_p3) target bundleno = 528 (0x210), region = 48 }
  0x19   : > { %1842 = dma.done.wait (%p1919_p2), [#allocation3], 1024  }
  0x1a   : > { %1844 = vsyncadd (%p1919_p2), [#allocation3], 4294966272 }
  0x1b   : > { %1846 = dma.done.wait (%p1919_p2), [#allocation5], 2048  }
  0x1c   : > { %1848 = vsyncadd (%p1919_p2), [#allocation5], 4294965248 }
  0x1d   : > { %1850 = dma.done.wait (%p1919_p2), [#allocation8], 2048  }
  0x1e   : > { %1852 = vsyncadd (%p1919_p2), [#allocation8], 4294965248  ;;  %s1360_s11 = sshll.u32 %s1345_s28, 2  ;;  %v1569_v0 = vld [vmem:[#allocation4 + $0x38] sm:$0xff]  ;;  %v1568_v6 = vld [vmem:[#allocation4 + $0x30] sm:$0xff] }
  0x1f   : > { %p405_p6 = scmp.lt.s32.totalorder %s1360_s11, 7  ;;  %v1559_v1 = vld [vmem:[#allocation2 + $0x38] sm:$0xff]  ;;  %564 = vmatpush.bf16.msra.mxu0 %v1569_v0  ;;  %v1558_v9 = vld [vmem:[#allocation2 + $0x30] sm:$0xff]  ;;  %v1567_v14 = vld [vmem:[#allocation4 + $0x28] sm:$0xff] }
  0x20   : > { %643 = vmatpush.bf16.msra.mxu1 %v1559_v1  ;;  %v1557_v16 = vld [vmem:[#allocation2 + $0x28] sm:$0xff]  ;;  %v1566_v20 = vld [vmem:[#allocation4 + $0x20] sm:$0xff]  ;;  %v1565_v25 = vld [vmem:[#allocation4 + $0x18] sm:$0xff] }
  0x21   : > { %s2261_s11 = smov (!%p405_p6, %s1360_s11), 7  ;;  %v1556_v22 = vld [vmem:[#allocation2 + $0x20] sm:$0xff]  ;;  %v1555_v27 = vld [vmem:[#allocation2 + $0x18] sm:$0xff]  ;;  %v1564_v30 = vld [vmem:[#allocation4 + $0x10] sm:$0xff] }
  0x22   : > { %s1361_s17 = sshll.u32 %s2261_s11, 2  ;;  %v1554_v31 = vld [vmem:[#allocation2 + $0x10] sm:$0xff]  ;;  %v1563_v32 = vld [vmem:[#allocation4 + $0x8] sm:$0xff]  ;;  %v1562_v34 = vld [vmem:[#allocation4] sm:$0xff]  ;;  %s1365_s28 = sshll.u32 %s2261_s11, 3 }
  0x23   : > { %s1982_s22 = scalar_lea.vmem %s2243_s1, %s1361_s17  ;;  %s1987_s25 = scalar_lea.vmem %s2242_s0, %s1361_s17  ;;  %565 = vmatpush.bf16.msra.mxu0 %v1568_v6  ;;  %v1553_v33 = vld [vmem:[#allocation2 + $0x8] sm:$0xff]  ;;  %v1552_v35 = vld [vmem:[#allocation2] sm:$0xff] }
  0x24   : > { %v464_v2 = vld [vmem:[%s1982_s22] sm:$0xff]   ;;  %v430_v7 = vld [vmem:[%s1987_s25 + $0x8] sm:$0xff]   ;;  %644 = vmatpush.bf16.msra.mxu1 %v1558_v9  ;;  %s420_s30 = scalar_lea.vmem %s2249_s7, %s1365_s28  ;;  %s426_s13 = scalar_lea.vmem %s2250_s8, %s1365_s28 }
  0x25   : > { %v468_v3 = vunpack.c.l.bf16 %v464_v2  ;;  %v428_v4 = vld [vmem:[%s1987_s25] sm:$0xff]   ;;  %v434_v10 = vunpack.c.l.bf16 %v430_v7  ;;  %v469_v12 = vunpack.c.h.bf16 %v464_v2  ;;  %v435_v17 = vunpack.c.h.bf16 %v430_v7  ;;  %v467_v21 = vld [vmem:[%s1982_s22 + $0x8] sm:$0xff]  }
  0x26   : > { %v432_v5 = vunpack.c.l.bf16 %v428_v4  ;;  %v433_v15 = vunpack.c.h.bf16 %v428_v4  ;;  %v471_v24 = vunpack.c.h.bf16 %v467_v21  ;;  %v470_v26 = vunpack.c.l.bf16 %v467_v21  ;;  %v1560_v36 = vld [vmem:[%s1982_s22] sm:$0xff]  ;;  %v1561_v38 = vld [vmem:[%s1982_s22 + $0x8] sm:$0xff] }
  0x27   : > { %v472_v8 = vmul.f32 %v468_v3, %v468_v3  ;;  %v438_v13 = vmul.f32 %v434_v10, %v434_v10  ;;  %v473_v18 = vmul.f32 %v469_v12, %v469_v12  ;;  %566 = vmatpush.bf16.msra.mxu0 %v1567_v14  ;;  %v439_v23 = vmul.f32 %v435_v17, %v435_v17  ;;  %v1550_v37 = vld [vmem:[%s1987_s25] sm:$0xff]  ;;  %v1551_v39 = vld [vmem:[%s1987_s25 + $0x8] sm:$0xff]  ;;  %v1593_v17 = vld [vmem:[#allocation9 + $0x38] sm:$0xff] }
  0x28   : > { %v436_v11 = vmul.f32 %v432_v5, %v432_v5  ;;  %v437_v19 = vmul.f32 %v433_v15, %v433_v15  ;;  %645 = vmatpush.bf16.msra.mxu1 %v1557_v16  ;;  %v475_v28 = vmul.f32 %v471_v24, %v471_v24  ;;  %v474_v29 = vmul.f32 %v470_v26, %v470_v26  ;;  %v1577_v16 = vld [vmem:[#allocation6 + $0x38] sm:$0xff] }
  0x29   : > { %476 = vadd.xlane.f32.xlu1 %v472_v8  ;;  %444 = vadd.xlane.f32.xlu2 %v438_v13 }
  0x2a   : > { %440 = vadd.xlane.f32.xlu0 %v436_v11  ;;  %980 = vmatpush.bf16.msra.mxu2 %v1577_v16 }
  0x2b   : > { %567 = vmatpush.bf16.msra.mxu0 %v1566_v20  ;;  %1083 = vmatpush.bf16.msra.mxu3 %v1593_v17 }
  0x2c   : > { %646 = vmatpush.bf16.msra.mxu1 %v1556_v22 }
  0x2f   : > { %568 = vmatpush.bf16.msra.mxu0 %v1565_v25 }
  0x30   : > { %647 = vmatpush.bf16.msra.mxu1 %v1555_v27 }
  0x31   : > { %478 = vadd.xlane.f32.xlu1 %v473_v18  ;;  %446 = vadd.xlane.f32.xlu2 %v439_v23  ;;  %v1585_v18 = vld [vmem:[#allocation7 + $0x38] sm:$0xff] }
  0x32   : > { %442 = vadd.xlane.f32.xlu0 %v437_v19 }
  0x33   : > { %569 = vmatpush.bf16.msra.mxu0 %v1564_v30 }
  0x34   : > { %648 = vmatpush.bf16.msra.mxu1 %v1554_v31 }
  0x37   : > { %570 = vmatpush.bf16.msra.mxu0 %v1563_v32 }
  0x38   : > { %649 = vmatpush.bf16.msra.mxu1 %v1553_v33 }
  0x39   : > { %482 = vadd.xlane.f32.xlu1 %v475_v28 }
  0x3a   : > { %480 = vadd.xlane.f32.xlu0 %v474_v29 }
  0x3b   : > { %571 = vmatpush.bf16.msra.mxu0 %v1562_v34 }
  0x3c   : > { %650 = vmatpush.bf16.msra.mxu1 %v1552_v35 }
  0x3e   : > { %572 = vmatmul.bf16.vlgmr.msra.gmra.mxu0 %v1560_v36  ;;  %v1576_v36 = vld [vmem:[#allocation6 + $0x30] sm:$0xff] }
  0x3f   : > { %651 = vmatmul.bf16.vlgmr.msra.gmra.mxu1 %v1550_v37  ;;  %1150 = vmatpush.bf16.msrb.mxu0 %v1585_v18  ;;  %v1592_v37 = vld [vmem:[#allocation9 + $0x30] sm:$0xff] }
  0x40   : > { %1594 = vmatpush.bf16.msrb.mxu1 %v1585_v18  ;;  %981 = vmatpush.bf16.msra.mxu2 %v1576_v36 }
  0x41   : > { %1084 = vmatpush.bf16.msra.mxu3 %v1592_v37 }
  0x4e   : > { %577 = vmatmul.bf16.gmra.mxu0 %v1561_v38  ;;  %v1584_v38 = vld [vmem:[#allocation7 + $0x30] sm:$0xff] }
  0x4f   : > { %656 = vmatmul.bf16.gmra.mxu1 %v1551_v39  ;;  %1151 = vmatpush.bf16.msrb.mxu0 %v1584_v38 }
  0x50   : > { %1595 = vmatpush.bf16.msrb.mxu1 %v1584_v38  ;;  %v1580_v38 = vld [vmem:[#allocation7 + $0x10] sm:$0xff] }
  0x9c   : > { %v477_v40 = vpop.xlane.xlu1 %476  ;;  %v445_v43 = vpop.xlane.xlu2 %444 }
  0x9d   : > { %v441_v41 = vpop.xlane.xlu0 %440 }
  0x9e   : > { %v1997_v42 = vadd.f32 %v477_v40, %v441_v41 }
  0xa0   : > { %1663 = vrsqrt.f32 %v1997_v42  ;;  %vm669_vm0 = vcmp.eq.f32.partialorder %v1997_v42, inf  ;;  %v672_v62 = vand.u32 2147483648, %v1997_v42  ;;  %vm671_vm1 = vcmp.eq.f32.partialorder %v1997_v42, 0.0 }
  0xa4   : > { %v479_v44 = vpop.xlane.xlu1 %478  ;;  %v447_v50 = vpop.xlane.xlu2 %446 }
  0xa5   : > { %v443_v45 = vpop.xlane.xlu0 %442 }
  0xa6   : > { %v1664_v46 = vpop.eup %1663  ;;  %v2000_v47 = vadd.f32 %v479_v44, %v443_v45 }
  0xa7   : > { %v663_v48 = vmul.f32 %v1664_v46, %v1997_v42 }
  0xa8   : > { %1665 = vrsqrt.f32 %v2000_v47  ;;  %vm681_vm2 = vcmp.eq.f32.partialorder %v2000_v47, inf  ;;  %v684_v13 = vand.u32 2147483648, %v2000_v47  ;;  %vm683_vm3 = vcmp.eq.f32.partialorder %v2000_v47, 0.0 }
  0xa9   : > { %v664_v49 = vmul.f32 %v1664_v46, %v663_v48 }
  0xab   : > { %v665_v51 = vmul.f32 0.5, %v664_v49 }
  0xac   : > { %v483_v52 = vpop.xlane.xlu1 %482 }
  0xad   : > { %v2004_v53 = vadd.f32 %v483_v52, %v447_v50  ;;  %v481_v54 = vpop.xlane.xlu0 %480  ;;  %v666_v55 = vsub.f32 1.5, %v665_v51 }
  0xae   : > { %v1666_v56 = vpop.eup %1665  ;;  %v2006_v57 = vadd.f32 %v481_v54, %v445_v43  ;;  %v1575_v54 = vld [vmem:[#allocation6 + $0x28] sm:$0xff] }
  0xaf   : > { %v675_v58 = vmul.f32 %v1666_v56, %v2000_v47  ;;  %1667 = vrsqrt.f32 %v2004_v53  ;;  %v667_v59 = vmul.f32 %v1664_v46, %v666_v55  ;;  %vm705_vm4 = vcmp.eq.f32.partialorder %v2004_v53, inf  ;;  %v1591_v55 = vld [vmem:[#allocation9 + $0x28] sm:$0xff]  ;;  %982 = vmatpush.bf16.msra.mxu2 %v1575_v54 }
  0xb0   : > { %1669 = vrsqrt.f32 %v2006_v57  ;;  %vm693_vm5 = vcmp.eq.f32.partialorder %v2006_v57, inf  ;;  %vm695_vm6 = vcmp.eq.f32.partialorder %v2006_v57, 0.0  ;;  %v696_v30 = vand.u32 2147483648, %v2006_v57  ;;  %1085 = vmatpush.bf16.msra.mxu3 %v1591_v55  ;;  %v1579_v54 = vld [vmem:[#allocation7 + $0x8] sm:$0xff] }
  0xb1   : > { %v668_v60 = vmul.f32 %v667_v59, %v1997_v42  ;;  %v676_v61 = vmul.f32 %v1666_v56, %v675_v58  ;;  %v708_v35 = vand.u32 2147483648, %v2004_v53  ;;  %vm707_vm9 = vcmp.eq.f32.partialorder %v2004_v53, 0.0 }
  0xb3   : > { %v670_v63 = vsel %vm669_vm0, %v1997_v42, %v668_v60  ;;  %v677_v0 = vmul.f32 0.5, %v676_v61 }
  0xb4   : > { %v2016_v1 = vsel %vm671_vm1, %v672_v62, %v670_v63 }
  0xb5   : > { %v1668_v2 = vpop.eup %1667  ;;  %v2019_v3 = vadd.f32 1e-12, %v2016_v1  ;;  %v678_v4 = vsub.f32 1.5, %v677_v0 }
  0xb6   : > { %v1670_v5 = vpop.eup %1669  ;;  %v699_v6 = vmul.f32 %v1668_v2, %v2004_v53 }
  0xb7   : > { %v687_v7 = vmul.f32 %v1670_v5, %v2006_v57  ;;  %1671 = vrcp.f32 %v2019_v3  ;;  %v679_v8 = vmul.f32 %v1666_v56, %v678_v4  ;;  %v725_v28 = vand.u32 2147483648, %v2019_v3  ;;  %v1583_v56 = vld [vmem:[#allocation7 + $0x28] sm:$0xff] }
  0xb8   : > { %v700_v9 = vmul.f32 %v1668_v2, %v699_v6  ;;  %v723_v34 = vand.u32 2147483647, %v2019_v3  ;;  %vm719_vm8 = vweird.f32 %v2019_v3  ;;  %1152 = vmatpush.bf16.msrb.mxu0 %v1583_v56  ;;  %1596 = vmatpush.bf16.msrb.mxu1 %v1583_v56 }
  0xb9   : > { %v688_v10 = vmul.f32 %v1670_v5, %v687_v7  ;;  %v680_v11 = vmul.f32 %v679_v8, %v2000_v47  ;;  %v726_v48 = vor.u32 1.1754944e-38, %v725_v28  ;;  %v1582_v7 = vld [vmem:[#allocation7 + $0x20] sm:$0xff] }
  0xba   : > { %v701_v12 = vmul.f32 0.5, %v700_v9  ;;  %vm724_vm11 = vcmp.eq.f32.partialorder %v723_v34, 8.507059e+37 }
  0xbb   : > { %v689_v14 = vmul.f32 0.5, %v688_v10  ;;  %v682_v15 = vsel %vm681_vm2, %v2000_v47, %v680_v11  ;;  %v573_v32 = vpop.f32.mrf.mxu0 }
  0xbc   : > { %v702_v19 = vsub.f32 1.5, %v701_v12  ;;  %v2029_v21 = vsel %vm683_vm3, %v684_v13, %v682_v15  ;;  %v652_v39 = vpop.f32.mrf.mxu1  ;;  %1153 = vmatpush.bf16.msrb.mxu0 %v1582_v7  ;;  %v1573_v15 = vld [vmem:[#allocation6 + $0x18] sm:$0xff]  ;;  %1597 = vmatpush.bf16.msrb.mxu1 %v1582_v7 }
  0xbd   : > { %v1672_v20 = vpop.eup %1671  ;;  %v690_v22 = vsub.f32 1.5, %v689_v14  ;;  %v2033_v24 = vadd.f32 1e-12, %v2029_v21  ;;  %v653_v43 = vadd.f32 %v652_v39, %v573_v32  ;;  %v1588_v32 = vld [vmem:[#allocation9 + $0x10] sm:$0xff] }
  0xbe   : > { %v715_v23 = vmul.f32 %v1672_v20, %v2019_v3  ;;  %v703_v25 = vmul.f32 %v1668_v2, %v702_v19  ;;  %vm720_vm7 = vweird.f32 %v1672_v20  ;;  %v1574_v2 = vld [vmem:[#allocation6 + $0x20] sm:$0xff]  ;;  %v1589_v19 = vld [vmem:[#allocation9 + $0x18] sm:$0xff] }
  0xbf   : > { %v691_v26 = vmul.f32 %v1670_v5, %v690_v22  ;;  %1673 = vrcp.f32 %v2033_v24  ;;  %vm721_vm10 = vmor %vm719_vm8, %vm720_vm7  ;;  %v740_v0 = vand.u32 2147483648, %v2033_v24  ;;  %v1590_v3 = vld [vmem:[#allocation9 + $0x20] sm:$0xff]  ;;  %v738_v6 = vand.u32 2147483647, %v2033_v24  ;;  %983 = vmatpush.bf16.msra.mxu2 %v1574_v2 }
  0xc0   : > { %v716_v27 = vsub.f32 1.0, %v715_v23  ;;  %v704_v31 = vmul.f32 %v703_v25, %v2004_v53  ;;  %vm734_vm13 = vweird.f32 %v2033_v24  ;;  %1086 = vmatpush.bf16.msra.mxu3 %v1590_v3 }
  0xc1   : > { %v692_v29 = vmul.f32 %v691_v26, %v2006_v57  ;;  %v741_v13 = vor.u32 1.1754944e-38, %v740_v0  ;;  %vm739_vm15 = vcmp.eq.f32.partialorder %v738_v6, 8.507059e+37 }
  0xc2   : > { %v717_v33 = vmul.f32 %v1672_v20, %v716_v27  ;;  %v706_v41 = vsel %vm705_vm4, %v2004_v53, %v704_v31  ;;  %v1572_v31 = vld [vmem:[#allocation6 + $0x10] sm:$0xff] }
  0xc3   : > { %v694_v40 = vsel %vm693_vm5, %v2006_v57, %v692_v29  ;;  %v2057_v46 = vsel %vm707_vm9, %v708_v35, %v706_v41  ;;  %v575_v63 = vpop.f32.mrf.mxu0  ;;  %984 = vmatpush.bf16.msra.mxu2 %v1573_v15 }
  0xc4   : > { %v718_v44 = vadd.f32 %v1672_v20, %v717_v33  ;;  %v2055_v45 = vsel %vm695_vm6, %v696_v30, %v694_v40  ;;  %v2064_v50 = vadd.f32 1e-12, %v2057_v46  ;;  %v654_v4 = vpop.f32.mrf.mxu1  ;;  %1087 = vmatpush.bf16.msra.mxu3 %v1589_v19 }
  0xc5   : > { %v2061_v49 = vadd.f32 1e-12, %v2055_v45  ;;  %v1674_v51 = vpop.eup %1673  ;;  %v655_v17 = vadd.f32 %v654_v4, %v575_v63 }
  0xc6   : > { %v722_v52 = vsel %vm721_vm10, %v1672_v20, %v718_v44  ;;  %v730_v59 = vmul.f32 %v1674_v51, %v2033_v24  ;;  %vm735_vm12 = vweird.f32 %v1674_v51  ;;  %v1581_v20 = vld [vmem:[#allocation7 + $0x18] sm:$0xff]  ;;  %vm764_vm2 = vweird.f32 %v2064_v50 }
  0xc7   : > { %v727_v58 = vsel %vm724_vm11, %v726_v48, %v722_v52  ;;  %1675 = vrcp.f32 %v2061_v49  ;;  %vm736_vm14 = vmor %vm734_vm13, %vm735_vm12  ;;  %1154 = vmatpush.bf16.msrb.mxu0 %v1581_v20  ;;  %v753_v29 = vand.u32 2147483647, %v2061_v49  ;;  %v755_v30 = vand.u32 2147483648, %v2061_v49  ;;  %1598 = vmatpush.bf16.msrb.mxu1 %v1581_v20  ;;  %v1587_v52 = vld [vmem:[#allocation9 + $0x8] sm:$0xff] }
  0xc8   : > { %v2068_v60 = vmul.f32 %v727_v58, %v653_v43  ;;  %v731_v61 = vsub.f32 1.0, %v730_v59  ;;  %1677 = vrcp.f32 %v2064_v50  ;;  %vm749_vm0 = vweird.f32 %v2061_v49  ;;  %985 = vmatpush.bf16.msra.mxu2 %v1572_v31  ;;  %1088 = vmatpush.bf16.msra.mxu3 %v1588_v32 }
  0xc9   : > { %vm2107_vm3 = vcmp.eq.f32.partialorder %v753_v29, 8.507059e+37  ;;  %v768_v48 = vand.u32 2147483647, %v2064_v50  ;;  %v770_v4 = vand.u32 2147483648, %v2064_v50 }
  0xca   : > { %v1448_v62 = vclamps-f32 %v2068_v60, 1.0  ;;  %v732_v5 = vmul.f32 %v1674_v51, %v731_v61  ;;  %v756_v61 = vor.u32 1.1754944e-38, %v755_v30 }
  0xcb   : > { %v578_v28 = vpop.f32.mrf.mxu0  ;;  %1155 = vmatpush.bf16.msrb.mxu0 %v1580_v38  ;;  %1599 = vmatpush.bf16.msrb.mxu1 %v1580_v38  ;;  %vm769_vm7 = vcmp.eq.f32.partialorder %v768_v48, 8.507059e+37 }
  0xcc   : > { %v2076_v8 = vand.u32 2147483647, %v1448_v62  ;;  %v733_v10 = vadd.f32 %v1674_v51, %v732_v5  ;;  %v657_v35 = vpop.f32.mrf.mxu1  ;;  %1089 = vmatpush.bf16.msra.mxu3 %v1587_v52 }
  0xcd   : > { %v2078_v9 = vpop.eup %1675  ;;  %v658_v0 = vadd.f32 %v657_v35, %v578_v28 }
  0xce   : > { %v790_v11 = vsub.f32 1.0, %v2076_v8  ;;  %v846_v12 = vmul.f32 0.0006534779, %v2076_v8  ;;  %v745_v14 = vmul.f32 %v2078_v9, %v2061_v49  ;;  %v2085_v16 = vpop.eup %1677  ;;  %v737_v18 = vsel %vm736_vm14, %v1674_v51, %v733_v10  ;;  %v1571_v51 = vld [vmem:[#allocation6 + $0x8] sm:$0xff] }
  0xcf   : > { %v742_v24 = vsel %vm739_vm15, %v741_v13, %v737_v18  ;;  %v760_v27 = vmul.f32 %v2085_v16, %v2064_v50  ;;  %vm750_vm1 = vweird.f32 %v2078_v9  ;;  %vm765_vm4 = vweird.f32 %v2085_v16  ;;  %986 = vmatpush.bf16.msra.mxu2 %v1571_v51  ;;  %1156 = vmatpush.bf16.msrb.mxu0 %v1579_v54  ;;  %v1586_v13 = vld [vmem:[#allocation9] sm:$0xff] }
  0xd0   : > { %v2087_v22 = vmax.f32 %v790_v11, 0.0  ;;  %v850_v23 = vadd.f32 -0.0035079354, %v846_v12  ;;  %v746_v25 = vsub.f32 1.0, %v745_v14  ;;  %v2089_v26 = vmul.f32 %v742_v24, %v655_v17  ;;  %vm2121_vm5 = vmor %vm749_vm0, %vm750_vm1  ;;  %v1570_v12 = vld [vmem:[#allocation6] sm:$0xff]  ;;  %1600 = vmatpush.bf16.msrb.mxu1 %v1579_v54  ;;  %1090 = vmatpush.bf16.msra.mxu3 %v1586_v13 }
  0xd1   : > { %v761_v37 = vsub.f32 1.0, %v760_v27  ;;  %vm2137_vm6 = vmor %vm764_vm2, %vm765_vm4  ;;  %v1578_v14 = vld [vmem:[#allocation7] sm:$0xff] }
  0xd2   : > { %1679 = vrsqrt.f32 %v2087_v22  ;;  %v854_v33 = vmul.f32 %v850_v23, %v2076_v8  ;;  %v1449_v34 = vclamps-f32 %v2089_v26, 1.0  ;;  %v747_v36 = vmul.f32 %v2078_v9, %v746_v25 }
  0xd3   : > { %v762_v44 = vmul.f32 %v2085_v16, %v761_v37  ;;  %v580_v11 = vpop.f32.mrf.mxu0  ;;  %v771_v23 = vor.u32 1.1754944e-38, %v770_v4  ;;  %987 = vmatpush.bf16.msra.mxu2 %v1570_v12  ;;  %1157 = vmatpush.bf16.msrb.mxu0 %v1578_v14  ;;  %vm805_vm8 = vcmp.eq.f32.partialorder %v2087_v22, inf  ;;  %vm807_vm9 = vcmp.eq.f32.partialorder %v2087_v22, 0.0 }
  0xd4   : > { %v858_v39 = vadd.f32 0.010194921, %v854_v33  ;;  %v2103_v40 = vand.u32 2147483647, %v1449_v34  ;;  %v748_v41 = vadd.f32 %v2078_v9, %v747_v36  ;;  %v659_v50 = vpop.f32.mrf.mxu1  ;;  %1601 = vmatpush.bf16.msrb.mxu1 %v1578_v14 }
  0xd5   : > { %v763_v3 = vadd.f32 %v2085_v16, %v762_v44  ;;  %v660_v27 = vadd.f32 %v659_v50, %v580_v11 }
  0xd6   : > { %v862_v55 = vmul.f32 %v858_v39, %v2076_v8  ;;  %v791_v56 = vsub.f32 1.0, %v2103_v40  ;;  %v847_v58 = vmul.f32 0.0006534779, %v2103_v40  ;;  %v752_v2 = vsel %vm2121_vm5, %v2078_v9, %v748_v41 }
  0xd7   : > { %v757_v9 = vsel %vm2107_vm3, %v756_v61, %v752_v2  ;;  %v767_v18 = vsel %vm2137_vm6, %v2085_v16, %v763_v3  ;;  %v808_v3 = vand.u32 2147483648, %v2087_v22 }
  0xd8   : > { %v1680_v63 = vpop.eup %1679  ;;  %v866_v6 = vadd.f32 -0.026078133, %v862_v55  ;;  %v2131_v49 = vmax.f32 %v791_v56, 0.0  ;;  %v851_v7 = vadd.f32 -0.0035079354, %v847_v58  ;;  %v2149_v20 = vmul.f32 %v757_v9, %v658_v0 }
  0xd9   : > { %v799_v5 = vmul.f32 %v1680_v63, %v2087_v22  ;;  %v772_v30 = vsel %vm769_vm7, %v771_v23, %v767_v18 }
  0xda   : > { %v870_v17 = vmul.f32 %v866_v6, %v2076_v8  ;;  %1681 = vrsqrt.f32 %v2131_v49  ;;  %v855_v19 = vmul.f32 %v851_v7, %v2103_v40  ;;  %v1450_v29 = vclamps-f32 %v2149_v20, 1.0 }
  0xdb   : > { %v800_v15 = vmul.f32 %v1680_v63, %v799_v5  ;;  %v2153_v32 = vmul.f32 %v772_v30, %v660_v27  ;;  %v898_v5 = vmax.f32 %v1448_v62, 0.0  ;;  %vm817_vm10 = vcmp.eq.f32.partialorder %v2131_v49, inf }
  0xdc   : > { %v874_v25 = vadd.f32 0.08952983, %v870_v17  ;;  %v859_v28 = vadd.f32 0.010194921, %v855_v19  ;;  %v2158_v35 = vand.u32 2147483647, %v1450_v29 }
  0xdd   : > { %v801_v24 = vmul.f32 0.5, %v800_v15  ;;  %v1451_v39 = vclamps-f32 %v2153_v32, 1.0  ;;  %v902_v17 = vmul.f32 3.1415927, %v898_v5  ;;  %vm819_vm11 = vcmp.eq.f32.partialorder %v2131_v49, 0.0 }
  0xde   : > { %v878_v16 = vmul.f32 %v874_v25, %v2076_v8  ;;  %v863_v33 = vmul.f32 %v859_v28, %v2103_v40  ;;  %v792_v44 = vsub.f32 1.0, %v2158_v35  ;;  %v848_v48 = vmul.f32 0.0006534779, %v2158_v35 }
  0xdf   : > { %v802_v31 = vsub.f32 1.5, %v801_v24  ;;  %v2168_v54 = vand.u32 2147483647, %v1451_v39  ;;  %v820_v24 = vand.u32 2147483648, %v2131_v49 }
  0xe0   : > { %v1682_v36 = vpop.eup %1681  ;;  %v882_v38 = vadd.f32 -1.0707921, %v878_v16  ;;  %v867_v43 = vadd.f32 -0.026078133, %v863_v33  ;;  %v2171_v58 = vmax.f32 %v792_v44, 0.0 }
  0xe1   : > { %v803_v37 = vmul.f32 %v1680_v63, %v802_v31  ;;  %v811_v41 = vmul.f32 %v1682_v36, %v2131_v49  ;;  %v852_v59 = vadd.f32 -0.0035079354, %v848_v48  ;;  %v793_v61 = vsub.f32 1.0, %v2168_v54 }
  0xe2   : > { %v886_v52 = vmul.f32 %v882_v38, %v2076_v8  ;;  %v871_v56 = vmul.f32 %v867_v43, %v2103_v40  ;;  %v849_v63 = vmul.f32 0.0006534779, %v2168_v54  ;;  %1683 = vrsqrt.f32 %v2171_v58 }
  0xe3   : > { %v804_v51 = vmul.f32 %v803_v37, %v2087_v22  ;;  %v812_v55 = vmul.f32 %v1682_v36, %v811_v41  ;;  %v856_v10 = vmul.f32 %v852_v59, %v2158_v35  ;;  %v2184_v9 = vmax.f32 %v793_v61, 0.0 }
  0xe4   : > { %v875_v8 = vadd.f32 0.08952983, %v871_v56  ;;  %v890_v4 = vadd.f32 0.99999994, %v886_v52  ;;  %v853_v12 = vadd.f32 -0.0035079354, %v849_v63 }
  0xe5   : > { %v806_v0 = vsel %vm805_vm8, %v2087_v22, %v804_v51  ;;  %v813_v2 = vmul.f32 0.5, %v812_v55  ;;  %v860_v15 = vadd.f32 0.010194921, %v856_v10  ;;  %1685 = vrsqrt.f32 %v2184_v9 }
  0xe6   : > { %v879_v7 = vmul.f32 %v875_v8, %v2103_v40  ;;  %v809_v11 = vsel %vm807_vm9, %v808_v3, %v806_v0  ;;  %v899_v22 = vmax.f32 %v1449_v34, 0.0  ;;  %v857_v60 = vmul.f32 %v853_v12, %v2168_v54 }
  0xe7   : > { %v814_v6 = vsub.f32 1.5, %v813_v2  ;;  %v894_v50 = vmul.f32 %v890_v4, %v809_v11  ;;  %v864_v23 = vmul.f32 %v860_v15, %v2158_v35  ;;  %vm829_vm12 = vcmp.eq.f32.partialorder %v2171_v58, inf }
  0xe8   : > { %v883_v14 = vadd.f32 -1.0707921, %v879_v7  ;;  %v1684_v62 = vpop.eup %1683  ;;  %v861_v27 = vadd.f32 0.010194921, %v857_v60  ;;  %v903_v37 = vmul.f32 3.1415927, %v899_v22 }
  0xe9   : > { %v815_v13 = vmul.f32 %v1682_v36, %v814_v6  ;;  %v823_v25 = vmul.f32 %v1684_v62, %v2171_v58  ;;  %v868_v28 = vadd.f32 -0.026078133, %v864_v23  ;;  %v906_v33 = vadd.f32 %v902_v17, %v894_v50 }
  0xea   : > { %v887_v19 = vmul.f32 %v883_v14, %v2103_v40  ;;  %v865_v16 = vmul.f32 %v861_v27, %v2168_v54  ;;  %v832_v7 = vand.u32 2147483648, %v2171_v58  ;;  %vm831_vm13 = vcmp.eq.f32.partialorder %v2171_v58, 0.0 }
  0xeb   : > { %v816_v18 = vmul.f32 %v815_v13, %v2131_v49  ;;  %v824_v31 = vmul.f32 %v1684_v62, %v823_v25  ;;  %v1686_v40 = vpop.eup %1685  ;;  %v872_v38 = vmul.f32 %v868_v28, %v2158_v35  ;;  %v910_v59 = vmul.f32 %v906_v33, %v2016_v1 }
  0xec   : > { %v891_v34 = vadd.f32 0.99999994, %v887_v19  ;;  %v835_v43 = vmul.f32 %v1686_v40, %v2184_v9  ;;  %v869_v44 = vadd.f32 -0.026078133, %v865_v16  ;;  %v900_v1 = vmax.f32 %v1450_v29, 0.0 }
  0xed   : > { %v818_v26 = vsel %vm817_vm10, %v2131_v49, %v816_v18  ;;  %v825_v41 = vmul.f32 0.5, %v824_v31  ;;  %v876_v51 = vadd.f32 0.08952983, %v872_v38  ;;  %vm841_vm14 = vcmp.eq.f32.partialorder %v2184_v9, inf }
  0xee   : > { %v821_v30 = vsel %vm819_vm11, %v820_v24, %v818_v26  ;;  %v836_v49 = vmul.f32 %v1686_v40, %v835_v43  ;;  %v873_v55 = vmul.f32 %v869_v44, %v2168_v54  ;;  %v844_v29 = vand.u32 2147483648, %v2184_v9 }
  0xef   : > { %v895_v36 = vmul.f32 %v891_v34, %v821_v30  ;;  %v826_v52 = vsub.f32 1.5, %v825_v41  ;;  %v880_v56 = vmul.f32 %v876_v51, %v2158_v35  ;;  %v904_v22 = vmul.f32 3.1415927, %v900_v1 }
  0xf0   : > { %v837_v0 = vmul.f32 0.5, %v836_v49  ;;  %v877_v2 = vadd.f32 0.08952983, %v873_v55  ;;  %vm843_vm15 = vcmp.eq.f32.partialorder %v2184_v9, 0.0 }
  0xf1   : > { %v907_v48 = vadd.f32 %v903_v37, %v895_v36  ;;  %v827_v63 = vmul.f32 %v1684_v62, %v826_v52  ;;  %v884_v8 = vadd.f32 -1.0707921, %v880_v56 }
  0xf2   : > { %v838_v5 = vsub.f32 1.5, %v837_v0  ;;  %v881_v6 = vmul.f32 %v877_v2, %v2168_v54 }
  0xf3   : > { %v911_v61 = vmul.f32 %v907_v48, %v2029_v21  ;;  %v828_v4 = vmul.f32 %v827_v63, %v2171_v58  ;;  %v888_v10 = vmul.f32 %v884_v8, %v2158_v35  ;;  %v901_v35 = vmax.f32 %v1451_v39, 0.0 }
  0xf4   : > { %v839_v11 = vmul.f32 %v1686_v40, %v838_v5  ;;  %v885_v12 = vadd.f32 -1.0707921, %v881_v6 }
  0xf5   : > { %v914_v3 = vpack.c.bf16 %v911_v61, %v910_v59  ;;  %v830_v21 = vsel %vm829_vm12, %v2171_v58, %v828_v4  ;;  %v892_v14 = vadd.f32 0.99999994, %v888_v10 }
  0xf6   : > { %v833_v13 = vsel %vm831_vm13, %v832_v7, %v830_v21  ;;  %v840_v15 = vmul.f32 %v839_v11, %v2184_v9  ;;  %v889_v17 = vmul.f32 %v885_v12, %v2168_v54  ;;  %v905_v54 = vmul.f32 3.1415927, %v901_v35 }
  0xf7   : > { %988 = vmatmul.bf16.vlgmr.msra.gmra.mxu2 %v914_v3  ;;  %1091 = vmatmul.bf16.vlgmr.msra.gmra.mxu3 %v914_v3  ;;  %v896_v20 = vmul.f32 %v892_v14, %v833_v13 }
  0xf8   : > { %1158 = vmatmul.bf16.vlgmr.msrb.gmra.mxu0 %v914_v3  ;;  %v842_v58 = vsel %vm841_vm14, %v2184_v9, %v840_v15  ;;  %v893_v60 = vadd.f32 0.99999994, %v889_v17 }
  0xf9   : > { %v845_v62 = vsel %vm843_vm15, %v844_v29, %v842_v58  ;;  %v908_v50 = vadd.f32 %v904_v22, %v896_v20 }
  0xfa   : > { %v897_v18 = vmul.f32 %v893_v60, %v845_v62 }
  0xfb   : > { %v912_v32 = vmul.f32 %v908_v50, %v2055_v45 }
  0xfc   : > { %v909_v19 = vadd.f32 %v905_v54, %v897_v18 }
  0xfe   : > { %v913_v39 = vmul.f32 %v909_v19, %v2057_v46 }
 0x100   : > { %v915_v23 = vpack.c.bf16 %v913_v39, %v912_v32 }
 0x102   : > { %1163 = vmatmul.bf16.vlgmr.msrb.gmra.mxu1 %v915_v23 }
 0x107   : > { %993 = vmatmul.bf16.gmra.mxu2 %v915_v23  ;;  %1096 = vmatmul.bf16.gmra.mxu3 %v915_v23 }
 0x175   : > { %v1159_v24 = vpop.f32.mrf.mxu0 }
 0x17a   : > { %v989_v9 = vpop.f32.mrf.mxu2  ;;  %v1092_v25 = vpop.f32.mrf.mxu3 }
 0x17b   : > { %999 = vst [vmem:[%s420_s30] sm:$0xff] %v989_v9  ;;  %v1160_v27 = vadd.f32 %v1159_v24, %v1092_v25 }
 0x17d   : > { %v1169_v26 = vmul.f32 %v1160_v27, %v910_v59  ;;  %v1161_v45 = vpop.f32.mrf.mxu0 }
 0x17f   : > { %1173 = vadd.xlane.f32.xlu2 %v1169_v26  ;;  %v1164_v31 = vpop.f32.mrf.mxu1 }
 0x182   : > { %v991_v34 = vpop.f32.mrf.mxu2  ;;  %v1094_v46 = vpop.f32.mrf.mxu3 }
 0x183   : > { %1000 = vst [vmem:[%s420_s30 + $0x8] sm:$0xff] %v991_v34  ;;  %v1162_v28 = vadd.f32 %v1161_v45, %v1094_v46 }
 0x185   : > { %v1170_v30 = vmul.f32 %v1162_v28, %v911_v61 }
 0x187   : > { %1175 = vadd.xlane.f32.xlu0 %v1170_v30  ;;  %v1166_v37 = vpop.f32.mrf.mxu1 }
 0x18a   : > { %v994_v16 = vpop.f32.mrf.mxu2  ;;  %v1097_v40 = vpop.f32.mrf.mxu3 }
 0x18b   : > { %1001 = vst [vmem:[%s420_s30 + $0x10] sm:$0xff] %v994_v16  ;;  %v1165_v33 = vadd.f32 %v1164_v31, %v1097_v40 }
 0x18d   : > { %v1171_v36 = vmul.f32 %v1165_v33, %v912_v32 }
 0x18f   : > { %1177 = vadd.xlane.f32.xlu1 %v1171_v36 }
 0x192   : > { %v996_v38 = vpop.f32.mrf.mxu2  ;;  %v1099_v41 = vpop.f32.mrf.mxu3 }
 0x193   : > { %1002 = vst [vmem:[%s420_s30 + $0x18] sm:$0xff] %v996_v38  ;;  %v1167_v43 = vadd.f32 %v1166_v37, %v1099_v41 }
 0x195   : > { %v1172_v44 = vmul.f32 %v1167_v43, %v913_v39 }
 0x197   : > { %1179 = vadd.xlane.f32.xlu2 %v1172_v44 }
 0x1f2   : > { %v1174_v48 = vpop.xlane.xlu2 %1173 }
 0x1f3   : > { %v1181_v51 = vsub.f32 %v1997_v42, %v1174_v48 }
 0x1f5   : > { %v1185_v52 = vmax.f32 %v1181_v51, 1e-08 }
 0x1f7   : > { %1189 = vst [vmem:[%s426_s13] sm:$0xff] %v1185_v52 }
 0x1fa   : > { %v1176_v49 = vpop.xlane.xlu0 %1175 }
 0x1fb   : > { %v1182_v55 = vsub.f32 %v2000_v47, %v1176_v49 }
 0x1fd   : > { %v1186_v56 = vmax.f32 %v1182_v55, 1e-08 }
 0x1ff   : > { %1190 = vst [vmem:[%s426_s13 + $0x8] sm:$0xff] %v1186_v56 }
 0x202   : > { %v1178_v59 = vpop.xlane.xlu1 %1177 }
 0x203   : > { %v1183_v61 = vsub.f32 %v2006_v57, %v1178_v59 }
 0x205   : > { %v1187_v63 = vmax.f32 %v1183_v61, 1e-08 }
 0x207   : > { %1191 = vst [vmem:[%s426_s13 + $0x10] sm:$0xff] %v1187_v63 }
 0x20a   : > { %v1180_v0 = vpop.xlane.xlu2 %1179 }
 0x20b   : > { %v1184_v42 = vsub.f32 %v2004_v53, %v1180_v0 }
 0x20d   : > { %v1188_v2 = vmax.f32 %v1184_v42, 1e-08 }
 0x20f   : > { %1192 = vst [vmem:[%s426_s13 + $0x18] sm:$0xff] %v1188_v2 }
 0x210 PF: > { %s22_s27 = sadd.s32 1, %s1855_s27  }
 0x211   : > { %p19_p7 = scmp.ge.s32.totalorder %s22_s27, 4  }
 0x213   :  { %21 = sbr.rel (!%p19_p7) target bundleno = 3 (0x3), region = 114 }
 0x218   :  { %1232 = vsyncpa [#allocation3], 1 }
 0x219   :  { %1234 = vsyncpa [#allocation3 + $0x1], 1 }
 0x21a   :  { %1235 = vsyncpa [#allocation5], 1 }
 0x21b   :  { %1236 = vsyncpa [#allocation8], 1 }

</bundles_post_ra>
